<compile_context>
chip_gen: v6e
topology: v6e:2x2x1
jax: 0.10.0
libtpu: 0.0.40
codegen_flags: <defaults>
</compile_context>

<pallas_src>
import functools

import jax
import jax.numpy as jnp
from jax.experimental import pallas as pl
from jax.experimental.pallas import tpu as pltpu


def _round_up(x, m):
    return (x + m - 1) // m * m


# ---------------------------------------------------------------------------
# Pallas kernels
# ---------------------------------------------------------------------------
def _conv_pool_relu_kernel(p_ref, w_ref, b_ref, o_ref):
    """Fused conv (4 phase matmuls) + 2x2/2 max-pool + bias + ReLU.

    p_ref : (4, K, nt) bf16  stacked im2col patches, one slab per pool phase
    w_ref : (Cout, K)  bf16  flattened conv weight (loaded once, reused 4x)
    b_ref : (Cout, 1)  f32   bias (broadcast over lanes)
    o_ref : (Cout, nt) bf16  pooled + ReLU'd activation, lane-dense spatial
    """
    w = w_ref[...]
    m = jnp.dot(w, p_ref[0], preferred_element_type=jnp.float32)
    for ph in range(1, 4):
        m = jnp.maximum(
            m, jnp.dot(w, p_ref[ph], preferred_element_type=jnp.float32))
    m = m + b_ref[...]
    o_ref[...] = jnp.maximum(m, 0.0).astype(o_ref.dtype)


def _fc_head_kernel(x_ref, w1_ref, b1_ref, w2_ref, b2_ref, w3_ref, b3_ref,
                    o_ref):
    """fc1 -> ReLU -> fc2 -> ReLU -> fc3, fully fused, flatten fused too.

    x_ref  : (C2, bt, HW) bf16   conv2 activation in its natural layout
    w1_ref : (C2, HW, 512) bf16  fc1 W^T reshaped so sum_c matches torch flatten
    others : (in, out) bf16 weights, (1, out) f32 biases
    """
    C2 = x_ref.shape[0]
    h = jnp.dot(x_ref[0], w1_ref[0], preferred_element_type=jnp.float32)
    for c in range(1, C2):
        h = h + jnp.dot(x_ref[c], w1_ref[c],
                        preferred_element_type=jnp.float32)
    h = jnp.maximum(h + b1_ref[...], 0.0)
    h = jnp.maximum(
        jnp.dot(h.astype(w2_ref.dtype), w2_ref[...],
                preferred_element_type=jnp.float32) + b2_ref[...], 0.0)
    o_ref[...] = (jnp.dot(h.astype(w3_ref.dtype), w3_ref[...],
                          preferred_element_type=jnp.float32)
                  + b3_ref[...]).astype(o_ref.dtype)


# ---------------------------------------------------------------------------
# Wrappers / glue
# ---------------------------------------------------------------------------
def _stacked_phase_patches(x_cf, kh, kw):
    """Stack im2col patches for the four 2x2 pool phases into one operand.

    x_cf: (Cin, B, H, W).  Returns (4, K, N) bf16 with K = Cin*kh*kw ordered
    (c, di, dj) -- matching the conv-weight flatten -- and N = B*Hp*Wp.
    """
    C, B, H, W = x_cf.shape
    Ho, Wo = H - kh + 1, W - kw + 1
    Hp, Wp = Ho // 2, Wo // 2
    phases = []
    for pi in (0, 1):
        for pj in (0, 1):
            cols = []
            for di in range(kh):
                for dj in range(kw):
                    cols.append(x_cf[:, :,
                                     pi + di: pi + di + 2 * Hp: 2,
                                     pj + dj: pj + dj + 2 * Wp: 2])
            p = jnp.stack(cols, axis=1).reshape(C * kh * kw, B * Hp * Wp)
            phases.append(p)
    return jnp.stack(phases, axis=0).astype(jnp.bfloat16)      # (4, K, N)


def conv_relu_pool(x_cf, wmat, b, *, kh=5, kw=5, nt_max=512):
    """valid conv (stride 1) + ReLU + 2x2/2 max-pool, one pipelined pallas_call.

    x_cf : (Cin, B, H, W) bf16 channel-first activation
    wmat : (Cout, Cin*kh*kw) bf16, b: (Cout,) f32
    out  : (Cout, B, Hp, Wp) bf16
    """
    Cin, B, H, W = x_cf.shape
    Cout, K = wmat.shape
    assert K == Cin * kh * kw
    Ho, Wo = H - kh + 1, W - kw + 1
    assert Ho % 2 == 0 and Wo % 2 == 0, "2x2/2 max-pool needs even conv output"
    Hp, Wp = Ho // 2, Wo // 2
    N = B * Hp * Wp

    patches = _stacked_phase_patches(x_cf, kh, kw)              # (4, K, N)
    nt = min(nt_max, _round_up(N, 128))
    Np = _round_up(N, nt)
    if Np != N:
        patches = jnp.pad(patches, ((0, 0), (0, 0), (0, Np - N)))

    cost = pl.CostEstimate(
        flops=int(2 * 4 * Cout * K * Np),
        transcendentals=0,
        bytes_accessed=int(patches.size * 2 + wmat.size * 2 + Cout * Np * 2),
    )

    out = pl.pallas_call(
        _conv_pool_relu_kernel,
        out_shape=jax.ShapeDtypeStruct((Cout, Np), jnp.bfloat16),
        grid=(Np // nt,),
        in_specs=[
            pl.BlockSpec((4, K, nt), lambda n: (0, 0, n)),   # streamed patches
            pl.BlockSpec((Cout, K), lambda n: (0, 0)),       # resident weight
            pl.BlockSpec((Cout, 1), lambda n: (0, 0)),       # resident bias
        ],
        out_specs=pl.BlockSpec((Cout, nt), lambda n: (0, n)),
        compiler_params=pltpu.CompilerParams(
            dimension_semantics=("parallel",),
            vmem_limit_bytes=32 * 1024 * 1024),
        cost_estimate=cost,
    )(patches, wmat, b.reshape(Cout, 1))
    return out[:, :N].reshape(Cout, B, Hp, Wp)


def fc_head(xc, params, num_out):
    """Fused flatten + fc1->ReLU->fc2->ReLU->fc3.  xc: (C2, B, HW) bf16."""
    C2, B, HW = xc.shape
    H1 = params["fc1_w"].shape[2]
    H2 = params["fc2_w"].shape[1]
    out_pad = params["fc3_w"].shape[1]

    bt = 128 if (B > 128 and B % 128 == 0) else B
    grid = (B // bt,)

    cost = pl.CostEstimate(
        flops=int(2 * B * (C2 * HW * H1 + H1 * H2 + H2 * out_pad)),
        transcendentals=0,
        bytes_accessed=int(xc.size * 2 + params["fc1_w"].size * 2
                           + params["fc2_w"].size * 2
                           + params["fc3_w"].size * 2 + B * out_pad * 4),
    )

    out = pl.pallas_call(
        _fc_head_kernel,
        out_shape=jax.ShapeDtypeStruct((B, out_pad), jnp.float32),
        grid=grid,
        in_specs=[
            pl.BlockSpec((C2, bt, HW), lambda i: (0, i, 0)),   # batch-tiled x
            pl.BlockSpec((C2, HW, H1), lambda i: (0, 0, 0)),   # resident weights
            pl.BlockSpec((1, H1), lambda i: (0, 0)),
            pl.BlockSpec((H1, H2), lambda i: (0, 0)),
            pl.BlockSpec((1, H2), lambda i: (0, 0)),
            pl.BlockSpec((H2, out_pad), lambda i: (0, 0)),
            pl.BlockSpec((1, out_pad), lambda i: (0, 0)),
        ],
        out_specs=pl.BlockSpec((bt, out_pad), lambda i: (i, 0)),
        compiler_params=pltpu.CompilerParams(
            dimension_semantics=("parallel",),
            vmem_limit_bytes=32 * 1024 * 1024),
        cost_estimate=cost,
    )(xc,
      params["fc1_w"], params["fc1_b"].reshape(1, -1),
      params["fc2_w"], params["fc2_b"].reshape(1, -1),
      params["fc3_w"], params["fc3_b"].reshape(1, -1))
    return out[:, :num_out]


def init_params(key, num_out):
    keys = jax.random.split(key, 10)

    def u(k, shape, fan_in, dtype=jnp.float32):
        bound = 1.0 / jnp.sqrt(jnp.float32(fan_in))
        return jax.random.uniform(k, shape, jnp.float32,
                                  -bound, bound).astype(dtype)

    out_pad = _round_up(num_out, 128)
    fc3_w = jnp.pad(u(keys[8], (128, num_out), 128),
                    ((0, 0), (0, out_pad - num_out))).astype(jnp.bfloat16)
    fc3_b = jnp.pad(u(keys[9], (num_out,), 128), (0, out_pad - num_out))

    return {
        # conv weights stored pre-flattened (Cout, Cin*kh*kw) in (c,di,dj)
        # order (matches the im2col patch ordering), bf16.
        "conv1_w": u(keys[0], (6, 3 * 25), 3 * 25, jnp.bfloat16),
        "conv1_b": u(keys[1], (6,), 3 * 25),
        "conv2_w": u(keys[2], (16, 6 * 25), 6 * 25, jnp.bfloat16),
        "conv2_b": u(keys[3], (16,), 6 * 25),
        # fc1 weight stored as W^T reshaped to (C2=16, Hp*Wp=169, 512): row
        # index (c, hw) matches torch.flatten on NCHW, so the flatten is fused
        # into the FC kernel's per-channel contraction.
        "fc1_w":   u(keys[4], (16, 169, 512), 2704, jnp.bfloat16),
        "fc1_b":   u(keys[5], (512,), 2704),
        "fc2_w":   u(keys[6], (512, 128), 512, jnp.bfloat16),
        "fc2_b":   u(keys[7], (128,), 512),
        # fc3 padded to 128 output lanes (zeros beyond num_out; sliced off).
        "fc3_w":   fc3_w,
        "fc3_b":   fc3_b,
    }


def cnn_forward(params, x, num_out):
    """x: (B, 3, 64, 64) NCHW (64 implied by fc1 in_features = 16*13*13)."""
    xc = jnp.transpose(x, (1, 0, 2, 3)).astype(jnp.bfloat16)       # (3,B,64,64)
    xc = conv_relu_pool(xc, params["conv1_w"], params["conv1_b"])  # (6,B,30,30)
    xc = conv_relu_pool(xc, params["conv2_w"], params["conv2_b"])  # (16,B,13,13)
    C2, B, Hp, Wp = xc.shape
    xc = xc.reshape(C2, B, Hp * Wp)                                # (16,B,169)
    # note: self.softmax is defined in the torch __init__ but never applied in
    # forward(), so it is intentionally not applied here either.
    return fc_head(xc, params, num_out)                            # (B, out)


if __name__ == "__main__":
    key = jax.random.PRNGKey(0)
    pkey, xkey = jax.random.split(key)
    num_out = 10
    params = init_params(pkey, num_out)
    x = jax.random.normal(xkey, (2, 3, 64, 64), jnp.float32)

    fwd = jax.jit(functools.partial(cnn_forward, num_out=num_out))
    logits = jax.block_until_ready(fwd(params, x))
    assert logits.shape == (2, num_out)
    assert logits.dtype == jnp.float32
    print("KERNEL_OK")
</pallas_src>

<mosaic_0001>
module attributes {stable_mosaic.version = 11 : i64} {
  func.func @_conv_pool_relu_kernel(%arg0: i32, %arg1: memref<4x75x512xbf16, #tpu.memory_space<vmem>>, %arg2: memref<6x75xbf16, #tpu.memory_space<vmem>>, %arg3: memref<6x1xf32, #tpu.memory_space<vmem>>, %arg4: memref<6x512xbf16, #tpu.memory_space<vmem>>) attributes {dimension_semantics = [#tpu.dimension_semantics<parallel>], iteration_bounds = array<i64: 4>, scalar_prefetch = 0 : i64, scratch_operands = 0 : i64, tpu.core_type = #tpu.core_type<tc>, window_params = [{transform_indices = @transform_0, window_bounds = array<i64: 4, 75, 512>}, {pipeline_mode = #tpu.pipeline_mode<synchronous>, transform_indices = @transform_1, window_bounds = array<i64: 6, 75>}, {pipeline_mode = #tpu.pipeline_mode<synchronous>, transform_indices = @transform_2, window_bounds = array<i64: 6, 1>}, {transform_indices = @transform_3, window_bounds = array<i64: 6, 512>}]} {
    %c0 = arith.constant 0 : index
    %c0_0 = arith.constant 0 : index
    %0 = vector.load %arg2[%c0, %c0_0] : memref<6x75xbf16, #tpu.memory_space<vmem>>, vector<6x75xbf16>
    %c0_1 = arith.constant 0 : index
    %c0_2 = arith.constant 0 : index
    %c0_3 = arith.constant 0 : index
    %1 = vector.load %arg1[%c0_1, %c0_2, %c0_3] : memref<4x75x512xbf16, #tpu.memory_space<vmem>>, vector<1x75x512xbf16>
    %2 = vector.shape_cast %1 : vector<1x75x512xbf16> to vector<75x512xbf16>
    %cst = arith.constant dense<0.000000e+00> : vector<6x512xf32>
    %3 = tpu.matmul %0, %2, %cst {dimension_numbers = #tpu.dot_dimension_numbers<[1], [0], [0], [1], [0, 0, 1, 1], [], []>} : vector<6x75xbf16>, vector<75x512xbf16>, vector<6x512xf32> -> vector<6x512xf32>
    %c1 = arith.constant 1 : index
    %c0_4 = arith.constant 0 : index
    %c0_5 = arith.constant 0 : index
    %4 = vector.load %arg1[%c1, %c0_4, %c0_5] : memref<4x75x512xbf16, #tpu.memory_space<vmem>>, vector<1x75x512xbf16>
    %5 = vector.shape_cast %4 : vector<1x75x512xbf16> to vector<75x512xbf16>
    %cst_6 = arith.constant dense<0.000000e+00> : vector<6x512xf32>
    %6 = tpu.matmul %0, %5, %cst_6 {dimension_numbers = #tpu.dot_dimension_numbers<[1], [0], [0], [1], [0, 0, 1, 1], [], []>} : vector<6x75xbf16>, vector<75x512xbf16>, vector<6x512xf32> -> vector<6x512xf32>
    %7 = arith.maximumf %3, %6 : vector<6x512xf32>
    %c2 = arith.constant 2 : index
    %c0_7 = arith.constant 0 : index
    %c0_8 = arith.constant 0 : index
    %8 = vector.load %arg1[%c2, %c0_7, %c0_8] : memref<4x75x512xbf16, #tpu.memory_space<vmem>>, vector<1x75x512xbf16>
    %9 = vector.shape_cast %8 : vector<1x75x512xbf16> to vector<75x512xbf16>
    %cst_9 = arith.constant dense<0.000000e+00> : vector<6x512xf32>
    %10 = tpu.matmul %0, %9, %cst_9 {dimension_numbers = #tpu.dot_dimension_numbers<[1], [0], [0], [1], [0, 0, 1, 1], [], []>} : vector<6x75xbf16>, vector<75x512xbf16>, vector<6x512xf32> -> vector<6x512xf32>
    %11 = arith.maximumf %7, %10 : vector<6x512xf32>
    %c3 = arith.constant 3 : index
    %c0_10 = arith.constant 0 : index
    %c0_11 = arith.constant 0 : index
    %12 = vector.load %arg1[%c3, %c0_10, %c0_11] : memref<4x75x512xbf16, #tpu.memory_space<vmem>>, vector<1x75x512xbf16>
    %13 = vector.shape_cast %12 : vector<1x75x512xbf16> to vector<75x512xbf16>
    %cst_12 = arith.constant dense<0.000000e+00> : vector<6x512xf32>
    %14 = tpu.matmul %0, %13, %cst_12 {dimension_numbers = #tpu.dot_dimension_numbers<[1], [0], [0], [1], [0, 0, 1, 1], [], []>} : vector<6x75xbf16>, vector<75x512xbf16>, vector<6x512xf32> -> vector<6x512xf32>
    %15 = arith.maximumf %11, %14 : vector<6x512xf32>
    %c0_13 = arith.constant 0 : index
    %c0_14 = arith.constant 0 : index
    %16 = vector.load %arg3[%c0_13, %c0_14] : memref<6x1xf32, #tpu.memory_space<vmem>>, vector<6x1xf32>
    %17 = vector.broadcast %16 : vector<6x1xf32> to vector<6x512xf32>
    %18 = arith.addf %15, %17 : vector<6x512xf32>
    %cst_15 = arith.constant 0.000000e+00 : f32
    %19 = vector.broadcast %cst_15 : f32 to vector<6x512xf32>
    %20 = arith.maximumf %18, %19 : vector<6x512xf32>
    %21 = arith.truncf %20 : vector<6x512xf32> to vector<6x512xbf16>
    %c0_16 = arith.constant 0 : index
    %c0_17 = arith.constant 0 : index
    %22 = vector.load %arg4[%c0_16, %c0_17] : memref<6x512xbf16, #tpu.memory_space<vmem>>, vector<6x512xbf16>
    tpu.vector_store %arg4[%c0_16, %c0_17], %21 {strides = array<i32>} : memref<6x512xbf16, #tpu.memory_space<vmem>>, vector<6x512xbf16>,
    return
  }
  func.func @transform_0(%arg0: i32) -> (i32, i32, i32) {
    %c0_i32 = arith.constant 0 : i32
    %c0_i32_0 = arith.constant 0 : i32
    %c0_i32_1 = arith.constant 0 : i32
    return %c0_i32, %c0_i32_0, %arg0 : i32, i32, i32
  }
  func.func @transform_1(%arg0: i32) -> (i32, i32) {
    %c0_i32 = arith.constant 0 : i32
    %c0_i32_0 = arith.constant 0 : i32
    %c0_i32_1 = arith.constant 0 : i32
    return %c0_i32, %c0_i32_0 : i32, i32
  }
  func.func @transform_2(%arg0: i32) -> (i32, i32) {
    %c0_i32 = arith.constant 0 : i32
    %c0_i32_0 = arith.constant 0 : i32
    %c0_i32_1 = arith.constant 0 : i32
    return %c0_i32, %c0_i32_0 : i32, i32
  }
  func.func @transform_3(%arg0: i32) -> (i32, i32) {
    %c0_i32 = arith.constant 0 : i32
    %c0_i32_0 = arith.constant 0 : i32
    return %c0_i32, %arg0 : i32, i32
  }
}

module attributes {stable_mosaic.version = 11 : i64} {
  func.func @_conv_pool_relu_kernel(%arg0: i32, %arg1: memref<4x150x384xbf16, #tpu.memory_space<vmem>>, %arg2: memref<16x150xbf16, #tpu.memory_space<vmem>>, %arg3: memref<16x1xf32, #tpu.memory_space<vmem>>, %arg4: memref<16x384xbf16, #tpu.memory_space<vmem>>) attributes {dimension_semantics = [#tpu.dimension_semantics<parallel>], iteration_bounds = array<i64: 1>, scalar_prefetch = 0 : i64, scratch_operands = 0 : i64, tpu.core_type = #tpu.core_type<tc>, window_params = [{transform_indices = @transform_0, window_bounds = array<i64: 4, 150, 384>}, {pipeline_mode = #tpu.pipeline_mode<synchronous>, transform_indices = @transform_1, window_bounds = array<i64: 16, 150>}, {pipeline_mode = #tpu.pipeline_mode<synchronous>, transform_indices = @transform_2, window_bounds = array<i64: 16, 1>}, {transform_indices = @transform_3, window_bounds = array<i64: 16, 384>}]} {
    %c0 = arith.constant 0 : index
    %c0_0 = arith.constant 0 : index
    %0 = vector.load %arg2[%c0, %c0_0] : memref<16x150xbf16, #tpu.memory_space<vmem>>, vector<16x150xbf16>
    %c0_1 = arith.constant 0 : index
    %c0_2 = arith.constant 0 : index
    %c0_3 = arith.constant 0 : index
    %1 = vector.load %arg1[%c0_1, %c0_2, %c0_3] : memref<4x150x384xbf16, #tpu.memory_space<vmem>>, vector<1x150x384xbf16>
    %2 = vector.shape_cast %1 : vector<1x150x384xbf16> to vector<150x384xbf16>
    %cst = arith.constant dense<0.000000e+00> : vector<16x384xf32>
    %3 = tpu.matmul %0, %2, %cst {dimension_numbers = #tpu.dot_dimension_numbers<[1], [0], [0], [1], [0, 0, 1, 1], [], []>} : vector<16x150xbf16>, vector<150x384xbf16>, vector<16x384xf32> -> vector<16x384xf32>
    %c1 = arith.constant 1 : index
    %c0_4 = arith.constant 0 : index
    %c0_5 = arith.constant 0 : index
    %4 = vector.load %arg1[%c1, %c0_4, %c0_5] : memref<4x150x384xbf16, #tpu.memory_space<vmem>>, vector<1x150x384xbf16>
    %5 = vector.shape_cast %4 : vector<1x150x384xbf16> to vector<150x384xbf16>
    %cst_6 = arith.constant dense<0.000000e+00> : vector<16x384xf32>
    %6 = tpu.matmul %0, %5, %cst_6 {dimension_numbers = #tpu.dot_dimension_numbers<[1], [0], [0], [1], [0, 0, 1, 1], [], []>} : vector<16x150xbf16>, vector<150x384xbf16>, vector<16x384xf32> -> vector<16x384xf32>
    %7 = arith.maximumf %3, %6 : vector<16x384xf32>
    %c2 = arith.constant 2 : index
    %c0_7 = arith.constant 0 : index
    %c0_8 = arith.constant 0 : index
    %8 = vector.load %arg1[%c2, %c0_7, %c0_8] : memref<4x150x384xbf16, #tpu.memory_space<vmem>>, vector<1x150x384xbf16>
    %9 = vector.shape_cast %8 : vector<1x150x384xbf16> to vector<150x384xbf16>
    %cst_9 = arith.constant dense<0.000000e+00> : vector<16x384xf32>
    %10 = tpu.matmul %0, %9, %cst_9 {dimension_numbers = #tpu.dot_dimension_numbers<[1], [0], [0], [1], [0, 0, 1, 1], [], []>} : vector<16x150xbf16>, vector<150x384xbf16>, vector<16x384xf32> -> vector<16x384xf32>
    %11 = arith.maximumf %7, %10 : vector<16x384xf32>
    %c3 = arith.constant 3 : index
    %c0_10 = arith.constant 0 : index
    %c0_11 = arith.constant 0 : index
    %12 = vector.load %arg1[%c3, %c0_10, %c0_11] : memref<4x150x384xbf16, #tpu.memory_space<vmem>>, vector<1x150x384xbf16>
    %13 = vector.shape_cast %12 : vector<1x150x384xbf16> to vector<150x384xbf16>
    %cst_12 = arith.constant dense<0.000000e+00> : vector<16x384xf32>
    %14 = tpu.matmul %0, %13, %cst_12 {dimension_numbers = #tpu.dot_dimension_numbers<[1], [0], [0], [1], [0, 0, 1, 1], [], []>} : vector<16x150xbf16>, vector<150x384xbf16>, vector<16x384xf32> -> vector<16x384xf32>
    %15 = arith.maximumf %11, %14 : vector<16x384xf32>
    %c0_13 = arith.constant 0 : index
    %c0_14 = arith.constant 0 : index
    %16 = vector.load %arg3[%c0_13, %c0_14] : memref<16x1xf32, #tpu.memory_space<vmem>>, vector<16x1xf32>
    %17 = vector.broadcast %16 : vector<16x1xf32> to vector<16x384xf32>
    %18 = arith.addf %15, %17 : vector<16x384xf32>
    %cst_15 = arith.constant 0.000000e+00 : f32
    %19 = vector.broadcast %cst_15 : f32 to vector<16x384xf32>
    %20 = arith.maximumf %18, %19 : vector<16x384xf32>
    %21 = arith.truncf %20 : vector<16x384xf32> to vector<16x384xbf16>
    %c0_16 = arith.constant 0 : index
    %c0_17 = arith.constant 0 : index
    %22 = vector.load %arg4[%c0_16, %c0_17] : memref<16x384xbf16, #tpu.memory_space<vmem>>, vector<16x384xbf16>
    tpu.vector_store %arg4[%c0_16, %c0_17], %21 {strides = array<i32>} : memref<16x384xbf16, #tpu.memory_space<vmem>>, vector<16x384xbf16>,
    return
  }
  func.func @transform_0(%arg0: i32) -> (i32, i32, i32) {
    %c0_i32 = arith.constant 0 : i32
    %c0_i32_0 = arith.constant 0 : i32
    %c0_i32_1 = arith.constant 0 : i32
    return %c0_i32, %c0_i32_0, %arg0 : i32, i32, i32
  }
  func.func @transform_1(%arg0: i32) -> (i32, i32) {
    %c0_i32 = arith.constant 0 : i32
    %c0_i32_0 = arith.constant 0 : i32
    %c0_i32_1 = arith.constant 0 : i32
    return %c0_i32, %c0_i32_0 : i32, i32
  }
  func.func @transform_2(%arg0: i32) -> (i32, i32) {
    %c0_i32 = arith.constant 0 : i32
    %c0_i32_0 = arith.constant 0 : i32
    %c0_i32_1 = arith.constant 0 : i32
    return %c0_i32, %c0_i32_0 : i32, i32
  }
  func.func @transform_3(%arg0: i32) -> (i32, i32) {
    %c0_i32 = arith.constant 0 : i32
    %c0_i32_0 = arith.constant 0 : i32
    return %c0_i32, %arg0 : i32, i32
  }
}

module attributes {stable_mosaic.version = 11 : i64} {
  func.func @_fc_head_kernel(%arg0: i32, %arg1: memref<16x2x169xbf16, #tpu.memory_space<vmem>>, %arg2: memref<16x169x512xbf16, #tpu.memory_space<vmem>>, %arg3: memref<1x512xf32, #tpu.memory_space<vmem>>, %arg4: memref<512x128xbf16, #tpu.memory_space<vmem>>, %arg5: memref<1x128xf32, #tpu.memory_space<vmem>>, %arg6: memref<128x128xbf16, #tpu.memory_space<vmem>>, %arg7: memref<1x128xf32, #tpu.memory_space<vmem>>, %arg8: memref<2x128xf32, #tpu.memory_space<vmem>>) attributes {dimension_semantics = [#tpu.dimension_semantics<parallel>], iteration_bounds = array<i64: 1>, scalar_prefetch = 0 : i64, scratch_operands = 0 : i64, tpu.core_type = #tpu.core_type<tc>, window_params = [{transform_indices = @transform_0, window_bounds = array<i64: 16, 2, 169>}, {pipeline_mode = #tpu.pipeline_mode<synchronous>, transform_indices = @transform_1, window_bounds = array<i64: 16, 169, 512>}, {pipeline_mode = #tpu.pipeline_mode<synchronous>, transform_indices = @transform_2, window_bounds = array<i64: 1, 512>}, {pipeline_mode = #tpu.pipeline_mode<synchronous>, transform_indices = @transform_3, window_bounds = array<i64: 512, 128>}, {pipeline_mode = #tpu.pipeline_mode<synchronous>, transform_indices = @transform_4, window_bounds = array<i64: 1, 128>}, {pipeline_mode = #tpu.pipeline_mode<synchronous>, transform_indices = @transform_5, window_bounds = array<i64: 128, 128>}, {pipeline_mode = #tpu.pipeline_mode<synchronous>, transform_indices = @transform_6, window_bounds = array<i64: 1, 128>}, {transform_indices = @transform_7, window_bounds = array<i64: 2, 128>}]} {
    %c0 = arith.constant 0 : index
    %c0_0 = arith.constant 0 : index
    %c0_1 = arith.constant 0 : index
    %0 = vector.load %arg1[%c0, %c0_0, %c0_1] : memref<16x2x169xbf16, #tpu.memory_space<vmem>>, vector<1x2x169xbf16>
    %1 = vector.shape_cast %0 : vector<1x2x169xbf16> to vector<2x169xbf16>
    %c0_2 = arith.constant 0 : index
    %c0_3 = arith.constant 0 : index
    %c0_4 = arith.constant 0 : index
    %2 = vector.load %arg2[%c0_2, %c0_3, %c0_4] : memref<16x169x512xbf16, #tpu.memory_space<vmem>>, vector<1x169x512xbf16>
    %3 = vector.shape_cast %2 : vector<1x169x512xbf16> to vector<169x512xbf16>
    %cst = arith.constant dense<0.000000e+00> : vector<2x512xf32>
    %4 = tpu.matmul %1, %3, %cst {dimension_numbers = #tpu.dot_dimension_numbers<[1], [0], [0], [1], [0, 0, 1, 1], [], []>} : vector<2x169xbf16>, vector<169x512xbf16>, vector<2x512xf32> -> vector<2x512xf32>
    %c1 = arith.constant 1 : index
    %c0_5 = arith.constant 0 : index
    %c0_6 = arith.constant 0 : index
    %5 = vector.load %arg1[%c1, %c0_5, %c0_6] : memref<16x2x169xbf16, #tpu.memory_space<vmem>>, vector<1x2x169xbf16>
    %6 = vector.shape_cast %5 : vector<1x2x169xbf16> to vector<2x169xbf16>
    %c1_7 = arith.constant 1 : index
    %c0_8 = arith.constant 0 : index
    %c0_9 = arith.constant 0 : index
    %7 = vector.load %arg2[%c1_7, %c0_8, %c0_9] : memref<16x169x512xbf16, #tpu.memory_space<vmem>>, vector<1x169x512xbf16>
    %8 = vector.shape_cast %7 : vector<1x169x512xbf16> to vector<169x512xbf16>
    %cst_10 = arith.constant dense<0.000000e+00> : vector<2x512xf32>
    %9 = tpu.matmul %6, %8, %cst_10 {dimension_numbers = #tpu.dot_dimension_numbers<[1], [0], [0], [1], [0, 0, 1, 1], [], []>} : vector<2x169xbf16>, vector<169x512xbf16>, vector<2x512xf32> -> vector<2x512xf32>
    %10 = arith.addf %4, %9 : vector<2x512xf32>
    %c2 = arith.constant 2 : index
    %c0_11 = arith.constant 0 : index
    %c0_12 = arith.constant 0 : index
    %11 = vector.load %arg1[%c2, %c0_11, %c0_12] : memref<16x2x169xbf16, #tpu.memory_space<vmem>>, vector<1x2x169xbf16>
    %12 = vector.shape_cast %11 : vector<1x2x169xbf16> to vector<2x169xbf16>
    %c2_13 = arith.constant 2 : index
    %c0_14 = arith.constant 0 : index
    %c0_15 = arith.constant 0 : index
    %13 = vector.load %arg2[%c2_13, %c0_14, %c0_15] : memref<16x169x512xbf16, #tpu.memory_space<vmem>>, vector<1x169x512xbf16>
    %14 = vector.shape_cast %13 : vector<1x169x512xbf16> to vector<169x512xbf16>
    %cst_16 = arith.constant dense<0.000000e+00> : vector<2x512xf32>
    %15 = tpu.matmul %12, %14, %cst_16 {dimension_numbers = #tpu.dot_dimension_numbers<[1], [0], [0], [1], [0, 0, 1, 1], [], []>} : vector<2x169xbf16>, vector<169x512xbf16>, vector<2x512xf32> -> vector<2x512xf32>
    %16 = arith.addf %10, %15 : vector<2x512xf32>
    %c3 = arith.constant 3 : index
    %c0_17 = arith.constant 0 : index
    %c0_18 = arith.constant 0 : index
    %17 = vector.load %arg1[%c3, %c0_17, %c0_18] : memref<16x2x169xbf16, #tpu.memory_space<vmem>>, vector<1x2x169xbf16>
    %18 = vector.shape_cast %17 : vector<1x2x169xbf16> to vector<2x169xbf16>
    %c3_19 = arith.constant 3 : index
    %c0_20 = arith.constant 0 : index
    %c0_21 = arith.constant 0 : index
    %19 = vector.load %arg2[%c3_19, %c0_20, %c0_21] : memref<16x169x512xbf16, #tpu.memory_space<vmem>>, vector<1x169x512xbf16>
    %20 = vector.shape_cast %19 : vector<1x169x512xbf16> to vector<169x512xbf16>
    %cst_22 = arith.constant dense<0.000000e+00> : vector<2x512xf32>
    %21 = tpu.matmul %18, %20, %cst_22 {dimension_numbers = #tpu.dot_dimension_numbers<[1], [0], [0], [1], [0, 0, 1, 1], [], []>} : vector<2x169xbf16>, vector<169x512xbf16>, vector<2x512xf32> -> vector<2x512xf32>
    %22 = arith.addf %16, %21 : vector<2x512xf32>
    %c4 = arith.constant 4 : index
    %c0_23 = arith.constant 0 : index
    %c0_24 = arith.constant 0 : index
    %23 = vector.load %arg1[%c4, %c0_23, %c0_24] : memref<16x2x169xbf16, #tpu.memory_space<vmem>>, vector<1x2x169xbf16>
    %24 = vector.shape_cast %23 : vector<1x2x169xbf16> to vector<2x169xbf16>
    %c4_25 = arith.constant 4 : index
    %c0_26 = arith.constant 0 : index
    %c0_27 = arith.constant 0 : index
    %25 = vector.load %arg2[%c4_25, %c0_26, %c0_27] : memref<16x169x512xbf16, #tpu.memory_space<vmem>>, vector<1x169x512xbf16>
    %26 = vector.shape_cast %25 : vector<1x169x512xbf16> to vector<169x512xbf16>
    %cst_28 = arith.constant dense<0.000000e+00> : vector<2x512xf32>
    %27 = tpu.matmul %24, %26, %cst_28 {dimension_numbers = #tpu.dot_dimension_numbers<[1], [0], [0], [1], [0, 0, 1, 1], [], []>} : vector<2x169xbf16>, vector<169x512xbf16>, vector<2x512xf32> -> vector<2x512xf32>
    %28 = arith.addf %22, %27 : vector<2x512xf32>
    %c5 = arith.constant 5 : index
    %c0_29 = arith.constant 0 : index
    %c0_30 = arith.constant 0 : index
    %29 = vector.load %arg1[%c5, %c0_29, %c0_30] : memref<16x2x169xbf16, #tpu.memory_space<vmem>>, vector<1x2x169xbf16>
    %30 = vector.shape_cast %29 : vector<1x2x169xbf16> to vector<2x169xbf16>
    %c5_31 = arith.constant 5 : index
    %c0_32 = arith.constant 0 : index
    %c0_33 = arith.constant 0 : index
    %31 = vector.load %arg2[%c5_31, %c0_32, %c0_33] : memref<16x169x512xbf16, #tpu.memory_space<vmem>>, vector<1x169x512xbf16>
    %32 = vector.shape_cast %31 : vector<1x169x512xbf16> to vector<169x512xbf16>
    %cst_34 = arith.constant dense<0.000000e+00> : vector<2x512xf32>
    %33 = tpu.matmul %30, %32, %cst_34 {dimension_numbers = #tpu.dot_dimension_numbers<[1], [0], [0], [1], [0, 0, 1, 1], [], []>} : vector<2x169xbf16>, vector<169x512xbf16>, vector<2x512xf32> -> vector<2x512xf32>
    %34 = arith.addf %28, %33 : vector<2x512xf32>
    %c6 = arith.constant 6 : index
    %c0_35 = arith.constant 0 : index
    %c0_36 = arith.constant 0 : index
    %35 = vector.load %arg1[%c6, %c0_35, %c0_36] : memref<16x2x169xbf16, #tpu.memory_space<vmem>>, vector<1x2x169xbf16>
    %36 = vector.shape_cast %35 : vector<1x2x169xbf16> to vector<2x169xbf16>
    %c6_37 = arith.constant 6 : index
    %c0_38 = arith.constant 0 : index
    %c0_39 = arith.constant 0 : index
    %37 = vector.load %arg2[%c6_37, %c0_38, %c0_39] : memref<16x169x512xbf16, #tpu.memory_space<vmem>>, vector<1x169x512xbf16>
    %38 = vector.shape_cast %37 : vector<1x169x512xbf16> to vector<169x512xbf16>
    %cst_40 = arith.constant dense<0.000000e+00> : vector<2x512xf32>
    %39 = tpu.matmul %36, %38, %cst_40 {dimension_numbers = #tpu.dot_dimension_numbers<[1], [0], [0], [1], [0, 0, 1, 1], [], []>} : vector<2x169xbf16>, vector<169x512xbf16>, vector<2x512xf32> -> vector<2x512xf32>
    %40 = arith.addf %34, %39 : vector<2x512xf32>
    %c7 = arith.constant 7 : index
    %c0_41 = arith.constant 0 : index
    %c0_42 = arith.constant 0 : index
    %41 = vector.load %arg1[%c7, %c0_41, %c0_42] : memref<16x2x169xbf16, #tpu.memory_space<vmem>>, vector<1x2x169xbf16>
    %42 = vector.shape_cast %41 : vector<1x2x169xbf16> to vector<2x169xbf16>
    %c7_43 = arith.constant 7 : index
    %c0_44 = arith.constant 0 : index
    %c0_45 = arith.constant 0 : index
    %43 = vector.load %arg2[%c7_43, %c0_44, %c0_45] : memref<16x169x512xbf16, #tpu.memory_space<vmem>>, vector<1x169x512xbf16>
    %44 = vector.shape_cast %43 : vector<1x169x512xbf16> to vector<169x512xbf16>
    %cst_46 = arith.constant dense<0.000000e+00> : vector<2x512xf32>
    %45 = tpu.matmul %42, %44, %cst_46 {dimension_numbers = #tpu.dot_dimension_numbers<[1], [0], [0], [1], [0, 0, 1, 1], [], []>} : vector<2x169xbf16>, vector<169x512xbf16>, vector<2x512xf32> -> vector<2x512xf32>
    %46 = arith.addf %40, %45 : vector<2x512xf32>
    %c8 = arith.constant 8 : index
    %c0_47 = arith.constant 0 : index
    %c0_48 = arith.constant 0 : index
    %47 = vector.load %arg1[%c8, %c0_47, %c0_48] : memref<16x2x169xbf16, #tpu.memory_space<vmem>>, vector<1x2x169xbf16>
    %48 = vector.shape_cast %47 : vector<1x2x169xbf16> to vector<2x169xbf16>
    %c8_49 = arith.constant 8 : index
    %c0_50 = arith.constant 0 : index
    %c0_51 = arith.constant 0 : index
    %49 = vector.load %arg2[%c8_49, %c0_50, %c0_51] : memref<16x169x512xbf16, #tpu.memory_space<vmem>>, vector<1x169x512xbf16>
    %50 = vector.shape_cast %49 : vector<1x169x512xbf16> to vector<169x512xbf16>
    %cst_52 = arith.constant dense<0.000000e+00> : vector<2x512xf32>
    %51 = tpu.matmul %48, %50, %cst_52 {dimension_numbers = #tpu.dot_dimension_numbers<[1], [0], [0], [1], [0, 0, 1, 1], [], []>} : vector<2x169xbf16>, vector<169x512xbf16>, vector<2x512xf32> -> vector<2x512xf32>
    %52 = arith.addf %46, %51 : vector<2x512xf32>
    %c9 = arith.constant 9 : index
    %c0_53 = arith.constant 0 : index
    %c0_54 = arith.constant 0 : index
    %53 = vector.load %arg1[%c9, %c0_53, %c0_54] : memref<16x2x169xbf16, #tpu.memory_space<vmem>>, vector<1x2x169xbf16>
    %54 = vector.shape_cast %53 : vector<1x2x169xbf16> to vector<2x169xbf16>
    %c9_55 = arith.constant 9 : index
    %c0_56 = arith.constant 0 : index
    %c0_57 = arith.constant 0 : index
    %55 = vector.load %arg2[%c9_55, %c0_56, %c0_57] : memref<16x169x512xbf16, #tpu.memory_space<vmem>>, vector<1x169x512xbf16>
    %56 = vector.shape_cast %55 : vector<1x169x512xbf16> to vector<169x512xbf16>
    %cst_58 = arith.constant dense<0.000000e+00> : vector<2x512xf32>
    %57 = tpu.matmul %54, %56, %cst_58 {dimension_numbers = #tpu.dot_dimension_numbers<[1], [0], [0], [1], [0, 0, 1, 1], [], []>} : vector<2x169xbf16>, vector<169x512xbf16>, vector<2x512xf32> -> vector<2x512xf32>
    %58 = arith.addf %52, %57 : vector<2x512xf32>
    %c10 = arith.constant 10 : index
    %c0_59 = arith.constant 0 : index
    %c0_60 = arith.constant 0 : index
    %59 = vector.load %arg1[%c10, %c0_59, %c0_60] : memref<16x2x169xbf16, #tpu.memory_space<vmem>>, vector<1x2x169xbf16>
    %60 = vector.shape_cast %59 : vector<1x2x169xbf16> to vector<2x169xbf16>
    %c10_61 = arith.constant 10 : index
    %c0_62 = arith.constant 0 : index
    %c0_63 = arith.constant 0 : index
    %61 = vector.load %arg2[%c10_61, %c0_62, %c0_63] : memref<16x169x512xbf16, #tpu.memory_space<vmem>>, vector<1x169x512xbf16>
    %62 = vector.shape_cast %61 : vector<1x169x512xbf16> to vector<169x512xbf16>
    %cst_64 = arith.constant dense<0.000000e+00> : vector<2x512xf32>
    %63 = tpu.matmul %60, %62, %cst_64 {dimension_numbers = #tpu.dot_dimension_numbers<[1], [0], [0], [1], [0, 0, 1, 1], [], []>} : vector<2x169xbf16>, vector<169x512xbf16>, vector<2x512xf32> -> vector<2x512xf32>
    %64 = arith.addf %58, %63 : vector<2x512xf32>
    %c11 = arith.constant 11 : index
    %c0_65 = arith.constant 0 : index
    %c0_66 = arith.constant 0 : index
    %65 = vector.load %arg1[%c11, %c0_65, %c0_66] : memref<16x2x169xbf16, #tpu.memory_space<vmem>>, vector<1x2x169xbf16>
    %66 = vector.shape_cast %65 : vector<1x2x169xbf16> to vector<2x169xbf16>
    %c11_67 = arith.constant 11 : index
    %c0_68 = arith.constant 0 : index
    %c0_69 = arith.constant 0 : index
    %67 = vector.load %arg2[%c11_67, %c0_68, %c0_69] : memref<16x169x512xbf16, #tpu.memory_space<vmem>>, vector<1x169x512xbf16>
    %68 = vector.shape_cast %67 : vector<1x169x512xbf16> to vector<169x512xbf16>
    %cst_70 = arith.constant dense<0.000000e+00> : vector<2x512xf32>
    %69 = tpu.matmul %66, %68, %cst_70 {dimension_numbers = #tpu.dot_dimension_numbers<[1], [0], [0], [1], [0, 0, 1, 1], [], []>} : vector<2x169xbf16>, vector<169x512xbf16>, vector<2x512xf32> -> vector<2x512xf32>
    %70 = arith.addf %64, %69 : vector<2x512xf32>
    %c12 = arith.constant 12 : index
    %c0_71 = arith.constant 0 : index
    %c0_72 = arith.constant 0 : index
    %71 = vector.load %arg1[%c12, %c0_71, %c0_72] : memref<16x2x169xbf16, #tpu.memory_space<vmem>>, vector<1x2x169xbf16>
    %72 = vector.shape_cast %71 : vector<1x2x169xbf16> to vector<2x169xbf16>
    %c12_73 = arith.constant 12 : index
    %c0_74 = arith.constant 0 : index
    %c0_75 = arith.constant 0 : index
    %73 = vector.load %arg2[%c12_73, %c0_74, %c0_75] : memref<16x169x512xbf16, #tpu.memory_space<vmem>>, vector<1x169x512xbf16>
    %74 = vector.shape_cast %73 : vector<1x169x512xbf16> to vector<169x512xbf16>
    %cst_76 = arith.constant dense<0.000000e+00> : vector<2x512xf32>
    %75 = tpu.matmul %72, %74, %cst_76 {dimension_numbers = #tpu.dot_dimension_numbers<[1], [0], [0], [1], [0, 0, 1, 1], [], []>} : vector<2x169xbf16>, vector<169x512xbf16>, vector<2x512xf32> -> vector<2x512xf32>
    %76 = arith.addf %70, %75 : vector<2x512xf32>
    %c13 = arith.constant 13 : index
    %c0_77 = arith.constant 0 : index
    %c0_78 = arith.constant 0 : index
    %77 = vector.load %arg1[%c13, %c0_77, %c0_78] : memref<16x2x169xbf16, #tpu.memory_space<vmem>>, vector<1x2x169xbf16>
    %78 = vector.shape_cast %77 : vector<1x2x169xbf16> to vector<2x169xbf16>
    %c13_79 = arith.constant 13 : index
    %c0_80 = arith.constant 0 : index
    %c0_81 = arith.constant 0 : index
    %79 = vector.load %arg2[%c13_79, %c0_80, %c0_81] : memref<16x169x512xbf16, #tpu.memory_space<vmem>>, vector<1x169x512xbf16>
    %80 = vector.shape_cast %79 : vector<1x169x512xbf16> to vector<169x512xbf16>
    %cst_82 = arith.constant dense<0.000000e+00> : vector<2x512xf32>
    %81 = tpu.matmul %78, %80, %cst_82 {dimension_numbers = #tpu.dot_dimension_numbers<[1], [0], [0], [1], [0, 0, 1, 1], [], []>} : vector<2x169xbf16>, vector<169x512xbf16>, vector<2x512xf32> -> vector<2x512xf32>
    %82 = arith.addf %76, %81 : vector<2x512xf32>
    %c14 = arith.constant 14 : index
    %c0_83 = arith.constant 0 : index
    %c0_84 = arith.constant 0 : index
    %83 = vector.load %arg1[%c14, %c0_83, %c0_84] : memref<16x2x169xbf16, #tpu.memory_space<vmem>>, vector<1x2x169xbf16>
    %84 = vector.shape_cast %83 : vector<1x2x169xbf16> to vector<2x169xbf16>
    %c14_85 = arith.constant 14 : index
    %c0_86 = arith.constant 0 : index
    %c0_87 = arith.constant 0 : index
    %85 = vector.load %arg2[%c14_85, %c0_86, %c0_87] : memref<16x169x512xbf16, #tpu.memory_space<vmem>>, vector<1x169x512xbf16>
    %86 = vector.shape_cast %85 : vector<1x169x512xbf16> to vector<169x512xbf16>
    %cst_88 = arith.constant dense<0.000000e+00> : vector<2x512xf32>
    %87 = tpu.matmul %84, %86, %cst_88 {dimension_numbers = #tpu.dot_dimension_numbers<[1], [0], [0], [1], [0, 0, 1, 1], [], []>} : vector<2x169xbf16>, vector<169x512xbf16>, vector<2x512xf32> -> vector<2x512xf32>
    %88 = arith.addf %82, %87 : vector<2x512xf32>
    %c15 = arith.constant 15 : index
    %c0_89 = arith.constant 0 : index
    %c0_90 = arith.constant 0 : index
    %89 = vector.load %arg1[%c15, %c0_89, %c0_90] : memref<16x2x169xbf16, #tpu.memory_space<vmem>>, vector<1x2x169xbf16>
    %90 = vector.shape_cast %89 : vector<1x2x169xbf16> to vector<2x169xbf16>
    %c15_91 = arith.constant 15 : index
    %c0_92 = arith.constant 0 : index
    %c0_93 = arith.constant 0 : index
    %91 = vector.load %arg2[%c15_91, %c0_92, %c0_93] : memref<16x169x512xbf16, #tpu.memory_space<vmem>>, vector<1x169x512xbf16>
    %92 = vector.shape_cast %91 : vector<1x169x512xbf16> to vector<169x512xbf16>
    %cst_94 = arith.constant dense<0.000000e+00> : vector<2x512xf32>
    %93 = tpu.matmul %90, %92, %cst_94 {dimension_numbers = #tpu.dot_dimension_numbers<[1], [0], [0], [1], [0, 0, 1, 1], [], []>} : vector<2x169xbf16>, vector<169x512xbf16>, vector<2x512xf32> -> vector<2x512xf32>
    %94 = arith.addf %88, %93 : vector<2x512xf32>
    %c0_95 = arith.constant 0 : index
    %c0_96 = arith.constant 0 : index
    %95 = vector.load %arg3[%c0_95, %c0_96] : memref<1x512xf32, #tpu.memory_space<vmem>>, vector<1x512xf32>
    %96 = vector.broadcast %95 : vector<1x512xf32> to vector<2x512xf32>
    %97 = arith.addf %94, %96 : vector<2x512xf32>
    %cst_97 = arith.constant 0.000000e+00 : f32
    %98 = vector.broadcast %cst_97 : f32 to vector<2x512xf32>
    %99 = arith.maximumf %97, %98 : vector<2x512xf32>
    %100 = arith.truncf %99 : vector<2x512xf32> to vector<2x512xbf16>
    %c0_98 = arith.constant 0 : index
    %c0_99 = arith.constant 0 : index
    %101 = vector.load %arg4[%c0_98, %c0_99] : memref<512x128xbf16, #tpu.memory_space<vmem>>, vector<512x128xbf16>
    %cst_100 = arith.constant dense<0.000000e+00> : vector<2x128xf32>
    %102 = tpu.matmul %100, %101, %cst_100 {dimension_numbers = #tpu.dot_dimension_numbers<[1], [0], [0], [1], [0, 0, 1, 1], [], []>} : vector<2x512xbf16>, vector<512x128xbf16>, vector<2x128xf32> -> vector<2x128xf32>
    %c0_101 = arith.constant 0 : index
    %c0_102 = arith.constant 0 : index
    %103 = vector.load %arg5[%c0_101, %c0_102] : memref<1x128xf32, #tpu.memory_space<vmem>>, vector<1x128xf32>
    %104 = vector.broadcast %103 : vector<1x128xf32> to vector<2x128xf32>
    %105 = arith.addf %102, %104 : vector<2x128xf32>
    %cst_103 = arith.constant 0.000000e+00 : f32
    %106 = vector.broadcast %cst_103 : f32 to vector<2x128xf32>
    %107 = arith.maximumf %105, %106 : vector<2x128xf32>
    %108 = arith.truncf %107 : vector<2x128xf32> to vector<2x128xbf16>
    %c0_104 = arith.constant 0 : index
    %c0_105 = arith.constant 0 : index
    %109 = vector.load %arg6[%c0_104, %c0_105] : memref<128x128xbf16, #tpu.memory_space<vmem>>, vector<128x128xbf16>
    %cst_106 = arith.constant dense<0.000000e+00> : vector<2x128xf32>
    %110 = tpu.matmul %108, %109, %cst_106 {dimension_numbers = #tpu.dot_dimension_numbers<[1], [0], [0], [1], [0, 0, 1, 1], [], []>} : vector<2x128xbf16>, vector<128x128xbf16>, vector<2x128xf32> -> vector<2x128xf32>
    %c0_107 = arith.constant 0 : index
    %c0_108 = arith.constant 0 : index
    %111 = vector.load %arg7[%c0_107, %c0_108] : memref<1x128xf32, #tpu.memory_space<vmem>>, vector<1x128xf32>
    %112 = vector.broadcast %111 : vector<1x128xf32> to vector<2x128xf32>
    %113 = arith.addf %110, %112 : vector<2x128xf32>
    %c0_109 = arith.constant 0 : index
    %c0_110 = arith.constant 0 : index
    %114 = vector.load %arg8[%c0_109, %c0_110] : memref<2x128xf32, #tpu.memory_space<vmem>>, vector<2x128xf32>
    tpu.vector_store %arg8[%c0_109, %c0_110], %113 {strides = array<i32>} : memref<2x128xf32, #tpu.memory_space<vmem>>, vector<2x128xf32>,
    return
  }
  func.func @transform_0(%arg0: i32) -> (i32, i32, i32) {
    %c0_i32 = arith.constant 0 : i32
    %c0_i32_0 = arith.constant 0 : i32
    %c0_i32_1 = arith.constant 0 : i32
    return %c0_i32, %arg0, %c0_i32_0 : i32, i32, i32
  }
  func.func @transform_1(%arg0: i32) -> (i32, i32, i32) {
    %c0_i32 = arith.constant 0 : i32
    %c0_i32_0 = arith.constant 0 : i32
    %c0_i32_1 = arith.constant 0 : i32
    %c0_i32_2 = arith.constant 0 : i32
    return %c0_i32, %c0_i32_0, %c0_i32_1 : i32, i32, i32
  }
  func.func @transform_2(%arg0: i32) -> (i32, i32) {
    %c0_i32 = arith.constant 0 : i32
    %c0_i32_0 = arith.constant 0 : i32
    %c0_i32_1 = arith.constant 0 : i32
    return %c0_i32, %c0_i32_0 : i32, i32
  }
  func.func @transform_3(%arg0: i32) -> (i32, i32) {
    %c0_i32 = arith.constant 0 : i32
    %c0_i32_0 = arith.constant 0 : i32
    %c0_i32_1 = arith.constant 0 : i32
    return %c0_i32, %c0_i32_0 : i32, i32
  }
  func.func @transform_4(%arg0: i32) -> (i32, i32) {
    %c0_i32 = arith.constant 0 : i32
    %c0_i32_0 = arith.constant 0 : i32
    %c0_i32_1 = arith.constant 0 : i32
    return %c0_i32, %c0_i32_0 : i32, i32
  }
  func.func @transform_5(%arg0: i32) -> (i32, i32) {
    %c0_i32 = arith.constant 0 : i32
    %c0_i32_0 = arith.constant 0 : i32
    %c0_i32_1 = arith.constant 0 : i32
    return %c0_i32, %c0_i32_0 : i32, i32
  }
  func.func @transform_6(%arg0: i32) -> (i32, i32) {
    %c0_i32 = arith.constant 0 : i32
    %c0_i32_0 = arith.constant 0 : i32
    %c0_i32_1 = arith.constant 0 : i32
    return %c0_i32, %c0_i32_0 : i32, i32
  }
  func.func @transform_7(%arg0: i32) -> (i32, i32) {
    %c0_i32 = arith.constant 0 : i32
    %c0_i32_0 = arith.constant 0 : i32
    return %arg0, %c0_i32 : i32, i32
  }
}

</mosaic_0001>

<bundles_post_ra>
// kernel: cnn_forward.3
= control target key start
LH: loop header
LB: loop body
LE: loop exit
PB: predicated region body
PF: predicated region fallthrough
CT: control target
= control target key end

     0   :  { %s1669_s12 = smov 0   ;;  %s1671_s13 = smov 0   ;;  %s2018_s0 = inlined_call_operand.vmem [shape: bf16[4,75,2048], index: 0, kind: input, shape index: {}]   ;;  %s2019_s1 = inlined_call_operand.vmem [shape: bf16[6,75], index: 1, kind: input, shape index: {}]   ;;  %s2020_s2 = inlined_call_operand.vmem [shape: f32[6,1], index: 2, kind: input, shape index: {}]   ;;  %s2021_s3 = inlined_call_operand.vmem [shape: bf16[6,2048], index: 3, kind: output, shape index: {}]  }
   0x1   :  { %s1673_s14 = smov 0  }
   0x2 LB: > { %s1310_s15 = sadd.s32 4294967295, %s1645_s14   ;;  %s1686_s16 = sadd.s32 1, %s1645_s14   ;;  %s1645_s14 = sphi %s1673_s14, %s2024_s14   ;;  %s1641_s13 = sphi %s1671_s13, %s2023_s13   ;;  %s1637_s12 = sphi %s1669_s12, %s2022_s12  }
   0x3   : > { %s17_s17 = ssub.s32 %s1645_s14, %s1686_s16  ;;  %s20_s18 = sadd.s32 1, %s1641_s13 }
   0x4   : > { %p18_p0 = scmp.eq.s32.totalorder %s17_s17, 0  ;;  %p27_p1 = scmp.ne.s32.totalorder %s1641_s13, %s1637_s12 }
   0x5   : > { %p28_p2 = scmp.eq.s32.totalorder %s1645_s14, 0  ;;  %p1313_p4 = scmp.ge.s32.totalorder %s1645_s14, 4 }
   0x6   : > { %s1695_s19 = scalar_select %p18_p0, %s1641_s13, %s20_s18  }
   0x7   : > { %p29_p3 = por %p28_p2, %p27_p1  ;;  %127 = sbr.rel (%p1313_p4) target bundleno = 56 (0x38), region = 24 }
   0xc   : > { %130 = sbr.rel (!%p29_p3) target bundleno = 56 (0x38), region = 28  ;;  %s132_s20 = sand.u32 (%p29_p3), 1, %s1641_s13  }
   0xd   : > { %s1471_s21 = sshll.u32 (%p29_p3), %s1645_s14, 4  ;;  %s1474_s22 = smul.u32 (%p29_p3), 640, %s132_s20 }
   0xe   : > { %s1703_s25 = scalar_lea.vmem (%p29_p3), %s2018_s0, %s1471_s21 }
   0xf   : > { %v150_v0 = vld [vmem:[%s1703_s25] sm:$0xff] (%p29_p3)  ;;  %v152_v1 = vld [vmem:[%s1703_s25 + $0x8] sm:$0xff] (%p29_p3)  ;;  %s1711_s26 = scalar_lea.vmem (%p29_p3), [#allocation2], %s1474_s22 }
  0x10   : > { %v154_v2 = vld [vmem:[%s1703_s25 + $0x40] sm:$0xff] (%p29_p3)  ;;  %v156_v3 = vld [vmem:[%s1703_s25 + $0x48] sm:$0xff] (%p29_p3)  ;;  %151 = vst [vmem:[%s1711_s26] sm:$0xff] (%p29_p3), %v150_v0  ;;  %153 = vst [vmem:[%s1711_s26 + $0x8] sm:$0xff] (%p29_p3), %v152_v1 }
  0x11   : > { %v158_v4 = vld [vmem:[%s1703_s25 + $0x80] sm:$0xff]  ;;  %v160_v5 = vld [vmem:[%s1703_s25 + $0x88] sm:$0xff]  ;;  %155 = vst [vmem:[%s1711_s26 + $0x10] sm:$0xff] %v154_v2  ;;  %157 = vst [vmem:[%s1711_s26 + $0x18] sm:$0xff] %v156_v3 }
  0x12   : > { %159 = vst [vmem:[%s1711_s26 + $0x20] sm:$0xff] %v158_v4  ;;  %161 = vst [vmem:[%s1711_s26 + $0x28] sm:$0xff] %v160_v5  ;;  %v162_v6 = vld [vmem:[%s1703_s25 + $0xc0] sm:$0xff]  ;;  %v164_v7 = vld [vmem:[%s1703_s25 + $0xc8] sm:$0xff] }
  0x13   : > { %v166_v8 = vld [vmem:[%s1703_s25 + $0x100] sm:$0xff]  ;;  %163 = vst [vmem:[%s1711_s26 + $0x30] sm:$0xff] %v162_v6  ;;  %165 = vst [vmem:[%s1711_s26 + $0x38] sm:$0xff] %v164_v7  ;;  %v168_v9 = vld [vmem:[%s1703_s25 + $0x108] sm:$0xff] }
  0x14   : > { %167 = vst [vmem:[%s1711_s26 + $0x40] sm:$0xff] %v166_v8  ;;  %v170_v10 = vld [vmem:[%s1703_s25 + $0x140] sm:$0xff]  ;;  %v172_v11 = vld [vmem:[%s1703_s25 + $0x148] sm:$0xff]  ;;  %169 = vst [vmem:[%s1711_s26 + $0x48] sm:$0xff] %v168_v9 }
  0x15   : > { %171 = vst [vmem:[%s1711_s26 + $0x50] sm:$0xff] %v170_v10  ;;  %173 = vst [vmem:[%s1711_s26 + $0x58] sm:$0xff] %v172_v11  ;;  %v174_v12 = vld [vmem:[%s1703_s25 + $0x180] sm:$0xff]  ;;  %v176_v13 = vld [vmem:[%s1703_s25 + $0x188] sm:$0xff] }
  0x16   : > { %v178_v14 = vld [vmem:[%s1703_s25 + $0x1c0] sm:$0xff]  ;;  %175 = vst [vmem:[%s1711_s26 + $0x60] sm:$0xff] %v174_v12  ;;  %177 = vst [vmem:[%s1711_s26 + $0x68] sm:$0xff] %v176_v13  ;;  %v180_v15 = vld [vmem:[%s1703_s25 + $0x1c8] sm:$0xff] }
  0x17   : > { %179 = vst [vmem:[%s1711_s26 + $0x70] sm:$0xff] %v178_v14  ;;  %v182_v16 = vld [vmem:[%s1703_s25 + $0x200] sm:$0xff]  ;;  %v184_v17 = vld [vmem:[%s1703_s25 + $0x208] sm:$0xff]  ;;  %181 = vst [vmem:[%s1711_s26 + $0x78] sm:$0xff] %v180_v15 }
  0x18   : > { %183 = vst [vmem:[%s1711_s26 + $0x80] sm:$0xff] %v182_v16  ;;  %185 = vst [vmem:[%s1711_s26 + $0x88] sm:$0xff] %v184_v17  ;;  %v186_v18 = vld [vmem:[%s1703_s25 + $0x240] sm:$0xff]  ;;  %v188_v19 = vld [vmem:[%s1703_s25 + $0x248] sm:$0xff] }
  0x19   : > { %v190_v20 = vld [vmem:[%s1703_s25 + $0x280] sm:$0xff]  ;;  %187 = vst [vmem:[%s1711_s26 + $0x90] sm:$0xff] %v186_v18  ;;  %189 = vst [vmem:[%s1711_s26 + $0x98] sm:$0xff] %v188_v19  ;;  %v192_v21 = vld [vmem:[%s1703_s25 + $0x288] sm:$0xff] }
  0x1a   : > { %191 = vst [vmem:[%s1711_s26 + $0xa0] sm:$0xff] %v190_v20  ;;  %v194_v22 = vld [vmem:[%s1703_s25 + $0x2c0] sm:$0xff]  ;;  %v196_v23 = vld [vmem:[%s1703_s25 + $0x2c8] sm:$0xff]  ;;  %193 = vst [vmem:[%s1711_s26 + $0xa8] sm:$0xff] %v192_v21 }
  0x1b   : > { %195 = vst [vmem:[%s1711_s26 + $0xb0] sm:$0xff] %v194_v22  ;;  %197 = vst [vmem:[%s1711_s26 + $0xb8] sm:$0xff] %v196_v23  ;;  %v198_v24 = vld [vmem:[%s1703_s25 + $0x300] sm:$0xff]  ;;  %v200_v25 = vld [vmem:[%s1703_s25 + $0x308] sm:$0xff] }
  0x1c   : > { %v202_v26 = vld [vmem:[%s1703_s25 + $0x340] sm:$0xff]  ;;  %199 = vst [vmem:[%s1711_s26 + $0xc0] sm:$0xff] %v198_v24  ;;  %201 = vst [vmem:[%s1711_s26 + $0xc8] sm:$0xff] %v200_v25  ;;  %v204_v27 = vld [vmem:[%s1703_s25 + $0x348] sm:$0xff] }
  0x1d   : > { %203 = vst [vmem:[%s1711_s26 + $0xd0] sm:$0xff] %v202_v26  ;;  %v206_v28 = vld [vmem:[%s1703_s25 + $0x380] sm:$0xff]  ;;  %v208_v29 = vld [vmem:[%s1703_s25 + $0x388] sm:$0xff]  ;;  %205 = vst [vmem:[%s1711_s26 + $0xd8] sm:$0xff] %v204_v27 }
  0x1e   : > { %207 = vst [vmem:[%s1711_s26 + $0xe0] sm:$0xff] %v206_v28  ;;  %209 = vst [vmem:[%s1711_s26 + $0xe8] sm:$0xff] %v208_v29  ;;  %v210_v30 = vld [vmem:[%s1703_s25 + $0x3c0] sm:$0xff]  ;;  %v212_v31 = vld [vmem:[%s1703_s25 + $0x3c8] sm:$0xff] }
  0x1f   : > { %v214_v32 = vld [vmem:[%s1703_s25 + $0x400] sm:$0xff]  ;;  %211 = vst [vmem:[%s1711_s26 + $0xf0] sm:$0xff] %v210_v30  ;;  %213 = vst [vmem:[%s1711_s26 + $0xf8] sm:$0xff] %v212_v31  ;;  %v216_v33 = vld [vmem:[%s1703_s25 + $0x408] sm:$0xff] }
  0x20   : > { %215 = vst [vmem:[%s1711_s26 + $0x100] sm:$0xff] %v214_v32  ;;  %v218_v34 = vld [vmem:[%s1703_s25 + $0x440] sm:$0xff]  ;;  %v220_v35 = vld [vmem:[%s1703_s25 + $0x448] sm:$0xff]  ;;  %217 = vst [vmem:[%s1711_s26 + $0x108] sm:$0xff] %v216_v33 }
  0x21   : > { %219 = vst [vmem:[%s1711_s26 + $0x110] sm:$0xff] %v218_v34  ;;  %221 = vst [vmem:[%s1711_s26 + $0x118] sm:$0xff] %v220_v35  ;;  %v222_v36 = vld [vmem:[%s1703_s25 + $0x480] sm:$0xff]  ;;  %v224_v37 = vld [vmem:[%s1703_s25 + $0x488] sm:$0xff] }
  0x22   : > { %v226_v38 = vld [vmem:[%s1703_s25 + $0x4c0] sm:$0xff]  ;;  %223 = vst [vmem:[%s1711_s26 + $0x120] sm:$0xff] %v222_v36  ;;  %225 = vst [vmem:[%s1711_s26 + $0x128] sm:$0xff] %v224_v37  ;;  %v228_v39 = vld [vmem:[%s1703_s25 + $0x4c8] sm:$0xff] }
  0x23   : > { %227 = vst [vmem:[%s1711_s26 + $0x130] sm:$0xff] %v226_v38  ;;  %v230_v40 = vld [vmem:[%s1703_s25 + $0x500] sm:$0xff]  ;;  %v232_v41 = vld [vmem:[%s1703_s25 + $0x508] sm:$0xff]  ;;  %229 = vst [vmem:[%s1711_s26 + $0x138] sm:$0xff] %v228_v39 }
  0x24   : > { %231 = vst [vmem:[%s1711_s26 + $0x140] sm:$0xff] %v230_v40  ;;  %233 = vst [vmem:[%s1711_s26 + $0x148] sm:$0xff] %v232_v41  ;;  %v234_v42 = vld [vmem:[%s1703_s25 + $0x540] sm:$0xff]  ;;  %v236_v43 = vld [vmem:[%s1703_s25 + $0x548] sm:$0xff] }
  0x25   : > { %v238_v44 = vld [vmem:[%s1703_s25 + $0x580] sm:$0xff]  ;;  %235 = vst [vmem:[%s1711_s26 + $0x150] sm:$0xff] %v234_v42  ;;  %237 = vst [vmem:[%s1711_s26 + $0x158] sm:$0xff] %v236_v43  ;;  %v240_v45 = vld [vmem:[%s1703_s25 + $0x588] sm:$0xff] }
  0x26   : > { %239 = vst [vmem:[%s1711_s26 + $0x160] sm:$0xff] %v238_v44  ;;  %v242_v46 = vld [vmem:[%s1703_s25 + $0x5c0] sm:$0xff]  ;;  %v244_v47 = vld [vmem:[%s1703_s25 + $0x5c8] sm:$0xff]  ;;  %241 = vst [vmem:[%s1711_s26 + $0x168] sm:$0xff] %v240_v45 }
  0x27   : > { %243 = vst [vmem:[%s1711_s26 + $0x170] sm:$0xff] %v242_v46  ;;  %245 = vst [vmem:[%s1711_s26 + $0x178] sm:$0xff] %v244_v47  ;;  %v246_v48 = vld [vmem:[%s1703_s25 + $0x600] sm:$0xff]  ;;  %v248_v49 = vld [vmem:[%s1703_s25 + $0x608] sm:$0xff] }
  0x28   : > { %v250_v50 = vld [vmem:[%s1703_s25 + $0x640] sm:$0xff]  ;;  %247 = vst [vmem:[%s1711_s26 + $0x180] sm:$0xff] %v246_v48  ;;  %249 = vst [vmem:[%s1711_s26 + $0x188] sm:$0xff] %v248_v49  ;;  %v252_v51 = vld [vmem:[%s1703_s25 + $0x648] sm:$0xff] }
  0x29   : > { %251 = vst [vmem:[%s1711_s26 + $0x190] sm:$0xff] %v250_v50  ;;  %v254_v52 = vld [vmem:[%s1703_s25 + $0x680] sm:$0xff]  ;;  %v256_v53 = vld [vmem:[%s1703_s25 + $0x688] sm:$0xff]  ;;  %253 = vst [vmem:[%s1711_s26 + $0x198] sm:$0xff] %v252_v51 }
  0x2a   : > { %255 = vst [vmem:[%s1711_s26 + $0x1a0] sm:$0xff] %v254_v52  ;;  %257 = vst [vmem:[%s1711_s26 + $0x1a8] sm:$0xff] %v256_v53  ;;  %v258_v54 = vld [vmem:[%s1703_s25 + $0x6c0] sm:$0xff]  ;;  %v260_v55 = vld [vmem:[%s1703_s25 + $0x6c8] sm:$0xff] }
  0x2b   : > { %v262_v56 = vld [vmem:[%s1703_s25 + $0x700] sm:$0xff]  ;;  %259 = vst [vmem:[%s1711_s26 + $0x1b0] sm:$0xff] %v258_v54  ;;  %261 = vst [vmem:[%s1711_s26 + $0x1b8] sm:$0xff] %v260_v55  ;;  %v264_v57 = vld [vmem:[%s1703_s25 + $0x708] sm:$0xff] }
  0x2c   : > { %263 = vst [vmem:[%s1711_s26 + $0x1c0] sm:$0xff] %v262_v56  ;;  %v266_v58 = vld [vmem:[%s1703_s25 + $0x740] sm:$0xff]  ;;  %v268_v59 = vld [vmem:[%s1703_s25 + $0x748] sm:$0xff]  ;;  %265 = vst [vmem:[%s1711_s26 + $0x1c8] sm:$0xff] %v264_v57 }
  0x2d   : > { %267 = vst [vmem:[%s1711_s26 + $0x1d0] sm:$0xff] %v266_v58  ;;  %269 = vst [vmem:[%s1711_s26 + $0x1d8] sm:$0xff] %v268_v59  ;;  %v270_v60 = vld [vmem:[%s1703_s25 + $0x780] sm:$0xff]  ;;  %v272_v61 = vld [vmem:[%s1703_s25 + $0x788] sm:$0xff] }
  0x2e   : > { %v274_v62 = vld [vmem:[%s1703_s25 + $0x7c0] sm:$0xff]  ;;  %271 = vst [vmem:[%s1711_s26 + $0x1e0] sm:$0xff] %v270_v60  ;;  %273 = vst [vmem:[%s1711_s26 + $0x1e8] sm:$0xff] %v272_v61  ;;  %v276_v63 = vld [vmem:[%s1703_s25 + $0x7c8] sm:$0xff] }
  0x2f   : > { %275 = vst [vmem:[%s1711_s26 + $0x1f0] sm:$0xff] %v274_v62  ;;  %v278_v0 = vld [vmem:[%s1703_s25 + $0x800] sm:$0xff]  ;;  %v280_v1 = vld [vmem:[%s1703_s25 + $0x808] sm:$0xff]  ;;  %277 = vst [vmem:[%s1711_s26 + $0x1f8] sm:$0xff] %v276_v63 }
  0x30   : > { %279 = vst [vmem:[%s1711_s26 + $0x200] sm:$0xff] %v278_v0  ;;  %281 = vst [vmem:[%s1711_s26 + $0x208] sm:$0xff] %v280_v1  ;;  %v282_v2 = vld [vmem:[%s1703_s25 + $0x840] sm:$0xff]  ;;  %v284_v3 = vld [vmem:[%s1703_s25 + $0x848] sm:$0xff] }
  0x31   : > { %v286_v4 = vld [vmem:[%s1703_s25 + $0x880] sm:$0xff]  ;;  %283 = vst [vmem:[%s1711_s26 + $0x210] sm:$0xff] %v282_v2  ;;  %285 = vst [vmem:[%s1711_s26 + $0x218] sm:$0xff] %v284_v3  ;;  %v288_v5 = vld [vmem:[%s1703_s25 + $0x888] sm:$0xff] }
  0x32   : > { %287 = vst [vmem:[%s1711_s26 + $0x220] sm:$0xff] %v286_v4  ;;  %v290_v6 = vld [vmem:[%s1703_s25 + $0x8c0] sm:$0xff]  ;;  %v292_v7 = vld [vmem:[%s1703_s25 + $0x8c8] sm:$0xff]  ;;  %289 = vst [vmem:[%s1711_s26 + $0x228] sm:$0xff] %v288_v5 }
  0x33   : > { %291 = vst [vmem:[%s1711_s26 + $0x230] sm:$0xff] %v290_v6  ;;  %293 = vst [vmem:[%s1711_s26 + $0x238] sm:$0xff] %v292_v7  ;;  %v294_v8 = vld [vmem:[%s1703_s25 + $0x900] sm:$0xff]  ;;  %v296_v9 = vld [vmem:[%s1703_s25 + $0x908] sm:$0xff] }
  0x34   : > { %v298_v10 = vld [vmem:[%s1703_s25 + $0x940] sm:$0xff]  ;;  %295 = vst [vmem:[%s1711_s26 + $0x240] sm:$0xff] %v294_v8  ;;  %297 = vst [vmem:[%s1711_s26 + $0x248] sm:$0xff] %v296_v9  ;;  %v300_v11 = vld [vmem:[%s1703_s25 + $0x948] sm:$0xff] }
  0x35   : > { %299 = vst [vmem:[%s1711_s26 + $0x250] sm:$0xff] %v298_v10  ;;  %v302_v12 = vld [vmem:[%s1703_s25 + $0x980] sm:$0xff]  ;;  %v304_v13 = vld [vmem:[%s1703_s25 + $0x988] sm:$0xff]  ;;  %301 = vst [vmem:[%s1711_s26 + $0x258] sm:$0xff] %v300_v11 }
  0x36   : > { %303 = vst [vmem:[%s1711_s26 + $0x260] sm:$0xff] %v302_v12  ;;  %305 = vst [vmem:[%s1711_s26 + $0x268] sm:$0xff] %v304_v13  ;;  %v306_v14 = vld [vmem:[%s1703_s25 + $0x9c0] sm:$0xff]  ;;  %v308_v15 = vld [vmem:[%s1703_s25 + $0x9c8] sm:$0xff] }
  0x37   : > { %307 = vst [vmem:[%s1711_s26 + $0x270] sm:$0xff] %v306_v14  ;;  %309 = vst [vmem:[%s1711_s26 + $0x278] sm:$0xff] %v308_v15 }
  0x38 PF: > { %p1316_p5 = scmp.ge.s32.totalorder %s1645_s14, 1  ;;  %p314_p6 = scmp.lt.s32.totalorder %s1645_s14, 5 }
  0x3a   : > { %p315_p7 = pnand %p1316_p5, %p314_p6 }
  0x3b   : > { %s321_s27 = sand.u32 (!%p315_p7), 1, %s1637_s12   ;;  %s1317_s7 = sshll.u32 (!%p315_p7), %s1310_s15, 2 }
  0x3c   : > { %318 = sbr.rel (%p315_p7) target bundleno = 354 (0x162), region = 51  ;;  %p346_p8 = scmp.lt.s32.totalorder (!%p315_p7), %s1317_s7, 15 }
  0x3d   : > { %s1475_s28 = smul.u32 (!%p315_p7), 640, %s321_s27 }
  0x3f   : > { %s1878_s4 = scalar_lea.vmem (!%p315_p7), [#allocation2], %s1475_s28 }
  0x41   : > { %vm473_vm0 = vcmask 1044480   ;;  %vm474_vm1 = vcmask 1045504   ;;  %v1647_v16 = vmov 65535   ;;  %v1648_v18 = vmov 0   ;;  %v1216_v19 = vld [vmem:[%s2020_s2] sm:$0x3f] }
  0x42   : > { %v475_v17 = vsel %vm473_vm0, 4294967295, %v1647_v16  ;;  %521 = vmatprep.mubr.bf16.mxu0 %v1648_v18  ;;  %562 = vmatprep.mubr.bf16.mxu1 %v1648_v18  ;;  %v1503_v21 = vld [vmem:[%s1878_s4 + $0x84] ss:$16 sps:$4 sm:$0x3f]   ;;  %v1511_v30 = vld [vmem:[%s1878_s4 + $0x6c] ss:$16 sps:$4 sm:$0xff]  }
  0x43   : > { %1502 = vset.pattern.permute.xlu0 %v1648_v18  ;;  %v1876_v20 = vsel %vm474_vm1, %v475_v17, 0  ;;  %v1505_v22 = vld [vmem:[%s1878_s4 + $0x8c] ss:$16 sps:$4 sm:$0x3f]   ;;  %v1509_v27 = vld [vmem:[%s1878_s4 + $0x64] ss:$16 sps:$4 sm:$0xff]  }
  0x44   : > { %1219 = vperm.xlu0 %1502, %v1216_v19   ;;  %v481_v23 = vand.u32 %v1503_v21, %v1876_v20  ;;  %v1507_v24 = vld [vmem:[%s1878_s4 + $0x80] ss:$16 sps:$4 sm:$0x3f]   ;;  %v1508_v25 = vld [vmem:[%s1878_s4 + $0x88] ss:$16 sps:$4 sm:$0x3f]   ;;  %v487_v26 = vand.u32 %v1505_v22, %v1876_v20 }
  0x45   : > { %v478_v28 = vand.u32 %v1507_v24, %v1876_v20  ;;  %v484_v29 = vand.u32 %v1508_v25, %v1876_v20  ;;  %v1513_v31 = vld [vmem:[%s1878_s4 + $0x60] ss:$16 sps:$4 sm:$0xff]   ;;  %v1514_v32 = vld [vmem:[%s1878_s4 + $0x68] ss:$16 sps:$4 sm:$0xff]   ;;  %v1515_v33 = vld [vmem:[%s1878_s4 + $0x44] ss:$16 sps:$4 sm:$0xff]  }
  0x46   : > { %495 = vmatprep.subr.bf16.mxu0 %v481_v23  ;;  %536 = vmatprep.subr.bf16.mxu1 %v487_v26  ;;  %v1517_v34 = vld [vmem:[%s1878_s4 + $0x4c] ss:$16 sps:$4 sm:$0xff]   ;;  %v1519_v35 = vld [vmem:[%s1878_s4 + $0x40] ss:$16 sps:$4 sm:$0xff]   ;;  %v1520_v36 = vld [vmem:[%s1878_s4 + $0x48] ss:$16 sps:$4 sm:$0xff]  }
  0x47   : > { %496 = vmatpush1.bf16.msra.mxu0 %v478_v28  ;;  %537 = vmatpush1.bf16.msra.mxu1 %v484_v29  ;;  %v1521_v37 = vld [vmem:[%s1878_s4 + $0x24] ss:$16 sps:$4 sm:$0xff]   ;;  %v1523_v38 = vld [vmem:[%s1878_s4 + $0x2c] ss:$16 sps:$4 sm:$0xff]   ;;  %v1525_v39 = vld [vmem:[%s1878_s4 + $0x20] ss:$16 sps:$4 sm:$0xff]  }
  0x48   : > { %497 = vmatprep.subr.bf16.mxu0 %v1509_v27  ;;  %538 = vmatprep.subr.bf16.mxu1 %v1511_v30  ;;  %v1526_v40 = vld [vmem:[%s1878_s4 + $0x28] ss:$16 sps:$4 sm:$0xff]   ;;  %v1527_v41 = vld [vmem:[%s1878_s4 + $0x4] ss:$16 sps:$4 sm:$0xff]   ;;  %v1529_v42 = vld [vmem:[%s1878_s4 + $0xc] ss:$16 sps:$4 sm:$0xff]  }
  0x49   : > { %v1535_v43 = vld [vmem:[%s1878_s4 + $0x124] ss:$16 sps:$4 sm:$0x3f]   ;;  %v1531_v44 = vld [vmem:[%s1878_s4] ss:$16 sps:$4 sm:$0xff]   ;;  %vm469_vm2 = vcmask 613376  }
  0x4a   : > { %v1538_v45 = vld [vmem:[%s1878_s4 + $0x12c] ss:$16 sps:$4 sm:$0x3f]   ;;  %v1532_v46 = vld [vmem:[%s1878_s4 + $0x8] ss:$16 sps:$4 sm:$0xff]   ;;  %v692_v49 = vand.u32 %v1535_v43, %v1876_v20  ;;  %s2026_s7 = smov (!%p346_p8, %s1317_s7), 15 }
  0x4b   : > { %498 = vmatpush1.bf16.msra.mxu0 %v1513_v31  ;;  %539 = vmatpush1.bf16.msra.mxu1 %v1514_v32  ;;  %v1533_v47 = vld [vmem:[%s1878_s4 + $0x120] ss:$16 sps:$4 sm:$0x3f]   ;;  %v1536_v48 = vld [vmem:[%s1878_s4 + $0x128] ss:$16 sps:$4 sm:$0x3f]   ;;  %v698_v50 = vand.u32 %v1538_v45, %v1876_v20 }
  0x4c   : > { %499 = vmatprep.subr.bf16.mxu0 %v1515_v33  ;;  %540 = vmatprep.subr.bf16.mxu1 %v1517_v34  ;;  %v1913_v51 = vld [vmem:[%s2019_s1] sm:$0x7]  ;;  %v689_v52 = vand.u32 %v1533_v47, %v1876_v20  ;;  %v695_v53 = vand.u32 %v1536_v48, %v1876_v20  ;;  %v1541_v54 = vld [vmem:[%s1878_s4 + $0x104] ss:$16 sps:$4 sm:$0xff]   ;;  %v1544_v55 = vld [vmem:[%s1878_s4 + $0x10c] ss:$16 sps:$4 sm:$0xff]  }
  0x4d   : > { %v1539_v56 = vld [vmem:[%s1878_s4 + $0x100] ss:$16 sps:$4 sm:$0xff]   ;;  %v1542_v57 = vld [vmem:[%s1878_s4 + $0x108] ss:$16 sps:$4 sm:$0xff]   ;;  %v1547_v58 = vld [vmem:[%s1878_s4 + $0xe4] ss:$16 sps:$4 sm:$0xff]  }
  0x4e   : > { %v1550_v59 = vld [vmem:[%s1878_s4 + $0xec] ss:$16 sps:$4 sm:$0xff]   ;;  %v1545_v60 = vld [vmem:[%s1878_s4 + $0xe0] ss:$16 sps:$4 sm:$0xff]   ;;  %v1548_v61 = vld [vmem:[%s1878_s4 + $0xe8] ss:$16 sps:$4 sm:$0xff]  }
  0x4f   : > { %500 = vmatpush1.bf16.msra.mxu0 %v1519_v35  ;;  %541 = vmatpush1.bf16.msra.mxu1 %v1520_v36  ;;  %v1553_v62 = vld [vmem:[%s1878_s4 + $0xc4] ss:$16 sps:$4 sm:$0xff]   ;;  %v1556_v63 = vld [vmem:[%s1878_s4 + $0xcc] ss:$16 sps:$4 sm:$0xff]   ;;  %v1551_v0 = vld [vmem:[%s1878_s4 + $0xc0] ss:$16 sps:$4 sm:$0xff]  }
  0x50   : > { %501 = vmatprep.subr.bf16.mxu0 %v1521_v37  ;;  %542 = vmatprep.subr.bf16.mxu1 %v1523_v38  ;;  %v1554_v1 = vld [vmem:[%s1878_s4 + $0xc8] ss:$16 sps:$4 sm:$0xff]   ;;  %v1559_v2 = vld [vmem:[%s1878_s4 + $0xa4] ss:$16 sps:$4 sm:$0xff]   ;;  %v1562_v4 = vld [vmem:[%s1878_s4 + $0xac] ss:$16 sps:$4 sm:$0xff]  }
  0x51   : > { %v1565_v3 = vld [vmem:[%s1878_s4 + $0x1c4] ss:$16 sps:$4 sm:$0x3f]   ;;  %v1568_v5 = vld [vmem:[%s1878_s4 + $0x1cc] ss:$16 sps:$4 sm:$0x3f]  }
  0x52   : > { %v1557_v6 = vld [vmem:[%s1878_s4 + $0xa0] ss:$16 sps:$4 sm:$0xff]   ;;  %v1560_v7 = vld [vmem:[%s1878_s4 + $0xa8] ss:$16 sps:$4 sm:$0xff]   ;;  %v907_v10 = vand.u32 %v1565_v3, %v1876_v20  ;;  %v913_v11 = vand.u32 %v1568_v5, %v1876_v20  ;;  %v1571_v14 = vld [vmem:[%s1878_s4 + $0x1a4] ss:$16 sps:$4 sm:$0xff]  }
  0x53   : > { %502 = vmatpush1.bf16.msra.mxu0 %v1525_v39  ;;  %543 = vmatpush1.bf16.msra.mxu1 %v1526_v40  ;;  %v1563_v8 = vld [vmem:[%s1878_s4 + $0x1c0] ss:$16 sps:$4 sm:$0x3f]   ;;  %v1566_v9 = vld [vmem:[%s1878_s4 + $0x1c8] ss:$16 sps:$4 sm:$0x3f]  }
  0x54   : > { %503 = vmatprep.subr.bf16.mxu0 %v1527_v41  ;;  %544 = vmatprep.subr.bf16.mxu1 %v1529_v42  ;;  %v904_v12 = vand.u32 %v1563_v8, %v1876_v20  ;;  %v910_v13 = vand.u32 %v1566_v9, %v1876_v20  ;;  %v1574_v15 = vld [vmem:[%s1878_s4 + $0x1ac] ss:$16 sps:$4 sm:$0xff]   ;;  %v1569_v16 = vld [vmem:[%s1878_s4 + $0x1a0] ss:$16 sps:$4 sm:$0xff]   ;;  %v1572_v17 = vld [vmem:[%s1878_s4 + $0x1a8] ss:$16 sps:$4 sm:$0xff]  }
  0x55   : > { %v1577_v19 = vld [vmem:[%s1878_s4 + $0x184] ss:$16 sps:$4 sm:$0xff]   ;;  %v1580_v21 = vld [vmem:[%s1878_s4 + $0x18c] ss:$16 sps:$4 sm:$0xff]   ;;  %v1575_v22 = vld [vmem:[%s1878_s4 + $0x180] ss:$16 sps:$4 sm:$0xff]  }
  0x56   : > { %v1578_v23 = vld [vmem:[%s1878_s4 + $0x188] ss:$16 sps:$4 sm:$0xff]   ;;  %v1583_v24 = vld [vmem:[%s1878_s4 + $0x164] ss:$16 sps:$4 sm:$0xff]   ;;  %v1586_v25 = vld [vmem:[%s1878_s4 + $0x16c] ss:$16 sps:$4 sm:$0xff]  }
  0x57   : > { %504 = vmatpush1.bf16.msra.mxu0 %v1531_v44  ;;  %545 = vmatpush1.bf16.msra.mxu1 %v1532_v46  ;;  %v1581_v26 = vld [vmem:[%s1878_s4 + $0x160] ss:$16 sps:$4 sm:$0xff]   ;;  %v1584_v27 = vld [vmem:[%s1878_s4 + $0x168] ss:$16 sps:$4 sm:$0xff]   ;;  %v1589_v28 = vld [vmem:[%s1878_s4 + $0x144] ss:$16 sps:$4 sm:$0xff]  }
  0x58   : > { %706 = vmatprep.subr.bf16.mxu0 %v692_v49  ;;  %747 = vmatprep.subr.bf16.mxu1 %v698_v50  ;;  %v1592_v29 = vld [vmem:[%s1878_s4 + $0x14c] ss:$16 sps:$4 sm:$0xff]   ;;  %v1595_v30 = vld [vmem:[%s1878_s4 + $0x264] ss:$16 sps:$4 sm:$0x3f]   ;;  %s1318_s8 = sshll.u32 %s2026_s7, 2 }
  0x59   : > { %v1598_v31 = vld [vmem:[%s1878_s4 + $0x26c] ss:$16 sps:$4 sm:$0x3f]   ;;  %v1587_v32 = vld [vmem:[%s1878_s4 + $0x140] ss:$16 sps:$4 sm:$0xff]   ;;  %v1122_v36 = vand.u32 %v1595_v30, %v1876_v20  ;;  %s349_s11 = scalar_lea.vmem %s2021_s3, %s1318_s8 }
  0x5a   : > { %1339 = vmatmul.mubr.msk.bf16.vlgmr.msra.gmra.mxu0 %vm469_vm2, %v1913_v51  ;;  %1340 = vmatmul.mubr.msk.bf16.vlgmr.msra.gmra.mxu1 %vm469_vm2, %v1913_v51  ;;  %v1590_v33 = vld [vmem:[%s1878_s4 + $0x148] ss:$16 sps:$4 sm:$0xff]   ;;  %v1593_v34 = vld [vmem:[%s1878_s4 + $0x260] ss:$16 sps:$4 sm:$0x3f]   ;;  %v1128_v37 = vand.u32 %v1598_v31, %v1876_v20 }
  0x5b   : > { %707 = vmatpush1.bf16.msra.mxu0 %v689_v52  ;;  %748 = vmatpush1.bf16.msra.mxu1 %v695_v53  ;;  %v1596_v35 = vld [vmem:[%s1878_s4 + $0x268] ss:$16 sps:$4 sm:$0x3f]   ;;  %v1119_v38 = vand.u32 %v1593_v34, %v1876_v20  ;;  %v1601_v40 = vld [vmem:[%s1878_s4 + $0x244] ss:$16 sps:$4 sm:$0xff]  }
  0x5c   : > { %708 = vmatprep.subr.bf16.mxu0 %v1541_v54  ;;  %749 = vmatprep.subr.bf16.mxu1 %v1544_v55  ;;  %v1125_v39 = vand.u32 %v1596_v35, %v1876_v20  ;;  %v1604_v41 = vld [vmem:[%s1878_s4 + $0x24c] ss:$16 sps:$4 sm:$0xff]   ;;  %v1599_v42 = vld [vmem:[%s1878_s4 + $0x240] ss:$16 sps:$4 sm:$0xff]   ;;  %v1602_v43 = vld [vmem:[%s1878_s4 + $0x248] ss:$16 sps:$4 sm:$0xff]  }
  0x5d   : > { %732 = vmatprep.mubr.bf16.mxu0 %v1648_v18  ;;  %773 = vmatprep.mubr.bf16.mxu1 %v1648_v18  ;;  %v1607_v20 = vld [vmem:[%s1878_s4 + $0x224] ss:$16 sps:$4 sm:$0xff]   ;;  %v1610_v44 = vld [vmem:[%s1878_s4 + $0x22c] ss:$16 sps:$4 sm:$0xff]   ;;  %v1605_v45 = vld [vmem:[%s1878_s4 + $0x220] ss:$16 sps:$4 sm:$0xff]  }
  0x5e   : > { %v1608_v46 = vld [vmem:[%s1878_s4 + $0x228] ss:$16 sps:$4 sm:$0xff]   ;;  %v1613_v47 = vld [vmem:[%s1878_s4 + $0x204] ss:$16 sps:$4 sm:$0xff]   ;;  %v1616_v48 = vld [vmem:[%s1878_s4 + $0x20c] ss:$16 sps:$4 sm:$0xff]  }
  0x5f   : > { %709 = vmatpush1.bf16.msra.mxu0 %v1539_v56  ;;  %750 = vmatpush1.bf16.msra.mxu1 %v1542_v57  ;;  %v1611_v49 = vld [vmem:[%s1878_s4 + $0x200] ss:$16 sps:$4 sm:$0xff]   ;;  %v1614_v50 = vld [vmem:[%s1878_s4 + $0x208] ss:$16 sps:$4 sm:$0xff]   ;;  %v1619_v52 = vld [vmem:[%s1878_s4 + $0x1e4] ss:$16 sps:$4 sm:$0xff]  }
  0x60   : > { %710 = vmatprep.subr.bf16.mxu0 %v1547_v58  ;;  %751 = vmatprep.subr.bf16.mxu1 %v1550_v59  ;;  %v1622_v53 = vld [vmem:[%s1878_s4 + $0x1ec] ss:$16 sps:$4 sm:$0xff]   ;;  %v1620_v54 = vld [vmem:[%s1878_s4 + $0x1e8] ss:$16 sps:$4 sm:$0xff]  }
  0x63   : > { %711 = vmatpush1.bf16.msra.mxu0 %v1545_v60  ;;  %752 = vmatpush1.bf16.msra.mxu1 %v1548_v61 }
  0x64   : > { %712 = vmatprep.subr.bf16.mxu0 %v1553_v62  ;;  %753 = vmatprep.subr.bf16.mxu1 %v1556_v63 }
  0x67   : > { %713 = vmatpush1.bf16.msra.mxu0 %v1551_v0  ;;  %754 = vmatpush1.bf16.msra.mxu1 %v1554_v1 }
  0x68   : > { %714 = vmatprep.subr.bf16.mxu0 %v1559_v2  ;;  %755 = vmatprep.subr.bf16.mxu1 %v1562_v4 }
  0x6b   : > { %715 = vmatpush1.bf16.msra.mxu0 %v1557_v6  ;;  %756 = vmatpush1.bf16.msra.mxu1 %v1560_v7 }
  0x6c   : > { %921 = vmatprep.subr.bf16.mxu0 %v907_v10  ;;  %962 = vmatprep.subr.bf16.mxu1 %v913_v11 }
  0x6e   : > { %1381 = vmatmul.mubr.msk.bf16.vlgmr.msra.gmra.mxu0 %vm469_vm2, %v1913_v51  ;;  %1382 = vmatmul.mubr.msk.bf16.vlgmr.msra.gmra.mxu1 %vm469_vm2, %v1913_v51 }
  0x6f   : > { %922 = vmatpush1.bf16.msra.mxu0 %v904_v12  ;;  %963 = vmatpush1.bf16.msra.mxu1 %v910_v13 }
  0x70   : > { %923 = vmatprep.subr.bf16.mxu0 %v1571_v14  ;;  %964 = vmatprep.subr.bf16.mxu1 %v1574_v15 }
  0x71   : > { %947 = vmatprep.mubr.bf16.mxu0 %v1648_v18  ;;  %988 = vmatprep.mubr.bf16.mxu1 %v1648_v18 }
  0x73   : > { %924 = vmatpush1.bf16.msra.mxu0 %v1569_v16  ;;  %965 = vmatpush1.bf16.msra.mxu1 %v1572_v17 }
  0x74   : > { %925 = vmatprep.subr.bf16.mxu0 %v1577_v19  ;;  %966 = vmatprep.subr.bf16.mxu1 %v1580_v21 }
  0x77   : > { %926 = vmatpush1.bf16.msra.mxu0 %v1575_v22  ;;  %967 = vmatpush1.bf16.msra.mxu1 %v1578_v23 }
  0x78   : > { %927 = vmatprep.subr.bf16.mxu0 %v1583_v24  ;;  %968 = vmatprep.subr.bf16.mxu1 %v1586_v25 }
  0x7b   : > { %928 = vmatpush1.bf16.msra.mxu0 %v1581_v26  ;;  %969 = vmatpush1.bf16.msra.mxu1 %v1584_v27 }
  0x7c   : > { %929 = vmatprep.subr.bf16.mxu0 %v1589_v28  ;;  %970 = vmatprep.subr.bf16.mxu1 %v1592_v29 }
  0x7f   : > { %930 = vmatpush1.bf16.msra.mxu0 %v1587_v32  ;;  %971 = vmatpush1.bf16.msra.mxu1 %v1590_v33 }
  0x80   : > { %1136 = vmatprep.subr.bf16.mxu0 %v1122_v36  ;;  %1177 = vmatprep.subr.bf16.mxu1 %v1128_v37 }
  0x82   : > { %1423 = vmatmul.mubr.msk.bf16.vlgmr.msra.gmra.mxu0 %vm469_vm2, %v1913_v51  ;;  %1424 = vmatmul.mubr.msk.bf16.vlgmr.msra.gmra.mxu1 %vm469_vm2, %v1913_v51 }
  0x83   : > { %1137 = vmatpush1.bf16.msra.mxu0 %v1119_v38  ;;  %1178 = vmatpush1.bf16.msra.mxu1 %v1125_v39 }
  0x84   : > { %1138 = vmatprep.subr.bf16.mxu0 %v1601_v40  ;;  %1179 = vmatprep.subr.bf16.mxu1 %v1604_v41 }
  0x85   : > { %1162 = vmatprep.mubr.bf16.mxu0 %v1648_v18  ;;  %1203 = vmatprep.mubr.bf16.mxu1 %v1648_v18  ;;  %v1617_v18 = vld [vmem:[%s1878_s4 + $0x1e0] ss:$16 sps:$4 sm:$0xff]  }
  0x87   : > { %1139 = vmatpush1.bf16.msra.mxu0 %v1599_v42  ;;  %1180 = vmatpush1.bf16.msra.mxu1 %v1602_v43 }
  0x88   : > { %1140 = vmatprep.subr.bf16.mxu0 %v1607_v20  ;;  %1181 = vmatprep.subr.bf16.mxu1 %v1610_v44 }
  0x8b   : > { %1141 = vmatpush1.bf16.msra.mxu0 %v1605_v45  ;;  %1182 = vmatpush1.bf16.msra.mxu1 %v1608_v46 }
  0x8c   : > { %1142 = vmatprep.subr.bf16.mxu0 %v1613_v47  ;;  %1183 = vmatprep.subr.bf16.mxu1 %v1616_v48 }
  0x8f   : > { %1143 = vmatpush1.bf16.msra.mxu0 %v1611_v49  ;;  %1184 = vmatpush1.bf16.msra.mxu1 %v1614_v50 }
  0x90   : > { %1144 = vmatprep.subr.bf16.mxu0 %v1619_v52  ;;  %1185 = vmatprep.subr.bf16.mxu1 %v1622_v53 }
  0x93   : > { %1145 = vmatpush1.bf16.msra.mxu0 %v1617_v18  ;;  %1186 = vmatpush1.bf16.msra.mxu1 %v1620_v54 }
  0x96   : > { %1465 = vmatmul.mubr.msk.bf16.vlgmr.msra.gmra.mxu0 %vm469_vm2, %v1913_v51  ;;  %1466 = vmatmul.mubr.msk.bf16.vlgmr.msra.gmra.mxu1 %vm469_vm2, %v1913_v51 }
  0xbf   : > { %v1220_v22 = vpop.permute.xlu0 %1219 }
 0x11a   : > { %v523_v55 = vpop.f32.mrf.mxu0  ;;  %v564_v56 = vpop.f32.mrf.mxu1 }
 0x11c   : > { %v525_v57 = vpop.f32.mrf.mxu0  ;;  %v566_v58 = vpop.f32.mrf.mxu1 }
 0x11e   : > { %v527_v59 = vpop.f32.mrf.mxu0  ;;  %v568_v60 = vpop.f32.mrf.mxu1 }
 0x120   : > { %v528_v61 = vpop.f32.mrf.mxu0  ;;  %v569_v62 = vpop.f32.mrf.mxu1 }
 0x12e   : > { %v734_v63 = vpop.f32.mrf.mxu0  ;;  %v775_v0 = vpop.f32.mrf.mxu1 }
 0x12f   : > { %v782_v14 = vmax.f32 %v523_v55, %v734_v63  ;;  %v784_v15 = vmax.f32 %v564_v56, %v775_v0 }
 0x130   : > { %v736_v1 = vpop.f32.mrf.mxu0  ;;  %v777_v2 = vpop.f32.mrf.mxu1 }
 0x131   : > { %v783_v16 = vmax.f32 %v525_v57, %v736_v1  ;;  %v785_v17 = vmax.f32 %v566_v58, %v777_v2 }
 0x132   : > { %v738_v3 = vpop.f32.mrf.mxu0  ;;  %v779_v4 = vpop.f32.mrf.mxu1 }
 0x134   : > { %v739_v5 = vpop.f32.mrf.mxu0  ;;  %v780_v6 = vpop.f32.mrf.mxu1 }
 0x142   : > { %v949_v7 = vpop.f32.mrf.mxu0  ;;  %v990_v8 = vpop.f32.mrf.mxu1 }
 0x143   : > { %v997_v19 = vmax.f32 %v782_v14, %v949_v7  ;;  %v999_v21 = vmax.f32 %v784_v15, %v990_v8 }
 0x144   : > { %v951_v51 = vpop.f32.mrf.mxu0  ;;  %v992_v9 = vpop.f32.mrf.mxu1 }
 0x145   : > { %v998_v25 = vmax.f32 %v783_v16, %v951_v51  ;;  %v1000_v26 = vmax.f32 %v785_v17, %v992_v9 }
 0x146   : > { %v953_v10 = vpop.f32.mrf.mxu0  ;;  %v994_v11 = vpop.f32.mrf.mxu1 }
 0x148   : > { %v954_v12 = vpop.f32.mrf.mxu0  ;;  %v995_v13 = vpop.f32.mrf.mxu1 }
 0x156   : > { %v1164_v23 = vpop.f32.mrf.mxu0  ;;  %v1205_v24 = vpop.f32.mrf.mxu1 }
 0x157   : > { %v1212_v27 = vmax.f32 %v997_v19, %v1164_v23  ;;  %v1214_v28 = vmax.f32 %v999_v21, %v1205_v24 }
 0x158   : > { %v1166_v29 = vpop.f32.mrf.mxu0  ;;  %v1207_v30 = vpop.f32.mrf.mxu1 }
 0x159   : > { %v1222_v31 = vadd.f32 %v1220_v22, %v1212_v27  ;;  %v1224_v32 = vadd.f32 %v1220_v22, %v1214_v28  ;;  %v1213_v33 = vmax.f32 %v998_v25, %v1166_v29  ;;  %v1215_v34 = vmax.f32 %v1000_v26, %v1207_v30 }
 0x15a   : > { %v1168_v35 = vpop.f32.mrf.mxu0  ;;  %v1209_v36 = vpop.f32.mrf.mxu1 }
 0x15b   : > { %v1223_v37 = vadd.f32 %v1220_v22, %v1213_v33  ;;  %v1225_v38 = vadd.f32 %v1220_v22, %v1215_v34  ;;  %v1226_v41 = vmax.f32 %v1222_v31, 0.0  ;;  %v1228_v42 = vmax.f32 %v1224_v32, 0.0 }
 0x15c   : > { %v1169_v39 = vpop.f32.mrf.mxu0  ;;  %v1210_v40 = vpop.f32.mrf.mxu1 }
 0x15d   : > { %v1227_v43 = vmax.f32 %v1223_v37, 0.0  ;;  %v1229_v20 = vmax.f32 %v1225_v38, 0.0 }
 0x15f   : > { %v1472_v44 = vpack.c.bf16 %v1227_v43, %v1226_v41  ;;  %v1473_v45 = vpack.c.bf16 %v1229_v20, %v1228_v42 }
 0x161   : > { %1246 = vst [vmem:[%s349_s11] sm:$0x77] %v1472_v44  ;;  %1247 = vst [vmem:[%s349_s11 + $0x8] sm:$0x77] %v1473_v45 }
 0x162 PF: > { %p10_p9 = scmp.ge.s32.totalorder %s1686_s16, 6   ;;  %s2022_s12 = smov %s1641_s13 }
 0x163   : > { %s2023_s13 = smov %s1695_s19  ;;  %s2024_s14 = smov %s1686_s16 }
 0x164   :  { %12 = sbr.rel (!%p10_p9) target bundleno = 2 (0x2), region = 93 }

// kernel: cnn_forward.4
= control target key start
LH: loop header
LB: loop body
LE: loop exit
PB: predicated region body
PF: predicated region fallthrough
CT: control target
= control target key end

     0   :  { %v1653_v0 = vmov 0   ;;  %vm216_vm0 = vcmask 179200   ;;  %vm220_vm1 = vcmask 1042432   ;;  %s2127_s0 = inlined_call_operand.vmem [shape: bf16[4,150,384], index: 0, kind: input, shape index: {}]   ;;  %s2128_s1 = inlined_call_operand.vmem [shape: bf16[16,150], index: 1, kind: input, shape index: {}]   ;;  %s2129_s2 = inlined_call_operand.vmem [shape: f32[16,1], index: 2, kind: input, shape index: {}]   ;;  %s2130_s3 = inlined_call_operand.vmem [shape: bf16[16,384], index: 3, kind: output, shape index: {}]  }
   0x1   :  { %273 = vmatprep.subr.bf16.mxu1 %v1653_v0  ;;  %v1494_v1 = vld [vmem:[%s2127_s0 + $0xac] ss:$12 sps:$4 sm:$0xff]   ;;  %1493 = vset.pattern.permute.xlu0 %v1653_v0  ;;  %v1496_v2 = vld [vmem:[%s2127_s0 + $0xb0] ss:$12 sps:$4 sm:$0xff]   ;;  %v1497_v3 = vld [vmem:[%s2127_s0 + $0xa8] ss:$12 sps:$4 sm:$0xff]  }
   0x2   :  { %230 = vmatprep.subr.bf16.mxu0 %v1494_v1  ;;  %274 = vmatpush1.bf16.msra.mxu1 %v1496_v2  ;;  %v1498_v4 = vld [vmem:[%s2127_s0 + $0x94] ss:$12 sps:$4 sm:$0xff]   ;;  %v1500_v5 = vld [vmem:[%s2127_s0 + $0x98] ss:$12 sps:$4 sm:$0xff]   ;;  %v1501_v6 = vld [vmem:[%s2127_s0 + $0x90] ss:$12 sps:$4 sm:$0xff]  }
   0x3   :  { %231 = vmatpush1.bf16.msra.mxu0 %v1497_v3  ;;  %275 = vmatprep.subr.bf16.mxu1 %v1653_v0  ;;  %v1502_v7 = vld [vmem:[%s2127_s0 + $0x7c] ss:$12 sps:$4 sm:$0xff]   ;;  %v1504_v8 = vld [vmem:[%s2127_s0 + $0x80] ss:$12 sps:$4 sm:$0xff]   ;;  %v1505_v9 = vld [vmem:[%s2127_s0 + $0x78] ss:$12 sps:$4 sm:$0xff]  }
   0x4   :  { %232 = vmatprep.subr.bf16.mxu0 %v1498_v4  ;;  %v1506_v10 = vld [vmem:[%s2127_s0 + $0x64] ss:$12 sps:$4 sm:$0xff]   ;;  %v1508_v11 = vld [vmem:[%s2127_s0 + $0x68] ss:$12 sps:$4 sm:$0xff]   ;;  %v1509_v12 = vld [vmem:[%s2127_s0 + $0x60] ss:$12 sps:$4 sm:$0xff]  }
   0x5   :  { %v1510_v13 = vld [vmem:[%s2127_s0 + $0x4c] ss:$12 sps:$4 sm:$0xff]   ;;  %v1512_v14 = vld [vmem:[%s2127_s0 + $0x50] ss:$12 sps:$4 sm:$0xff]   ;;  %v1513_v15 = vld [vmem:[%s2127_s0 + $0x48] ss:$12 sps:$4 sm:$0xff]  }
   0x6   :  { %276 = vmatpush1.bf16.msra.mxu1 %v1500_v5  ;;  %v1514_v16 = vld [vmem:[%s2127_s0 + $0x34] ss:$12 sps:$4 sm:$0xff]   ;;  %v1516_v17 = vld [vmem:[%s2127_s0 + $0x38] ss:$12 sps:$4 sm:$0xff]   ;;  %v1517_v18 = vld [vmem:[%s2127_s0 + $0x30] ss:$12 sps:$4 sm:$0xff]  }
   0x7   :  { %233 = vmatpush1.bf16.msra.mxu0 %v1501_v6  ;;  %277 = vmatprep.subr.bf16.mxu1 %v1653_v0  ;;  %v1518_v19 = vld [vmem:[%s2127_s0 + $0x1c] ss:$12 sps:$4 sm:$0xff]   ;;  %v1520_v20 = vld [vmem:[%s2127_s0 + $0x20] ss:$12 sps:$4 sm:$0xff]   ;;  %v1521_v22 = vld [vmem:[%s2127_s0 + $0x18] ss:$12 sps:$4 sm:$0xff]  }
   0x8   :  { %234 = vmatprep.subr.bf16.mxu0 %v1502_v7  ;;  %v1744_v21 = vld [vmem:[%s2128_s1 + $0x4] ss:$8 sps:$4 sm:$0xff]   ;;  %v1524_v24 = vld [vmem:[%s2127_s0 + $0x8] ss:$12 sps:$4 sm:$0xff]   ;;  %v53_v25 = vld [vmem:[%s2127_s0 + $0xd8] sm:$0x77] }
   0x9   :  { %v1522_v23 = vld [vmem:[%s2127_s0 + $0x4] ss:$12 sps:$4 sm:$0xff]   ;;  %1270 = vmatprep.mubr.msk.bf16.mxu1 %vm216_vm0, %v1744_v21  ;;  %1269 = vmatprep.mubr.msk.bf16.mxu0 %vm216_vm0, %v1744_v21  ;;  %v1525_v26 = vld [vmem:[%s2127_s0] ss:$12 sps:$4 sm:$0xff]   ;;  %v1266_v28 = vcombine.high %v53_v25, %v53_v25  ;;  %v1265_v29 = vcombine.low %v53_v25, %v53_v25  ;;  %v1531_v33 = vld [vmem:[%s2127_s0 + $0xc8] ss:$12 sps:$4 sm:$0xff]  }
   0xa   :  { %278 = vmatpush1.bf16.msra.mxu1 %v1504_v8  ;;  %v1527_v27 = vld [vmem:[%s2127_s0 + $0xe0] ss:$0 sps:$4 sm:$0x77]   ;;  %v1529_v32 = vld [vmem:[%s2127_s0 + $0xc4] ss:$12 sps:$4 sm:$0xff]  }
   0xb   :  { %235 = vmatpush1.bf16.msra.mxu0 %v1505_v9  ;;  %279 = vmatprep.subr.bf16.mxu1 %v1653_v0  ;;  %v228_v30 = vsel %vm220_vm1, %v1527_v27, 0  ;;  %v222_v31 = vsel %vm220_vm1, %v1265_v29, 0  ;;  %v1532_v34 = vld [vmem:[%s2127_s0 + $0xc0] ss:$12 sps:$4 sm:$0xff]   ;;  %v1538_v35 = vld [vmem:[%s2127_s0 + $0x190] ss:$12 sps:$4 sm:$0xff]  }
   0xc   :  { %236 = vmatprep.subr.bf16.mxu0 %v1506_v10  ;;  %v1790_v36 = vld [vmem:[%s2128_s1] ss:$8 sps:$4 sm:$0xff]   ;;  %v1536_v38 = vld [vmem:[%s2127_s0 + $0x18c] ss:$12 sps:$4 sm:$0xff]   ;;  %v1547_v43 = vld [vmem:[%s2127_s0 + $0x164] ss:$12 sps:$4 sm:$0xff]  }
   0xd   :  { %v1539_v37 = vld [vmem:[%s2127_s0 + $0x194] ss:$12 sps:$4 sm:$0xff]   ;;  %v1542_v39 = vld [vmem:[%s2127_s0 + $0x178] ss:$12 sps:$4 sm:$0xff]   ;;  %v1543_v40 = vld [vmem:[%s2127_s0 + $0x17c] ss:$12 sps:$4 sm:$0xff]  }
   0xe   :  { %280 = vmatpush1.bf16.msra.mxu1 %v1508_v11  ;;  %v1540_v41 = vld [vmem:[%s2127_s0 + $0x174] ss:$12 sps:$4 sm:$0xff]   ;;  %v1544_v44 = vld [vmem:[%s2127_s0 + $0x15c] ss:$12 sps:$4 sm:$0xff]   ;;  %v1551_v46 = vld [vmem:[%s2127_s0 + $0x14c] ss:$12 sps:$4 sm:$0xff]  }
   0xf   :  { %237 = vmatpush1.bf16.msra.mxu0 %v1509_v12  ;;  %281 = vmatprep.subr.bf16.mxu1 %v1653_v0  ;;  %v1546_v42 = vld [vmem:[%s2127_s0 + $0x160] ss:$12 sps:$4 sm:$0xff]   ;;  %v1550_v45 = vld [vmem:[%s2127_s0 + $0x148] ss:$12 sps:$4 sm:$0xff]   ;;  %v1548_v47 = vld [vmem:[%s2127_s0 + $0x144] ss:$12 sps:$4 sm:$0xff]  }
  0x10   :  { %238 = vmatprep.subr.bf16.mxu0 %v1510_v13  ;;  %v1554_v48 = vld [vmem:[%s2127_s0 + $0x130] ss:$12 sps:$4 sm:$0xff]   ;;  %v1555_v49 = vld [vmem:[%s2127_s0 + $0x134] ss:$12 sps:$4 sm:$0xff]   ;;  %v1552_v50 = vld [vmem:[%s2127_s0 + $0x12c] ss:$12 sps:$4 sm:$0xff]  }
  0x11   :  { %v1558_v51 = vld [vmem:[%s2127_s0 + $0x118] ss:$12 sps:$4 sm:$0xff]   ;;  %v1559_v52 = vld [vmem:[%s2127_s0 + $0x11c] ss:$12 sps:$4 sm:$0xff]   ;;  %v1556_v53 = vld [vmem:[%s2127_s0 + $0x114] ss:$12 sps:$4 sm:$0xff]  }
  0x12   :  { %282 = vmatpush1.bf16.msra.mxu1 %v1512_v14  ;;  %v1562_v54 = vld [vmem:[%s2127_s0 + $0x100] ss:$12 sps:$4 sm:$0xff]   ;;  %v1563_v55 = vld [vmem:[%s2127_s0 + $0x104] ss:$12 sps:$4 sm:$0xff]   ;;  %v1560_v56 = vld [vmem:[%s2127_s0 + $0xfc] ss:$12 sps:$4 sm:$0xff]  }
  0x13   :  { %239 = vmatpush1.bf16.msra.mxu0 %v1513_v15  ;;  %283 = vmatprep.subr.bf16.mxu1 %v1653_v0  ;;  %v1566_v57 = vld [vmem:[%s2127_s0 + $0xe8] ss:$12 sps:$4 sm:$0xff]   ;;  %v1564_v58 = vld [vmem:[%s2127_s0 + $0xe4] ss:$12 sps:$4 sm:$0xff]   ;;  %v1307_v59 = vld [vmem:[%s2127_s0 + $0x1bc] sm:$0x77] }
  0x14   :  { %240 = vmatprep.subr.bf16.mxu0 %v1514_v16  ;;  %v1567_v60 = vld [vmem:[%s2127_s0 + $0xec] ss:$12 sps:$4 sm:$0xff]   ;;  %v1569_v61 = vld [vmem:[%s2127_s0 + $0x1c4] ss:$0 sps:$4 sm:$0x77]   ;;  %v1337_v62 = vcombine.high %v1307_v59, %v1307_v59  ;;  %v1336_v63 = vcombine.low %v1307_v59, %v1307_v59 }
  0x15   :  { %v512_v1 = vsel %vm220_vm1, %v1569_v61, 0  ;;  %v1573_v3 = vld [vmem:[%s2127_s0 + $0x1a8] ss:$12 sps:$4 sm:$0xff]   ;;  %v1574_v4 = vld [vmem:[%s2127_s0 + $0x1ac] ss:$12 sps:$4 sm:$0xff]   ;;  %v1184_v16 = vld [vmem:[%s2129_s2] sm:$0xff] }
  0x16   :  { %284 = vmatpush1.bf16.msra.mxu1 %v1516_v17  ;;  %v506_v2 = vsel %vm220_vm1, %v1336_v63, 0  ;;  %v1571_v5 = vld [vmem:[%s2127_s0 + $0x1a4] ss:$12 sps:$4 sm:$0xff]   ;;  %v1577_v6 = vld [vmem:[%s2127_s0 + $0x274] ss:$12 sps:$4 sm:$0xff]   ;;  %1188 = vperm.xlu0 %1493, %v1184_v16  }
  0x17   :  { %241 = vmatpush1.bf16.msra.mxu0 %v1517_v18  ;;  %285 = vmatprep.subr.bf16.mxu1 %v1653_v0  ;;  %v1578_v7 = vld [vmem:[%s2127_s0 + $0x278] ss:$12 sps:$4 sm:$0xff]   ;;  %v1575_v8 = vld [vmem:[%s2127_s0 + $0x270] ss:$12 sps:$4 sm:$0xff]   ;;  %v1582_v10 = vld [vmem:[%s2127_s0 + $0x260] ss:$12 sps:$4 sm:$0xff]  }
  0x18   :  { %242 = vmatprep.subr.bf16.mxu0 %v1518_v19  ;;  %v1581_v9 = vld [vmem:[%s2127_s0 + $0x25c] ss:$12 sps:$4 sm:$0xff]   ;;  %v1579_v11 = vld [vmem:[%s2127_s0 + $0x258] ss:$12 sps:$4 sm:$0xff]   ;;  %v1583_v14 = vld [vmem:[%s2127_s0 + $0x240] ss:$12 sps:$4 sm:$0xff]  }
  0x19   :  { %v1585_v12 = vld [vmem:[%s2127_s0 + $0x244] ss:$12 sps:$4 sm:$0xff]   ;;  %v1586_v13 = vld [vmem:[%s2127_s0 + $0x248] ss:$12 sps:$4 sm:$0xff]   ;;  %v1589_v15 = vld [vmem:[%s2127_s0 + $0x22c] ss:$12 sps:$4 sm:$0xff]  }
  0x1a   :  { %286 = vmatpush1.bf16.msra.mxu1 %v1520_v20  ;;  %v1590_v17 = vld [vmem:[%s2127_s0 + $0x230] ss:$12 sps:$4 sm:$0xff]   ;;  %v1587_v18 = vld [vmem:[%s2127_s0 + $0x228] ss:$12 sps:$4 sm:$0xff]   ;;  %v1594_v20 = vld [vmem:[%s2127_s0 + $0x218] ss:$12 sps:$4 sm:$0xff]  }
  0x1b   :  { %243 = vmatpush1.bf16.msra.mxu0 %v1521_v22  ;;  %287 = vmatprep.subr.bf16.mxu1 %v1653_v0  ;;  %v1593_v19 = vld [vmem:[%s2127_s0 + $0x214] ss:$12 sps:$4 sm:$0xff]   ;;  %v1591_v22 = vld [vmem:[%s2127_s0 + $0x210] ss:$12 sps:$4 sm:$0xff]   ;;  %v1595_v25 = vld [vmem:[%s2127_s0 + $0x1f8] ss:$12 sps:$4 sm:$0xff]  }
  0x1c   :  { %244 = vmatprep.subr.bf16.mxu0 %v1522_v23  ;;  %v1597_v23 = vld [vmem:[%s2127_s0 + $0x1fc] ss:$12 sps:$4 sm:$0xff]   ;;  %v1605_v29 = vld [vmem:[%s2127_s0 + $0x1cc] ss:$12 sps:$4 sm:$0xff]  }
  0x1d   :  { %v1602_v27 = vld [vmem:[%s2127_s0 + $0x1e8] ss:$12 sps:$4 sm:$0xff]   ;;  %v1641_v61 = vld [vmem:[%s2127_s0 + $0x2cc] ss:$12 sps:$4 sm:$0xff]   ;;  %v1644_v63 = vld [vmem:[%s2127_s0 + $0x2b0] ss:$12 sps:$4 sm:$0xff]  }
  0x1e   :  { %288 = vmatpush1.bf16.msra.mxu1 %v1524_v24  ;;  %v1598_v24 = vld [vmem:[%s2127_s0 + $0x200] ss:$12 sps:$4 sm:$0xff]   ;;  %v1634_v59 = vld [vmem:[%s2127_s0 + $0x2dc] ss:$12 sps:$4 sm:$0xff]  }
  0x1f   :  { %245 = vmatpush1.bf16.msra.mxu0 %v1525_v26  ;;  %301 = vmatprep.subr.bf16.mxu1 %v1653_v0  ;;  %v1601_v26 = vld [vmem:[%s2127_s0 + $0x1e4] ss:$12 sps:$4 sm:$0xff]  }
  0x20   :  { %1268 = vmatprep.subr.msk.bf16.mxu0 %vm220_vm1, %v1266_v28  ;;  %v1599_v28 = vld [vmem:[%s2127_s0 + $0x1e0] ss:$12 sps:$4 sm:$0xff]  }
  0x22   :  { %302 = vmatpush2.bf16.msra.mxu1 %v228_v30  ;;  %v1378_v30 = vld [vmem:[%s2127_s0 + $0x2a0] sm:$0x77] }
  0x23   :  { %259 = vmatpush2.bf16.msra.mxu0 %v222_v31  ;;  %303 = vmatprep.subr.bf16.mxu1 %v1653_v0  ;;  %v1606_v31 = vld [vmem:[%s2127_s0 + $0x1d0] ss:$12 sps:$4 sm:$0xff]  }
  0x24   :  { %260 = vmatprep.subr.bf16.mxu0 %v1529_v32  ;;  %v1185_v32 = vld [vmem:[%s2129_s2 + $0x8] sm:$0xff] }
  0x25   :  { %1193 = vperm.xlu0 %1493, %v1185_v32  }
  0x26   :  { %304 = vmatpush2.bf16.msra.mxu1 %v1531_v33  ;;  %v1603_v33 = vld [vmem:[%s2127_s0 + $0x1c8] ss:$12 sps:$4 sm:$0xff]  }
  0x27   :  { %261 = vmatpush2.bf16.msra.mxu0 %v1532_v34  ;;  %557 = vmatprep.subr.bf16.mxu1 %v1653_v0  ;;  %v1608_v34 = vld [vmem:[%s2127_s0 + $0x2a8] ss:$0 sps:$4 sm:$0x77]  }
  0x28   :  { %514 = vmatprep.subr.bf16.mxu0 %v1538_v35  ;;  %v1408_v35 = vcombine.high %v1378_v30, %v1378_v30 }
  0x29   :  { %306 = vmatmul.mubr.bf16.vlgmr.msra.gmra.mxu1 %v1790_v36 }
  0x2a   :  { %263 = vmatmul.mubr.bf16.vlgmr.msra.gmra.mxu0 %v1790_v36  ;;  %558 = vmatpush1.bf16.msra.mxu1 %v1539_v37  ;;  %v1407_v37 = vcombine.low %v1378_v30, %v1378_v30 }
  0x2b   :  { %515 = vmatpush1.bf16.msra.mxu0 %v1536_v38  ;;  %559 = vmatprep.subr.bf16.mxu1 %v1653_v0  ;;  %v802_v38 = vsel %vm220_vm1, %v1608_v34, 0 }
  0x2c   :  { %516 = vmatprep.subr.bf16.mxu0 %v1542_v39  ;;  %1341 = vmatprep.mubr.msk.bf16.mxu1 %vm216_vm0, %v1744_v21  ;;  %v796_v39 = vsel %vm220_vm1, %v1407_v37, 0 }
  0x2d   :  { %1340 = vmatprep.mubr.msk.bf16.mxu0 %vm216_vm0, %v1744_v21 }
  0x2e   :  { %560 = vmatpush1.bf16.msra.mxu1 %v1543_v40  ;;  %v1612_v40 = vld [vmem:[%s2127_s0 + $0x28c] ss:$12 sps:$4 sm:$0xff]  }
  0x2f   :  { %517 = vmatpush1.bf16.msra.mxu0 %v1540_v41  ;;  %561 = vmatprep.subr.bf16.mxu1 %v1653_v0  ;;  %v1613_v41 = vld [vmem:[%s2127_s0 + $0x290] ss:$12 sps:$4 sm:$0xff]  }
  0x30   :  { %518 = vmatprep.subr.bf16.mxu0 %v1546_v42  ;;  %v1610_v42 = vld [vmem:[%s2127_s0 + $0x288] ss:$12 sps:$4 sm:$0xff]  }
  0x32   :  { %562 = vmatpush1.bf16.msra.mxu1 %v1547_v43  ;;  %v1616_v43 = vld [vmem:[%s2127_s0 + $0x358] ss:$12 sps:$4 sm:$0xff]  }
  0x33   :  { %519 = vmatpush1.bf16.msra.mxu0 %v1544_v44  ;;  %563 = vmatprep.subr.bf16.mxu1 %v1653_v0  ;;  %v1617_v44 = vld [vmem:[%s2127_s0 + $0x35c] ss:$12 sps:$4 sm:$0xff]  }
  0x34   :  { %520 = vmatprep.subr.bf16.mxu0 %v1550_v45  ;;  %v1614_v45 = vld [vmem:[%s2127_s0 + $0x354] ss:$12 sps:$4 sm:$0xff]  }
  0x36   :  { %564 = vmatpush1.bf16.msra.mxu1 %v1551_v46  ;;  %v1620_v46 = vld [vmem:[%s2127_s0 + $0x340] ss:$12 sps:$4 sm:$0xff]  }
  0x37   :  { %521 = vmatpush1.bf16.msra.mxu0 %v1548_v47  ;;  %565 = vmatprep.subr.bf16.mxu1 %v1653_v0  ;;  %v1621_v47 = vld [vmem:[%s2127_s0 + $0x344] ss:$12 sps:$4 sm:$0xff]  }
  0x38   :  { %522 = vmatprep.subr.bf16.mxu0 %v1554_v48  ;;  %v1618_v48 = vld [vmem:[%s2127_s0 + $0x33c] ss:$12 sps:$4 sm:$0xff]  }
  0x3a   :  { %566 = vmatpush1.bf16.msra.mxu1 %v1555_v49  ;;  %v1624_v49 = vld [vmem:[%s2127_s0 + $0x328] ss:$12 sps:$4 sm:$0xff]  }
  0x3b   :  { %523 = vmatpush1.bf16.msra.mxu0 %v1552_v50  ;;  %567 = vmatprep.subr.bf16.mxu1 %v1653_v0  ;;  %v1625_v50 = vld [vmem:[%s2127_s0 + $0x32c] ss:$12 sps:$4 sm:$0xff]  }
  0x3c   :  { %524 = vmatprep.subr.bf16.mxu0 %v1558_v51  ;;  %v1622_v51 = vld [vmem:[%s2127_s0 + $0x324] ss:$12 sps:$4 sm:$0xff]  }
  0x3e   :  { %568 = vmatpush1.bf16.msra.mxu1 %v1559_v52  ;;  %v1628_v52 = vld [vmem:[%s2127_s0 + $0x310] ss:$12 sps:$4 sm:$0xff]  }
  0x3f   :  { %525 = vmatpush1.bf16.msra.mxu0 %v1556_v53  ;;  %569 = vmatprep.subr.bf16.mxu1 %v1653_v0  ;;  %v1626_v53 = vld [vmem:[%s2127_s0 + $0x30c] ss:$12 sps:$4 sm:$0xff]  }
  0x40   :  { %526 = vmatprep.subr.bf16.mxu0 %v1562_v54  ;;  %v1632_v54 = vld [vmem:[%s2127_s0 + $0x2f8] ss:$12 sps:$4 sm:$0xff]  }
  0x42   :  { %570 = vmatpush1.bf16.msra.mxu1 %v1563_v55  ;;  %v1633_v55 = vld [vmem:[%s2127_s0 + $0x2fc] ss:$12 sps:$4 sm:$0xff]  }
  0x43   :  { %527 = vmatpush1.bf16.msra.mxu0 %v1560_v56  ;;  %571 = vmatprep.subr.bf16.mxu1 %v1653_v0  ;;  %v1630_v56 = vld [vmem:[%s2127_s0 + $0x2f4] ss:$12 sps:$4 sm:$0xff]  }
  0x44   :  { %528 = vmatprep.subr.bf16.mxu0 %v1566_v57  ;;  %v1636_v57 = vld [vmem:[%s2127_s0 + $0x2e0] ss:$12 sps:$4 sm:$0xff]  }
  0x46   :  { %572 = vmatpush1.bf16.msra.mxu1 %v1567_v60  ;;  %v1640_v60 = vld [vmem:[%s2127_s0 + $0x2c8] ss:$12 sps:$4 sm:$0xff]  }
  0x47   :  { %529 = vmatpush1.bf16.msra.mxu0 %v1564_v58  ;;  %585 = vmatprep.subr.bf16.mxu1 %v1653_v0  ;;  %v1637_v58 = vld [vmem:[%s2127_s0 + $0x2e4] ss:$12 sps:$4 sm:$0xff]  }
  0x48   :  { %1339 = vmatprep.subr.msk.bf16.mxu0 %vm220_vm1, %v1337_v62  ;;  %v1638_v62 = vld [vmem:[%s2127_s0 + $0x2c4] ss:$12 sps:$4 sm:$0xff]  }
  0x4a   :  { %586 = vmatpush2.bf16.msra.mxu1 %v512_v1  ;;  %v1449_v1 = vld [vmem:[%s2127_s0 + $0x384] sm:$0x77] }
  0x4b   :  { %543 = vmatpush2.bf16.msra.mxu0 %v506_v2  ;;  %587 = vmatprep.subr.bf16.mxu1 %v1653_v0  ;;  %v1645_v2 = vld [vmem:[%s2127_s0 + $0x2b4] ss:$12 sps:$4 sm:$0xff]  }
  0x4c   :  { %544 = vmatprep.subr.bf16.mxu0 %v1573_v3  ;;  %v1642_v3 = vld [vmem:[%s2127_s0 + $0x2ac] ss:$12 sps:$4 sm:$0xff]  }
  0x4e   :  { %588 = vmatpush2.bf16.msra.mxu1 %v1574_v4  ;;  %v1647_v4 = vld [vmem:[%s2127_s0 + $0x38c] ss:$0 sps:$4 sm:$0x77]  }
  0x4f   :  { %545 = vmatpush2.bf16.msra.mxu0 %v1571_v5  ;;  %847 = vmatprep.subr.bf16.mxu1 %v1653_v0  ;;  %v1479_v5 = vcombine.high %v1449_v1, %v1449_v1 }
  0x50   :  { %804 = vmatprep.subr.bf16.mxu0 %v1577_v6  ;;  %v1478_v6 = vcombine.low %v1449_v1, %v1449_v1 }
  0x51   :  { %590 = vmatmul.mubr.bf16.vlgmr.msra.gmra.mxu1 %v1790_v36 }
  0x52   :  { %547 = vmatmul.mubr.bf16.vlgmr.msra.gmra.mxu0 %v1790_v36  ;;  %848 = vmatpush1.bf16.msra.mxu1 %v1578_v7  ;;  %v1092_v7 = vsel %vm220_vm1, %v1647_v4, 0 }
  0x53   :  { %805 = vmatpush1.bf16.msra.mxu0 %v1575_v8  ;;  %849 = vmatprep.subr.bf16.mxu1 %v1653_v0  ;;  %v1086_v8 = vsel %vm220_vm1, %v1478_v6, 0 }
  0x54   :  { %806 = vmatprep.subr.bf16.mxu0 %v1581_v9  ;;  %1412 = vmatprep.mubr.msk.bf16.mxu1 %vm216_vm0, %v1744_v21  ;;  %v1651_v9 = vld [vmem:[%s2127_s0 + $0x370] ss:$12 sps:$4 sm:$0xff]  }
  0x55   :  { %1411 = vmatprep.mubr.msk.bf16.mxu0 %vm216_vm0, %v1744_v21 }
  0x56   :  { %850 = vmatpush1.bf16.msra.mxu1 %v1582_v10  ;;  %v1652_v10 = vld [vmem:[%s2127_s0 + $0x374] ss:$12 sps:$4 sm:$0xff]  }
  0x57   :  { %807 = vmatpush1.bf16.msra.mxu0 %v1579_v11  ;;  %851 = vmatprep.subr.bf16.mxu1 %v1653_v0  ;;  %v1649_v11 = vld [vmem:[%s2127_s0 + $0x36c] ss:$12 sps:$4 sm:$0xff]  }
  0x58   :  { %808 = vmatprep.subr.bf16.mxu0 %v1585_v12 }
  0x5a   :  { %852 = vmatpush1.bf16.msra.mxu1 %v1586_v13 }
  0x5b   :  { %809 = vmatpush1.bf16.msra.mxu0 %v1583_v14  ;;  %853 = vmatprep.subr.bf16.mxu1 %v1653_v0 }
  0x5c   :  { %810 = vmatprep.subr.bf16.mxu0 %v1589_v15 }
  0x5e   :  { %854 = vmatpush1.bf16.msra.mxu1 %v1590_v17 }
  0x5f   :  { %811 = vmatpush1.bf16.msra.mxu0 %v1587_v18  ;;  %855 = vmatprep.subr.bf16.mxu1 %v1653_v0 }
  0x60   :  { %812 = vmatprep.subr.bf16.mxu0 %v1593_v19 }
  0x62   :  { %856 = vmatpush1.bf16.msra.mxu1 %v1594_v20 }
  0x63   :  { %813 = vmatpush1.bf16.msra.mxu0 %v1591_v22  ;;  %857 = vmatprep.subr.bf16.mxu1 %v1653_v0 }
  0x64   :  { %814 = vmatprep.subr.bf16.mxu0 %v1597_v23 }
  0x66   :  { %858 = vmatpush1.bf16.msra.mxu1 %v1598_v24 }
  0x67   :  { %815 = vmatpush1.bf16.msra.mxu0 %v1595_v25  ;;  %859 = vmatprep.subr.bf16.mxu1 %v1653_v0 }
  0x68   :  { %816 = vmatprep.subr.bf16.mxu0 %v1601_v26 }
  0x6a   :  { %860 = vmatpush1.bf16.msra.mxu1 %v1602_v27 }
  0x6b   :  { %817 = vmatpush1.bf16.msra.mxu0 %v1599_v28  ;;  %861 = vmatprep.subr.bf16.mxu1 %v1653_v0 }
  0x6c   :  { %818 = vmatprep.subr.bf16.mxu0 %v1605_v29 }
  0x6e   :  { %862 = vmatpush1.bf16.msra.mxu1 %v1606_v31 }
  0x6f   :  { %819 = vmatpush1.bf16.msra.mxu0 %v1603_v33  ;;  %875 = vmatprep.subr.bf16.mxu1 %v1653_v0 }
  0x70   :  { %1410 = vmatprep.subr.msk.bf16.mxu0 %vm220_vm1, %v1408_v35 }
  0x72   :  { %876 = vmatpush2.bf16.msra.mxu1 %v802_v38 }
  0x73   :  { %833 = vmatpush2.bf16.msra.mxu0 %v796_v39  ;;  %877 = vmatprep.subr.bf16.mxu1 %v1653_v0 }
  0x74   :  { %834 = vmatprep.subr.bf16.mxu0 %v1612_v40 }
  0x76   :  { %878 = vmatpush2.bf16.msra.mxu1 %v1613_v41 }
  0x77   :  { %835 = vmatpush2.bf16.msra.mxu0 %v1610_v42  ;;  %1137 = vmatprep.subr.bf16.mxu1 %v1653_v0 }
  0x78   :  { %1094 = vmatprep.subr.bf16.mxu0 %v1616_v43 }
  0x79   :  { %880 = vmatmul.mubr.bf16.vlgmr.msra.gmra.mxu1 %v1790_v36 }
  0x7a   :  { %837 = vmatmul.mubr.bf16.vlgmr.msra.gmra.mxu0 %v1790_v36  ;;  %1138 = vmatpush1.bf16.msra.mxu1 %v1617_v44 }
  0x7b   :  { %1095 = vmatpush1.bf16.msra.mxu0 %v1614_v45  ;;  %1139 = vmatprep.subr.bf16.mxu1 %v1653_v0 }
  0x7c   :  { %1096 = vmatprep.subr.bf16.mxu0 %v1620_v46  ;;  %1483 = vmatprep.mubr.msk.bf16.mxu1 %vm216_vm0, %v1744_v21 }
  0x7d   :  { %1482 = vmatprep.mubr.msk.bf16.mxu0 %vm216_vm0, %v1744_v21  ;;  %v1629_v21 = vld [vmem:[%s2127_s0 + $0x314] ss:$12 sps:$4 sm:$0xff]  }
  0x7e   :  { %1140 = vmatpush1.bf16.msra.mxu1 %v1621_v47 }
  0x7f   :  { %1097 = vmatpush1.bf16.msra.mxu0 %v1618_v48  ;;  %1141 = vmatprep.subr.bf16.mxu1 %v1653_v0 }
  0x80   :  { %1098 = vmatprep.subr.bf16.mxu0 %v1624_v49 }
  0x82   :  { %1142 = vmatpush1.bf16.msra.mxu1 %v1625_v50 }
  0x83   :  { %1099 = vmatpush1.bf16.msra.mxu0 %v1622_v51  ;;  %1143 = vmatprep.subr.bf16.mxu1 %v1653_v0 }
  0x84   :  { %1100 = vmatprep.subr.bf16.mxu0 %v1628_v52 }
  0x86   :  { %1144 = vmatpush1.bf16.msra.mxu1 %v1629_v21 }
  0x87   :  { %1101 = vmatpush1.bf16.msra.mxu0 %v1626_v53  ;;  %1145 = vmatprep.subr.bf16.mxu1 %v1653_v0 }
  0x88   :  { %1102 = vmatprep.subr.bf16.mxu0 %v1632_v54 }
  0x8a   :  { %1146 = vmatpush1.bf16.msra.mxu1 %v1633_v55 }
  0x8b   :  { %1103 = vmatpush1.bf16.msra.mxu0 %v1630_v56  ;;  %1147 = vmatprep.subr.bf16.mxu1 %v1653_v0 }
  0x8c   :  { %1104 = vmatprep.subr.bf16.mxu0 %v1636_v57 }
  0x8e   :  { %1148 = vmatpush1.bf16.msra.mxu1 %v1637_v58 }
  0x8f   :  { %1105 = vmatpush1.bf16.msra.mxu0 %v1634_v59  ;;  %1149 = vmatprep.subr.bf16.mxu1 %v1653_v0 }
  0x90   :  { %1106 = vmatprep.subr.bf16.mxu0 %v1640_v60 }
  0x91   :  { %v1189_v38 = vpop.permute.xlu0 %1188 }
  0x92   :  { %1150 = vmatpush1.bf16.msra.mxu1 %v1641_v61 }
  0x93   :  { %1107 = vmatpush1.bf16.msra.mxu0 %v1638_v62  ;;  %1151 = vmatprep.subr.bf16.mxu1 %v1653_v0 }
  0x94   :  { %1108 = vmatprep.subr.bf16.mxu0 %v1644_v63 }
  0x96   :  { %1152 = vmatpush1.bf16.msra.mxu1 %v1645_v2 }
  0x97   :  { %1109 = vmatpush1.bf16.msra.mxu0 %v1642_v3  ;;  %1165 = vmatprep.subr.bf16.mxu1 %v1653_v0 }
  0x98   :  { %1481 = vmatprep.subr.msk.bf16.mxu0 %vm220_vm1, %v1479_v5 }
  0x9a   :  { %1166 = vmatpush2.bf16.msra.mxu1 %v1092_v7 }
  0x9b   :  { %1123 = vmatpush2.bf16.msra.mxu0 %v1086_v8  ;;  %1167 = vmatprep.subr.bf16.mxu1 %v1653_v0 }
  0x9c   :  { %1124 = vmatprep.subr.bf16.mxu0 %v1651_v9 }
  0x9e   :  { %1168 = vmatpush2.bf16.msra.mxu1 %v1652_v10 }
  0x9f   :  { %1125 = vmatpush2.bf16.msra.mxu0 %v1649_v11 }
  0xa0   :  { %v1194_v57 = vpop.permute.xlu0 %1193 }
  0xa1   :  { %1170 = vmatmul.mubr.bf16.vlgmr.msra.gmra.mxu1 %v1790_v36 }
  0xa2   :  { %1127 = vmatmul.mubr.bf16.vlgmr.msra.gmra.mxu0 %v1790_v36 }
  0xe9   :  { %v307_v12 = vpop.f32.mrf.mxu1 }
  0xea   :  { %v264_v22 = vpop.f32.mrf.mxu0 }
  0xeb   :  { %v309_v13 = vpop.f32.mrf.mxu1 }
  0xec   :  { %v266_v25 = vpop.f32.mrf.mxu0 }
  0xed   :  { %v310_v14 = vpop.f32.mrf.mxu1 }
  0xee   :  { %v268_v28 = vpop.f32.mrf.mxu0 }
  0xef   :  { %v312_v15 = vpop.f32.mrf.mxu1 }
  0xf0   :  { %v270_v29 = vpop.f32.mrf.mxu0 }
 0x111   :  { %v591_v16 = vpop.f32.mrf.mxu1 }
 0x112   :  { %v600_v17 = vmax.f32 %v307_v12, %v591_v16  ;;  %v548_v30 = vpop.f32.mrf.mxu0 }
 0x113   :  { %v593_v18 = vpop.f32.mrf.mxu1  ;;  %v598_v37 = vmax.f32 %v264_v22, %v548_v30 }
 0x114   :  { %v550_v36 = vpop.f32.mrf.mxu0 }
 0x115   :  { %v594_v19 = vpop.f32.mrf.mxu1  ;;  %v599_v41 = vmax.f32 %v266_v25, %v550_v36 }
 0x116   :  { %v603_v0 = vmax.f32 %v310_v14, %v594_v19  ;;  %v552_v31 = vpop.f32.mrf.mxu0 }
 0x117   :  { %v596_v20 = vpop.f32.mrf.mxu1  ;;  %v601_v46 = vmax.f32 %v268_v28, %v552_v31 }
 0x118   :  { %v554_v32 = vpop.f32.mrf.mxu0 }
 0x119   :  { %v602_v21 = vmax.f32 %v270_v29, %v554_v32 }
 0x139   :  { %v881_v23 = vpop.f32.mrf.mxu1 }
 0x13a   :  { %v838_v33 = vpop.f32.mrf.mxu0  ;;  %v890_v39 = vmax.f32 %v600_v17, %v881_v23 }
 0x13b   :  { %v883_v24 = vpop.f32.mrf.mxu1  ;;  %v888_v42 = vmax.f32 %v598_v37, %v838_v33 }
 0x13c   :  { %v840_v34 = vpop.f32.mrf.mxu0 }
 0x13d   :  { %v884_v26 = vpop.f32.mrf.mxu1  ;;  %v889_v47 = vmax.f32 %v599_v41, %v840_v34 }
 0x13e   :  { %v842_v35 = vpop.f32.mrf.mxu0  ;;  %v893_v50 = vmax.f32 %v603_v0, %v884_v26 }
 0x13f   :  { %v886_v27 = vpop.f32.mrf.mxu1  ;;  %v891_v53 = vmax.f32 %v601_v46, %v842_v35 }
 0x140   :  { %v844_v40 = vpop.f32.mrf.mxu0 }
 0x141   :  { %v892_v61 = vmax.f32 %v602_v21, %v844_v40 }
 0x161   :  { %v1171_v43 = vpop.f32.mrf.mxu1 }
 0x162   :  { %v1180_v44 = vmax.f32 %v890_v39, %v1171_v43  ;;  %v1128_v45 = vpop.f32.mrf.mxu0 }
 0x163   :  { %v1178_v48 = vmax.f32 %v888_v42, %v1128_v45  ;;  %v1173_v49 = vpop.f32.mrf.mxu1 }
 0x164   :  { %v1198_v51 = vadd.f32 %v1189_v38, %v1180_v44  ;;  %v1130_v52 = vpop.f32.mrf.mxu0 }
 0x165   :  { %v1196_v54 = vadd.f32 %v1189_v38, %v1178_v48  ;;  %v1179_v55 = vmax.f32 %v889_v47, %v1130_v52  ;;  %v1174_v56 = vpop.f32.mrf.mxu1 }
 0x166   :  { %v1204_v58 = vmax.f32 %v1198_v51, 0.0  ;;  %v1183_v59 = vmax.f32 %v893_v50, %v1174_v56  ;;  %v1132_v60 = vpop.f32.mrf.mxu0 }
 0x167   :  { %v1197_v62 = vadd.f32 %v1189_v38, %v1179_v55  ;;  %v1181_v63 = vmax.f32 %v891_v53, %v1132_v60  ;;  %v1176_v1 = vpop.f32.mrf.mxu1  ;;  %v1202_v5 = vmax.f32 %v1196_v54, 0.0 }
 0x168   :  { %v1489_v2 = vpack.c.bf16 %v1204_v58, %v1204_v58  ;;  %v1201_v3 = vadd.f32 %v1194_v57, %v1183_v59  ;;  %v1134_v4 = vpop.f32.mrf.mxu0 }
 0x169   :  { %v1203_v6 = vmax.f32 %v1197_v62, 0.0  ;;  %v1199_v7 = vadd.f32 %v1194_v57, %v1181_v63  ;;  %v1182_v8 = vmax.f32 %v892_v61, %v1134_v4 }
 0x16a   :  { %1229 = vst [vmem:[%s2130_s3 + $0x8] sm:$0xf] %v1489_v2  ;;  %v1207_v9 = vmax.f32 %v1201_v3, 0.0 }
 0x16b   :  { %v1488_v10 = vpack.c.bf16 %v1203_v6, %v1202_v5  ;;  %v1200_v11 = vadd.f32 %v1194_v57, %v1182_v8  ;;  %v1205_v13 = vmax.f32 %v1199_v7, 0.0 }
 0x16c   :  { %v1491_v12 = vpack.c.bf16 %v1207_v9, %v1207_v9 }
 0x16d   :  { %1228 = vst [vmem:[%s2130_s3] sm:$0xff] %v1488_v10  ;;  %v1206_v14 = vmax.f32 %v1200_v11, 0.0 }
 0x16e   :  { %1231 = vst [vmem:[%s2130_s3 + $0x14] sm:$0xf] %v1491_v12 }
 0x16f   :  { %v1490_v15 = vpack.c.bf16 %v1206_v14, %v1205_v13 }
 0x171   :  { %1230 = vst [vmem:[%s2130_s3 + $0xc] sm:$0xff] %v1490_v15 }

// kernel: cnn_forward.5
= control target key start
LH: loop header
LB: loop body
LE: loop exit
PB: predicated region body
PF: predicated region fallthrough
CT: control target
= control target key end

     0   :  { %vm364_vm0 = vcmask 1043456   ;;  %vm365_vm1 = vcmask 1044480   ;;  %v9401_v26 = vmov 1966171168   ;;  %v132_v28 = vlaneseq  ;;  %s12083_s0 = inlined_call_operand.vmem [shape: bf16[16,2,169], index: 0, kind: input, shape index: {}]   ;;  %s12084_s1 = inlined_call_operand.vmem [shape: bf16[16,169,512], index: 1, kind: input, shape index: {}]   ;;  %s12085_s2 = inlined_call_operand.vmem [shape: f32[1,512], index: 2, kind: input, shape index: {}]   ;;  %s12086_s3 = inlined_call_operand.vmem [shape: bf16[512,128], index: 3, kind: input, shape index: {}]   ;;  %s12087_s4 = inlined_call_operand.vmem [shape: f32[1,128], index: 4, kind: input, shape index: {}]   ;;  %s12088_s5 = inlined_call_operand.vmem [shape: bf16[128,128], index: 5, kind: input, shape index: {}]   ;;  %s12089_s6 = inlined_call_operand.vmem [shape: f32[1,128], index: 6, kind: input, shape index: {}]   ;;  %s12090_s7 = inlined_call_operand.hbm [shape: f32[2,128], index: 7, kind: output, shape index: {}]  }
   0x1   :  { %v8283_v0 = vld [vmem:[%s12084_s1 + $0x244] ss:$16 sps:$4 sm:$0xff]   ;;  %v8285_v1 = vld [vmem:[%s12084_s1 + $0x24c] ss:$16 sps:$4 sm:$0xff]   ;;  %v8287_v2 = vld [vmem:[%s12084_s1 + $0x240] ss:$16 sps:$4 sm:$0xff]   ;;  %v130_v27 = vunpack.c.l.s4 %v9401_v26 }
   0x2   :  { %380 = vmatprep.subr.bf16.mxu0 %v8283_v0  ;;  %v8288_v3 = vld [vmem:[%s12084_s1 + $0x248] ss:$16 sps:$4 sm:$0xff]   ;;  %421 = vmatprep.subr.bf16.mxu1 %v8285_v1  ;;  %v8289_v4 = vld [vmem:[%s12084_s1 + $0x224] ss:$16 sps:$4 sm:$0xff]   ;;  %v8291_v5 = vld [vmem:[%s12084_s1 + $0x22c] ss:$16 sps:$4 sm:$0xff]  }
   0x3   :  { %381 = vmatpush1.bf16.msra.mxu0 %v8287_v2  ;;  %422 = vmatpush1.bf16.msra.mxu1 %v8288_v3  ;;  %v8293_v6 = vld [vmem:[%s12084_s1 + $0x220] ss:$16 sps:$4 sm:$0xff]   ;;  %v8294_v7 = vld [vmem:[%s12084_s1 + $0x228] ss:$16 sps:$4 sm:$0xff]   ;;  %v8295_v8 = vld [vmem:[%s12084_s1 + $0x204] ss:$16 sps:$4 sm:$0xff]   ;;  %v131_v37 = vunpack.c.0.s8 %v130_v27 }
   0x4   :  { %382 = vmatprep.subr.bf16.mxu0 %v8289_v4  ;;  %423 = vmatprep.subr.bf16.mxu1 %v8291_v5  ;;  %v8297_v9 = vld [vmem:[%s12084_s1 + $0x20c] ss:$16 sps:$4 sm:$0xff]   ;;  %v8299_v10 = vld [vmem:[%s12084_s1 + $0x200] ss:$16 sps:$4 sm:$0xff]   ;;  %v8300_v11 = vld [vmem:[%s12084_s1 + $0x208] ss:$16 sps:$4 sm:$0xff]  }
   0x5   :  { %v8301_v12 = vld [vmem:[%s12084_s1 + $0x1e4] ss:$16 sps:$4 sm:$0xff]   ;;  %v8303_v13 = vld [vmem:[%s12084_s1 + $0x1ec] ss:$16 sps:$4 sm:$0xff]   ;;  %v8305_v14 = vld [vmem:[%s12084_s1 + $0x1e0] ss:$16 sps:$4 sm:$0xff]  }
   0x6   :  { %v8306_v15 = vld [vmem:[%s12084_s1 + $0x1e8] ss:$16 sps:$4 sm:$0xff]   ;;  %v8307_v16 = vld [vmem:[%s12084_s1 + $0x1c4] ss:$16 sps:$4 sm:$0xff]   ;;  %v8309_v17 = vld [vmem:[%s12084_s1 + $0x1cc] ss:$16 sps:$4 sm:$0xff]  }
   0x7   :  { %383 = vmatpush1.bf16.msra.mxu0 %v8293_v6  ;;  %424 = vmatpush1.bf16.msra.mxu1 %v8294_v7  ;;  %v8311_v18 = vld [vmem:[%s12084_s1 + $0x1c0] ss:$16 sps:$4 sm:$0xff]   ;;  %v8312_v19 = vld [vmem:[%s12084_s1 + $0x1c8] ss:$16 sps:$4 sm:$0xff]   ;;  %v8313_v20 = vld [vmem:[%s12084_s1 + $0x1a4] ss:$16 sps:$4 sm:$0xff]  }
   0x8   :  { %384 = vmatprep.subr.bf16.mxu0 %v8295_v8  ;;  %425 = vmatprep.subr.bf16.mxu1 %v8297_v9  ;;  %v8315_v21 = vld [vmem:[%s12084_s1 + $0x1ac] ss:$16 sps:$4 sm:$0xff]   ;;  %v8317_v22 = vld [vmem:[%s12084_s1 + $0x1a0] ss:$16 sps:$4 sm:$0xff]   ;;  %v8318_v23 = vld [vmem:[%s12084_s1 + $0x1a8] ss:$16 sps:$4 sm:$0xff]  }
   0x9   :  { %v8319_v24 = vld [vmem:[%s12084_s1 + $0x184] ss:$16 sps:$4 sm:$0xff]   ;;  %v8321_v25 = vld [vmem:[%s12084_s1 + $0x18c] ss:$16 sps:$4 sm:$0xff]   ;;  %v8323_v29 = vld [vmem:[%s12084_s1 + $0x180] ss:$16 sps:$4 sm:$0xff]  }
   0xa   :  { %v9402_v30 = vmov 65535   ;;  %v8324_v32 = vld [vmem:[%s12084_s1 + $0x188] ss:$16 sps:$4 sm:$0xff]   ;;  %v8325_v33 = vld [vmem:[%s12084_s1 + $0x164] ss:$16 sps:$4 sm:$0xff]   ;;  %v9542_v38 = vshrl.u32 %v132_v28, 7 }
   0xb   :  { %385 = vmatpush1.bf16.msra.mxu0 %v8299_v10  ;;  %426 = vmatpush1.bf16.msra.mxu1 %v8300_v11  ;;  %v366_v31 = vsel %vm364_vm0, 4294967295, %v9402_v30  ;;  %v8327_v34 = vld [vmem:[%s12084_s1 + $0x16c] ss:$16 sps:$4 sm:$0xff]   ;;  %v8331_v35 = vld [vmem:[%s12084_s1 + $0x2a4] ss:$16 sps:$4 sm:$0x1f]  }
   0xc   :  { %386 = vmatprep.subr.bf16.mxu0 %v8301_v12  ;;  %427 = vmatprep.subr.bf16.mxu1 %v8303_v13  ;;  %v8333_v36 = vld [vmem:[%s12084_s1 + $0x2ac] ss:$16 sps:$4 sm:$0x1f]   ;;  %v8329_v39 = vld [vmem:[%s12084_s1 + $0x160] ss:$16 sps:$4 sm:$0xff]   ;;  %v9551_v41 = vsel %vm365_vm1, %v366_v31, 0  ;;  %v9562_v46 = vsub.s32 %v131_v37, %v9542_v38 }
   0xd   :  { %v8330_v40 = vld [vmem:[%s12084_s1 + $0x168] ss:$16 sps:$4 sm:$0xff]   ;;  %v8335_v42 = vld [vmem:[%s12084_s1 + $0x2a0] ss:$16 sps:$4 sm:$0x1f]   ;;  %v372_v44 = vand.u32 %v8331_v35, %v9551_v41  ;;  %v378_v45 = vand.u32 %v8333_v36, %v9551_v41  ;;  %vm360_vm2 = vcmask 334848  }
   0xe   :  { %v8336_v43 = vld [vmem:[%s12084_s1 + $0x2a8] ss:$16 sps:$4 sm:$0x1f]   ;;  %v369_v49 = vand.u32 %v8335_v42, %v9551_v41  ;;  %v8337_v51 = vld [vmem:[%s12084_s1 + $0x284] ss:$16 sps:$4 sm:$0xff]  }
   0xf   :  { %387 = vmatpush1.bf16.msra.mxu0 %v8305_v14  ;;  %428 = vmatpush1.bf16.msra.mxu1 %v8306_v15  ;;  %v6781_v47 = vld.sshfl [vmem:[%s12083_s0 + $0x2] sm:$0x11 pattern:$0x75316420]  ;;  %v375_v50 = vand.u32 %v8336_v43, %v9551_v41  ;;  %v8339_v52 = vld [vmem:[%s12084_s1 + $0x28c] ss:$16 sps:$4 sm:$0xff]  }
  0x10   :  { %388 = vmatprep.subr.bf16.mxu0 %v8307_v16  ;;  %429 = vmatprep.subr.bf16.mxu1 %v8309_v17  ;;  %v128_v48 = vcombine.high %v6781_v47, %v6781_v47  ;;  %v8341_v54 = vld [vmem:[%s12084_s1 + $0x280] ss:$16 sps:$4 sm:$0xff]   ;;  %v8342_v55 = vld [vmem:[%s12084_s1 + $0x288] ss:$16 sps:$4 sm:$0xff]   ;;  %v8343_v56 = vld [vmem:[%s12084_s1 + $0x264] ss:$16 sps:$4 sm:$0xff]   ;;  %v135_v62 = vrot.slane %v6781_v47, %v9562_v46 }
  0x11   :  { %v8345_v57 = vld [vmem:[%s12084_s1 + $0x26c] ss:$16 sps:$4 sm:$0xff]   ;;  %v8347_v58 = vld [vmem:[%s12084_s1 + $0x260] ss:$16 sps:$4 sm:$0xff]   ;;  %v8348_v59 = vld [vmem:[%s12084_s1 + $0x268] ss:$16 sps:$4 sm:$0xff]  }
  0x12   :  { %v142_v53 = vrot.slane %v128_v48, %v9562_v46  ;;  %v8351_v60 = vld [vmem:[%s12084_s1 + $0xe4] ss:$16 sps:$4 sm:$0xff]   ;;  %v8354_v61 = vld [vmem:[%s12084_s1 + $0xec] ss:$16 sps:$4 sm:$0xff]   ;;  %v8349_v63 = vld [vmem:[%s12084_s1 + $0xe0] ss:$16 sps:$4 sm:$0xff]  }
  0x13   :  { %389 = vmatpush1.bf16.msra.mxu0 %v8311_v18  ;;  %430 = vmatpush1.bf16.msra.mxu1 %v8312_v19  ;;  %v8352_v0 = vld [vmem:[%s12084_s1 + $0xe8] ss:$16 sps:$4 sm:$0xff]   ;;  %v8357_v1 = vld [vmem:[%s12084_s1 + $0xc4] ss:$16 sps:$4 sm:$0xff]   ;;  %v8360_v2 = vld [vmem:[%s12084_s1 + $0xcc] ss:$16 sps:$4 sm:$0xff]  }
  0x14   :  { %390 = vmatprep.subr.bf16.mxu0 %v8313_v20  ;;  %431 = vmatprep.subr.bf16.mxu1 %v8315_v21  ;;  %v8355_v3 = vld [vmem:[%s12084_s1 + $0xc0] ss:$16 sps:$4 sm:$0xff]   ;;  %v8358_v4 = vld [vmem:[%s12084_s1 + $0xc8] ss:$16 sps:$4 sm:$0xff]   ;;  %v8363_v5 = vld [vmem:[%s12084_s1 + $0xa4] ss:$16 sps:$4 sm:$0xff]  }
  0x15   :  { %6826 = vmatprep.mubr.msk.bf16.mxu0 %vm360_vm2, %v142_v53  ;;  %6827 = vmatprep.mubr.msk.bf16.mxu1 %vm360_vm2, %v142_v53  ;;  %v8366_v6 = vld [vmem:[%s12084_s1 + $0xac] ss:$16 sps:$4 sm:$0xff]   ;;  %v8361_v7 = vld [vmem:[%s12084_s1 + $0xa0] ss:$16 sps:$4 sm:$0xff]   ;;  %v8364_v8 = vld [vmem:[%s12084_s1 + $0xa8] ss:$16 sps:$4 sm:$0xff]  }
  0x16   :  { %v8369_v9 = vld [vmem:[%s12084_s1 + $0x84] ss:$16 sps:$4 sm:$0xff]   ;;  %v8372_v10 = vld [vmem:[%s12084_s1 + $0x8c] ss:$16 sps:$4 sm:$0xff]   ;;  %v8367_v11 = vld [vmem:[%s12084_s1 + $0x80] ss:$16 sps:$4 sm:$0xff]  }
  0x17   :  { %391 = vmatpush1.bf16.msra.mxu0 %v8317_v22  ;;  %432 = vmatpush1.bf16.msra.mxu1 %v8318_v23  ;;  %v8370_v12 = vld [vmem:[%s12084_s1 + $0x88] ss:$16 sps:$4 sm:$0xff]   ;;  %v8375_v13 = vld [vmem:[%s12084_s1 + $0x64] ss:$16 sps:$4 sm:$0xff]   ;;  %v8378_v14 = vld [vmem:[%s12084_s1 + $0x6c] ss:$16 sps:$4 sm:$0xff]  }
  0x18   :  { %392 = vmatprep.subr.bf16.mxu0 %v8319_v24  ;;  %433 = vmatprep.subr.bf16.mxu1 %v8321_v25  ;;  %v8373_v15 = vld [vmem:[%s12084_s1 + $0x60] ss:$16 sps:$4 sm:$0xff]   ;;  %v8376_v16 = vld [vmem:[%s12084_s1 + $0x68] ss:$16 sps:$4 sm:$0xff]   ;;  %v8381_v18 = vld [vmem:[%s12084_s1 + $0x44] ss:$16 sps:$4 sm:$0xff]  }
  0x19   :  { %v6828_v17 = vld.sshfl [vmem:[%s12083_s0] sm:$0x11 pattern:$0x75316420]  ;;  %v8384_v19 = vld [vmem:[%s12084_s1 + $0x4c] ss:$16 sps:$4 sm:$0xff]  }
  0x1a   :  { %v470_v20 = vcombine.high %v6828_v17, %v6828_v17  ;;  %v8379_v21 = vld [vmem:[%s12084_s1 + $0x40] ss:$16 sps:$4 sm:$0xff]   ;;  %v8382_v22 = vld [vmem:[%s12084_s1 + $0x48] ss:$16 sps:$4 sm:$0xff]   ;;  %v8387_v24 = vld [vmem:[%s12084_s1 + $0x24] ss:$16 sps:$4 sm:$0xff]   ;;  %v477_v53 = vrot.slane %v6828_v17, %v9562_v46 }
  0x1b   :  { %393 = vmatpush1.bf16.msra.mxu0 %v8323_v29  ;;  %434 = vmatpush1.bf16.msra.mxu1 %v8324_v32  ;;  %v8390_v25 = vld [vmem:[%s12084_s1 + $0x2c] ss:$16 sps:$4 sm:$0xff]   ;;  %v8385_v26 = vld [vmem:[%s12084_s1 + $0x20] ss:$16 sps:$4 sm:$0xff]   ;;  %v8388_v27 = vld [vmem:[%s12084_s1 + $0x28] ss:$16 sps:$4 sm:$0xff]  }
  0x1c   :  { %394 = vmatprep.subr.bf16.mxu0 %v8325_v33  ;;  %435 = vmatprep.subr.bf16.mxu1 %v8327_v34  ;;  %v484_v23 = vrot.slane %v470_v20, %v9562_v46  ;;  %v8393_v28 = vld [vmem:[%s12084_s1 + $0x4] ss:$16 sps:$4 sm:$0xff]   ;;  %v8396_v29 = vld [vmem:[%s12084_s1 + $0xc] ss:$16 sps:$4 sm:$0xff]   ;;  %v8391_v32 = vld [vmem:[%s12084_s1] ss:$16 sps:$4 sm:$0xff]  }
  0x1d   :  { %v8399_v30 = vld [vmem:[%s12084_s1 + $0x144] ss:$16 sps:$4 sm:$0x1f]   ;;  %v8402_v31 = vld [vmem:[%s12084_s1 + $0x14c] ss:$16 sps:$4 sm:$0x1f]  }
  0x1e   :  { %v8394_v33 = vld [vmem:[%s12084_s1 + $0x8] ss:$16 sps:$4 sm:$0xff]   ;;  %v8397_v34 = vld [vmem:[%s12084_s1 + $0x140] ss:$16 sps:$4 sm:$0x1f]   ;;  %v709_v36 = vand.u32 %v8399_v30, %v9551_v41  ;;  %v715_v37 = vand.u32 %v8402_v31, %v9551_v41 }
  0x1f   :  { %395 = vmatpush1.bf16.msra.mxu0 %v8329_v39  ;;  %436 = vmatpush1.bf16.msra.mxu1 %v8330_v40  ;;  %v8400_v35 = vld [vmem:[%s12084_s1 + $0x148] ss:$16 sps:$4 sm:$0x1f]   ;;  %v706_v39 = vand.u32 %v8397_v34, %v9551_v41  ;;  %v8405_v42 = vld [vmem:[%s12084_s1 + $0x124] ss:$16 sps:$4 sm:$0xff]  }
  0x20   :  { %406 = vmatprep.subr.bf16.mxu0 %v372_v44  ;;  %447 = vmatprep.subr.bf16.mxu1 %v378_v45  ;;  %v712_v40 = vand.u32 %v8400_v35, %v9551_v41  ;;  %v8408_v43 = vld [vmem:[%s12084_s1 + $0x12c] ss:$16 sps:$4 sm:$0xff]   ;;  %v8403_v44 = vld [vmem:[%s12084_s1 + $0x120] ss:$16 sps:$4 sm:$0xff]   ;;  %v8406_v45 = vld [vmem:[%s12084_s1 + $0x128] ss:$16 sps:$4 sm:$0xff]  }
  0x21   :  { %v8411_v47 = vld [vmem:[%s12084_s1 + $0x104] ss:$16 sps:$4 sm:$0xff]   ;;  %v8414_v48 = vld [vmem:[%s12084_s1 + $0x10c] ss:$16 sps:$4 sm:$0xff]   ;;  %v8451_v17 = vld [vmem:[%s12084_s1 + $0x2e0] ss:$16 sps:$4 sm:$0xff]  }
  0x22   :  { %v8462_v20 = vld [vmem:[%s12084_s1 + $0x2cc] ss:$16 sps:$4 sm:$0xff]   ;;  %v8471_v31 = vld [vmem:[%s12084_s1 + $0x3e4] ss:$16 sps:$4 sm:$0xff]   ;;  %v8472_v34 = vld [vmem:[%s12084_s1 + $0x3e8] ss:$16 sps:$4 sm:$0xff]  }
  0x23   :  { %407 = vmatpush2.bf16.msra.mxu0 %v369_v49  ;;  %448 = vmatpush2.bf16.msra.mxu1 %v375_v50  ;;  %v8409_v49 = vld [vmem:[%s12084_s1 + $0x100] ss:$16 sps:$4 sm:$0xff]   ;;  %v8412_v50 = vld [vmem:[%s12084_s1 + $0x108] ss:$16 sps:$4 sm:$0xff]   ;;  %v8477_v35 = vld [vmem:[%s12084_s1 + $0x3c4] ss:$16 sps:$4 sm:$0xff]  }
  0x24   :  { %408 = vmatprep.subr.bf16.mxu0 %v8337_v51  ;;  %449 = vmatprep.subr.bf16.mxu1 %v8339_v52  ;;  %v8417_v51 = vld [vmem:[%s12084_s1 + $0x3a4] ss:$16 sps:$4 sm:$0xff]   ;;  %v8420_v52 = vld [vmem:[%s12084_s1 + $0x3ac] ss:$16 sps:$4 sm:$0xff]  }
  0x27   :  { %409 = vmatpush2.bf16.msra.mxu0 %v8341_v54  ;;  %450 = vmatpush2.bf16.msra.mxu1 %v8342_v55  ;;  %v8415_v54 = vld [vmem:[%s12084_s1 + $0x3a0] ss:$16 sps:$4 sm:$0xff]   ;;  %v8418_v55 = vld [vmem:[%s12084_s1 + $0x3a8] ss:$16 sps:$4 sm:$0xff]  }
  0x28   :  { %410 = vmatprep.subr.bf16.mxu0 %v8343_v56  ;;  %451 = vmatprep.subr.bf16.mxu1 %v8345_v57  ;;  %v8423_v56 = vld [vmem:[%s12084_s1 + $0x384] ss:$16 sps:$4 sm:$0xff]   ;;  %v8426_v57 = vld [vmem:[%s12084_s1 + $0x38c] ss:$16 sps:$4 sm:$0xff]  }
  0x2b   :  { %411 = vmatpush2.bf16.msra.mxu0 %v8347_v58  ;;  %452 = vmatpush2.bf16.msra.mxu1 %v8348_v59  ;;  %v9761_v58 = vld.sshfl [vmem:[%s12083_s0 + $0x4] sm:$0x11 pattern:$0x75316420] }
  0x2c   :  { %717 = vmatprep.subr.bf16.mxu0 %v8351_v60  ;;  %758 = vmatprep.subr.bf16.mxu1 %v8354_v61  ;;  %v854_v59 = vcombine.high %v9761_v58, %v9761_v58  ;;  %v8421_v60 = vld [vmem:[%s12084_s1 + $0x380] ss:$16 sps:$4 sm:$0xff]   ;;  %v8424_v61 = vld [vmem:[%s12084_s1 + $0x388] ss:$16 sps:$4 sm:$0xff]  }
  0x2e   :  { %413 = vmatmul.mubr.bf16.vlgmr.msra.gmra.mxu0 %v135_v62  ;;  %454 = vmatmul.mubr.bf16.vlgmr.msra.gmra.mxu1 %v135_v62  ;;  %v8429_v62 = vld [vmem:[%s12084_s1 + $0x364] ss:$16 sps:$4 sm:$0xff]  }
  0x2f   :  { %718 = vmatpush1.bf16.msra.mxu0 %v8349_v63  ;;  %759 = vmatpush1.bf16.msra.mxu1 %v8352_v0  ;;  %v8432_v63 = vld [vmem:[%s12084_s1 + $0x36c] ss:$16 sps:$4 sm:$0xff]   ;;  %v868_v0 = vrot.slane %v854_v59, %v9562_v46 }
  0x30   :  { %719 = vmatprep.subr.bf16.mxu0 %v8357_v1  ;;  %760 = vmatprep.subr.bf16.mxu1 %v8360_v2  ;;  %v8427_v1 = vld [vmem:[%s12084_s1 + $0x360] ss:$16 sps:$4 sm:$0xff]   ;;  %v8430_v2 = vld [vmem:[%s12084_s1 + $0x368] ss:$16 sps:$4 sm:$0xff]   ;;  %v8504_v59 = vld [vmem:[%s12084_s1 + $0x4ac] ss:$16 sps:$4 sm:$0xff]  }
  0x31   :  { %6873 = vmatprep.mubr.msk.bf16.mxu0 %vm360_vm2, %v484_v23  ;;  %6874 = vmatprep.mubr.msk.bf16.mxu1 %vm360_vm2, %v484_v23  ;;  %v8457_v23 = vld [vmem:[%s12084_s1 + $0x2c0] ss:$16 sps:$4 sm:$0xff]  }
  0x33   :  { %720 = vmatpush1.bf16.msra.mxu0 %v8355_v3  ;;  %761 = vmatpush1.bf16.msra.mxu1 %v8358_v4  ;;  %v8435_v3 = vld [vmem:[%s12084_s1 + $0x344] ss:$16 sps:$4 sm:$0xff]   ;;  %v8438_v4 = vld [vmem:[%s12084_s1 + $0x34c] ss:$16 sps:$4 sm:$0xff]  }
  0x34   :  { %721 = vmatprep.subr.bf16.mxu0 %v8363_v5  ;;  %762 = vmatprep.subr.bf16.mxu1 %v8366_v6  ;;  %v8433_v5 = vld [vmem:[%s12084_s1 + $0x340] ss:$16 sps:$4 sm:$0xff]   ;;  %v8436_v6 = vld [vmem:[%s12084_s1 + $0x348] ss:$16 sps:$4 sm:$0xff]  }
  0x37   :  { %722 = vmatpush1.bf16.msra.mxu0 %v8361_v7  ;;  %763 = vmatpush1.bf16.msra.mxu1 %v8364_v8  ;;  %v8441_v7 = vld [vmem:[%s12084_s1 + $0x324] ss:$16 sps:$4 sm:$0xff]   ;;  %v8444_v8 = vld [vmem:[%s12084_s1 + $0x32c] ss:$16 sps:$4 sm:$0xff]  }
  0x38   :  { %723 = vmatprep.subr.bf16.mxu0 %v8369_v9  ;;  %764 = vmatprep.subr.bf16.mxu1 %v8372_v10  ;;  %v8439_v9 = vld [vmem:[%s12084_s1 + $0x320] ss:$16 sps:$4 sm:$0xff]   ;;  %v8442_v10 = vld [vmem:[%s12084_s1 + $0x328] ss:$16 sps:$4 sm:$0xff]  }
  0x3b   :  { %724 = vmatpush1.bf16.msra.mxu0 %v8367_v11  ;;  %765 = vmatpush1.bf16.msra.mxu1 %v8370_v12  ;;  %v8447_v11 = vld [vmem:[%s12084_s1 + $0x304] ss:$16 sps:$4 sm:$0xff]   ;;  %v8450_v12 = vld [vmem:[%s12084_s1 + $0x30c] ss:$16 sps:$4 sm:$0xff]  }
  0x3c   :  { %725 = vmatprep.subr.bf16.mxu0 %v8375_v13  ;;  %766 = vmatprep.subr.bf16.mxu1 %v8378_v14  ;;  %v8445_v13 = vld [vmem:[%s12084_s1 + $0x300] ss:$16 sps:$4 sm:$0xff]   ;;  %v8448_v14 = vld [vmem:[%s12084_s1 + $0x308] ss:$16 sps:$4 sm:$0xff]  }
  0x3f   :  { %726 = vmatpush1.bf16.msra.mxu0 %v8373_v15  ;;  %767 = vmatpush1.bf16.msra.mxu1 %v8376_v16  ;;  %v8453_v15 = vld [vmem:[%s12084_s1 + $0x2e4] ss:$16 sps:$4 sm:$0xff]   ;;  %v8456_v16 = vld [vmem:[%s12084_s1 + $0x2ec] ss:$16 sps:$4 sm:$0xff]  }
  0x40   :  { %727 = vmatprep.subr.bf16.mxu0 %v8381_v18  ;;  %768 = vmatprep.subr.bf16.mxu1 %v8384_v19  ;;  %v8454_v18 = vld [vmem:[%s12084_s1 + $0x2e8] ss:$16 sps:$4 sm:$0xff]   ;;  %v8459_v19 = vld [vmem:[%s12084_s1 + $0x2c4] ss:$16 sps:$4 sm:$0xff]  }
  0x43   :  { %728 = vmatpush1.bf16.msra.mxu0 %v8379_v21  ;;  %769 = vmatpush1.bf16.msra.mxu1 %v8382_v22  ;;  %v8465_v21 = vld [vmem:[%s12084_s1 + $0x404] ss:$16 sps:$4 sm:$0x1f]   ;;  %v8468_v22 = vld [vmem:[%s12084_s1 + $0x40c] ss:$16 sps:$4 sm:$0x1f]  }
  0x44   :  { %729 = vmatprep.subr.bf16.mxu0 %v8387_v24  ;;  %770 = vmatprep.subr.bf16.mxu1 %v8390_v25  ;;  %v8463_v24 = vld [vmem:[%s12084_s1 + $0x400] ss:$16 sps:$4 sm:$0x1f]   ;;  %v8460_v25 = vld [vmem:[%s12084_s1 + $0x2c8] ss:$16 sps:$4 sm:$0xff]  }
  0x47   :  { %730 = vmatpush1.bf16.msra.mxu0 %v8385_v26  ;;  %771 = vmatpush1.bf16.msra.mxu1 %v8388_v27  ;;  %v8466_v26 = vld [vmem:[%s12084_s1 + $0x408] ss:$16 sps:$4 sm:$0x1f]   ;;  %v1093_v27 = vand.u32 %v8465_v21, %v9551_v41 }
  0x48   :  { %731 = vmatprep.subr.bf16.mxu0 %v8393_v28  ;;  %772 = vmatprep.subr.bf16.mxu1 %v8396_v29  ;;  %v1099_v28 = vand.u32 %v8468_v22, %v9551_v41  ;;  %v1090_v29 = vand.u32 %v8463_v24, %v9551_v41  ;;  %v1096_v30 = vand.u32 %v8466_v26, %v9551_v41  ;;  %v8537_v22 = vld [vmem:[%s12084_s1 + $0x544] ss:$16 sps:$4 sm:$0xff]   ;;  %v8535_v24 = vld [vmem:[%s12084_s1 + $0x540] ss:$16 sps:$4 sm:$0xff]  }
  0x49   :  { %v8543_v26 = vld [vmem:[%s12084_s1 + $0x524] ss:$16 sps:$4 sm:$0xff]  }
  0x4b   :  { %732 = vmatpush1.bf16.msra.mxu0 %v8391_v32  ;;  %773 = vmatpush1.bf16.msra.mxu1 %v8394_v33  ;;  %v8474_v32 = vld [vmem:[%s12084_s1 + $0x3ec] ss:$16 sps:$4 sm:$0xff]   ;;  %v8469_v33 = vld [vmem:[%s12084_s1 + $0x3e0] ss:$16 sps:$4 sm:$0xff]  }
  0x4c   :  { %743 = vmatprep.subr.bf16.mxu0 %v709_v36  ;;  %784 = vmatprep.subr.bf16.mxu1 %v715_v37  ;;  %v8480_v36 = vld [vmem:[%s12084_s1 + $0x3cc] ss:$16 sps:$4 sm:$0xff]   ;;  %v8475_v37 = vld [vmem:[%s12084_s1 + $0x3c0] ss:$16 sps:$4 sm:$0xff]  }
  0x4f   :  { %744 = vmatpush2.bf16.msra.mxu0 %v706_v39  ;;  %785 = vmatpush2.bf16.msra.mxu1 %v712_v40  ;;  %v8478_v39 = vld [vmem:[%s12084_s1 + $0x3c8] ss:$16 sps:$4 sm:$0xff]   ;;  %v9889_v40 = vld.sshfl [vmem:[%s12083_s0 + $0x6] sm:$0x11 pattern:$0x75316420] }
  0x50   :  { %745 = vmatprep.subr.bf16.mxu0 %v8405_v42  ;;  %786 = vmatprep.subr.bf16.mxu1 %v8408_v43  ;;  %v8483_v42 = vld [vmem:[%s12084_s1 + $0x504] ss:$16 sps:$4 sm:$0xff]   ;;  %v8486_v43 = vld [vmem:[%s12084_s1 + $0x50c] ss:$16 sps:$4 sm:$0xff]  }
  0x53   :  { %746 = vmatpush2.bf16.msra.mxu0 %v8403_v44  ;;  %787 = vmatpush2.bf16.msra.mxu1 %v8406_v45  ;;  %v1242_v44 = vcombine.high %v9889_v40, %v9889_v40  ;;  %v861_v45 = vrot.slane %v9761_v58, %v9562_v46  ;;  %v8501_v58 = vld [vmem:[%s12084_s1 + $0x4a4] ss:$16 sps:$4 sm:$0xff]  }
  0x54   :  { %747 = vmatprep.subr.bf16.mxu0 %v8411_v47  ;;  %788 = vmatprep.subr.bf16.mxu1 %v8414_v48  ;;  %v8481_v47 = vld [vmem:[%s12084_s1 + $0x500] ss:$16 sps:$4 sm:$0xff]   ;;  %v8484_v48 = vld [vmem:[%s12084_s1 + $0x508] ss:$16 sps:$4 sm:$0xff]  }
  0x57   :  { %748 = vmatpush2.bf16.msra.mxu0 %v8409_v49  ;;  %789 = vmatpush2.bf16.msra.mxu1 %v8412_v50  ;;  %v8489_v49 = vld [vmem:[%s12084_s1 + $0x4e4] ss:$16 sps:$4 sm:$0xff]   ;;  %v8492_v50 = vld [vmem:[%s12084_s1 + $0x4ec] ss:$16 sps:$4 sm:$0xff]  }
  0x58   :  { %1101 = vmatprep.subr.bf16.mxu0 %v8417_v51  ;;  %1142 = vmatprep.subr.bf16.mxu1 %v8420_v52  ;;  %v1256_v51 = vrot.slane %v1242_v44, %v9562_v46  ;;  %v8487_v52 = vld [vmem:[%s12084_s1 + $0x4e0] ss:$16 sps:$4 sm:$0xff]   ;;  %v8561_v44 = vld [vmem:[%s12084_s1 + $0x624] ss:$16 sps:$4 sm:$0xff]  }
  0x5a   :  { %750 = vmatmul.mubr.bf16.vlgmr.msra.gmra.mxu0 %v477_v53  ;;  %791 = vmatmul.mubr.bf16.vlgmr.msra.gmra.mxu1 %v477_v53  ;;  %v8490_v53 = vld [vmem:[%s12084_s1 + $0x4e8] ss:$16 sps:$4 sm:$0xff]  }
  0x5b   :  { %1102 = vmatpush1.bf16.msra.mxu0 %v8415_v54  ;;  %1143 = vmatpush1.bf16.msra.mxu1 %v8418_v55  ;;  %v8495_v54 = vld [vmem:[%s12084_s1 + $0x4c4] ss:$16 sps:$4 sm:$0xff]   ;;  %v8498_v55 = vld [vmem:[%s12084_s1 + $0x4cc] ss:$16 sps:$4 sm:$0xff]  }
  0x5c   :  { %1103 = vmatprep.subr.bf16.mxu0 %v8423_v56  ;;  %1144 = vmatprep.subr.bf16.mxu1 %v8426_v57  ;;  %v8493_v56 = vld [vmem:[%s12084_s1 + $0x4c0] ss:$16 sps:$4 sm:$0xff]   ;;  %v8496_v57 = vld [vmem:[%s12084_s1 + $0x4c8] ss:$16 sps:$4 sm:$0xff]  }
  0x5d   :  { %6965 = vmatprep.mubr.msk.bf16.mxu0 %vm360_vm2, %v868_v0  ;;  %6966 = vmatprep.mubr.msk.bf16.mxu1 %vm360_vm2, %v868_v0  ;;  %v8505_v0 = vld [vmem:[%s12084_s1 + $0x480] ss:$16 sps:$4 sm:$0xff]  }
  0x5f   :  { %1104 = vmatpush1.bf16.msra.mxu0 %v8421_v60  ;;  %1145 = vmatpush1.bf16.msra.mxu1 %v8424_v61  ;;  %v8499_v60 = vld [vmem:[%s12084_s1 + $0x4a0] ss:$16 sps:$4 sm:$0xff]   ;;  %v8502_v61 = vld [vmem:[%s12084_s1 + $0x4a8] ss:$16 sps:$4 sm:$0xff]  }
  0x60   :  { %1105 = vmatprep.subr.bf16.mxu0 %v8429_v62  ;;  %1146 = vmatprep.subr.bf16.mxu1 %v8432_v63  ;;  %v8507_v62 = vld [vmem:[%s12084_s1 + $0x484] ss:$16 sps:$4 sm:$0xff]   ;;  %v8510_v63 = vld [vmem:[%s12084_s1 + $0x48c] ss:$16 sps:$4 sm:$0xff]  }
  0x63   :  { %1106 = vmatpush1.bf16.msra.mxu0 %v8427_v1  ;;  %1147 = vmatpush1.bf16.msra.mxu1 %v8430_v2  ;;  %v8508_v1 = vld [vmem:[%s12084_s1 + $0x488] ss:$16 sps:$4 sm:$0xff]   ;;  %v8513_v2 = vld [vmem:[%s12084_s1 + $0x464] ss:$16 sps:$4 sm:$0xff]  }
  0x64   :  { %1107 = vmatprep.subr.bf16.mxu0 %v8435_v3  ;;  %1148 = vmatprep.subr.bf16.mxu1 %v8438_v4  ;;  %v8516_v3 = vld [vmem:[%s12084_s1 + $0x46c] ss:$16 sps:$4 sm:$0xff]   ;;  %v8511_v4 = vld [vmem:[%s12084_s1 + $0x460] ss:$16 sps:$4 sm:$0xff]  }
  0x67   :  { %1108 = vmatpush1.bf16.msra.mxu0 %v8433_v5  ;;  %1149 = vmatpush1.bf16.msra.mxu1 %v8436_v6  ;;  %v8514_v5 = vld [vmem:[%s12084_s1 + $0x468] ss:$16 sps:$4 sm:$0xff]   ;;  %v8519_v6 = vld [vmem:[%s12084_s1 + $0x444] ss:$16 sps:$4 sm:$0xff]  }
  0x68   :  { %1109 = vmatprep.subr.bf16.mxu0 %v8441_v7  ;;  %1150 = vmatprep.subr.bf16.mxu1 %v8444_v8  ;;  %v8522_v7 = vld [vmem:[%s12084_s1 + $0x44c] ss:$16 sps:$4 sm:$0xff]   ;;  %v8517_v8 = vld [vmem:[%s12084_s1 + $0x440] ss:$16 sps:$4 sm:$0xff]  }
  0x6b   :  { %1110 = vmatpush1.bf16.msra.mxu0 %v8439_v9  ;;  %1151 = vmatpush1.bf16.msra.mxu1 %v8442_v10  ;;  %v8520_v9 = vld [vmem:[%s12084_s1 + $0x448] ss:$16 sps:$4 sm:$0xff]   ;;  %v8525_v10 = vld [vmem:[%s12084_s1 + $0x424] ss:$16 sps:$4 sm:$0xff]  }
  0x6c   :  { %1111 = vmatprep.subr.bf16.mxu0 %v8447_v11  ;;  %1152 = vmatprep.subr.bf16.mxu1 %v8450_v12  ;;  %v8531_v11 = vld [vmem:[%s12084_s1 + $0x564] ss:$16 sps:$4 sm:$0x1f]   ;;  %v8528_v12 = vld [vmem:[%s12084_s1 + $0x42c] ss:$16 sps:$4 sm:$0xff]  }
  0x6f   :  { %1112 = vmatpush1.bf16.msra.mxu0 %v8445_v13  ;;  %1153 = vmatpush1.bf16.msra.mxu1 %v8448_v14  ;;  %v8534_v13 = vld [vmem:[%s12084_s1 + $0x56c] ss:$16 sps:$4 sm:$0x1f]   ;;  %v8523_v14 = vld [vmem:[%s12084_s1 + $0x420] ss:$16 sps:$4 sm:$0xff]  }
  0x70   :  { %1113 = vmatprep.subr.bf16.mxu0 %v8453_v15  ;;  %1154 = vmatprep.subr.bf16.mxu1 %v8456_v16  ;;  %v8529_v15 = vld [vmem:[%s12084_s1 + $0x560] ss:$16 sps:$4 sm:$0x1f]   ;;  %v8526_v16 = vld [vmem:[%s12084_s1 + $0x428] ss:$16 sps:$4 sm:$0xff]  }
  0x73   :  { %1114 = vmatpush1.bf16.msra.mxu0 %v8451_v17  ;;  %1155 = vmatpush1.bf16.msra.mxu1 %v8454_v18  ;;  %v8532_v17 = vld [vmem:[%s12084_s1 + $0x568] ss:$16 sps:$4 sm:$0x1f]   ;;  %v1481_v18 = vand.u32 %v8531_v11, %v9551_v41 }
  0x74   :  { %1115 = vmatprep.subr.bf16.mxu0 %v8459_v19  ;;  %1156 = vmatprep.subr.bf16.mxu1 %v8462_v20  ;;  %v1487_v19 = vand.u32 %v8534_v13, %v9551_v41  ;;  %v1478_v20 = vand.u32 %v8529_v15, %v9551_v41  ;;  %v1484_v21 = vand.u32 %v8532_v17, %v9551_v41  ;;  %v8603_v13 = vld [vmem:[%s12084_s1 + $0x6a4] ss:$16 sps:$4 sm:$0xff]   ;;  %v8601_v15 = vld [vmem:[%s12084_s1 + $0x6a0] ss:$16 sps:$4 sm:$0xff]  }
  0x75   :  { %v8609_v17 = vld [vmem:[%s12084_s1 + $0x684] ss:$16 sps:$4 sm:$0xff]  }
  0x77   :  { %1116 = vmatpush1.bf16.msra.mxu0 %v8457_v23  ;;  %1157 = vmatpush1.bf16.msra.mxu1 %v8460_v25  ;;  %v8540_v23 = vld [vmem:[%s12084_s1 + $0x54c] ss:$16 sps:$4 sm:$0xff]   ;;  %v8538_v25 = vld [vmem:[%s12084_s1 + $0x548] ss:$16 sps:$4 sm:$0xff]  }
  0x78   :  { %1127 = vmatprep.subr.bf16.mxu0 %v1093_v27  ;;  %1168 = vmatprep.subr.bf16.mxu1 %v1099_v28  ;;  %v8546_v27 = vld [vmem:[%s12084_s1 + $0x52c] ss:$16 sps:$4 sm:$0xff]   ;;  %v10031_v28 = vld.sshfl [vmem:[%s12083_s0 + $0x8] sm:$0x11 pattern:$0x75316420] }
  0x7b   :  { %1128 = vmatpush2.bf16.msra.mxu0 %v1090_v29  ;;  %1169 = vmatpush2.bf16.msra.mxu1 %v1096_v30  ;;  %v8541_v29 = vld [vmem:[%s12084_s1 + $0x520] ss:$16 sps:$4 sm:$0xff]   ;;  %v8544_v30 = vld [vmem:[%s12084_s1 + $0x528] ss:$16 sps:$4 sm:$0xff]  }
  0x7c   :  { %1129 = vmatprep.subr.bf16.mxu0 %v8471_v31  ;;  %1170 = vmatprep.subr.bf16.mxu1 %v8474_v32  ;;  %v8549_v31 = vld [vmem:[%s12084_s1 + $0x664] ss:$16 sps:$4 sm:$0xff]   ;;  %v8552_v32 = vld [vmem:[%s12084_s1 + $0x66c] ss:$16 sps:$4 sm:$0xff]  }
  0x7f   :  { %1130 = vmatpush2.bf16.msra.mxu0 %v8469_v33  ;;  %1171 = vmatpush2.bf16.msra.mxu1 %v8472_v34  ;;  %v1630_v33 = vcombine.high %v10031_v28, %v10031_v28  ;;  %v1249_v34 = vrot.slane %v9889_v40, %v9562_v46 }
  0x80   :  { %1131 = vmatprep.subr.bf16.mxu0 %v8477_v35  ;;  %1172 = vmatprep.subr.bf16.mxu1 %v8480_v36  ;;  %v8547_v35 = vld [vmem:[%s12084_s1 + $0x660] ss:$16 sps:$4 sm:$0xff]   ;;  %v8550_v36 = vld [vmem:[%s12084_s1 + $0x668] ss:$16 sps:$4 sm:$0xff]  }
  0x81   :  { %v1644_v40 = vrot.slane %v1630_v33, %v9562_v46  ;;  %v8627_v33 = vld [vmem:[%s12084_s1 + $0x784] ss:$16 sps:$4 sm:$0xff]  }
  0x83   :  { %1132 = vmatpush2.bf16.msra.mxu0 %v8475_v37  ;;  %1173 = vmatpush2.bf16.msra.mxu1 %v8478_v39  ;;  %v8555_v37 = vld [vmem:[%s12084_s1 + $0x644] ss:$16 sps:$4 sm:$0xff]   ;;  %v8558_v39 = vld [vmem:[%s12084_s1 + $0x64c] ss:$16 sps:$4 sm:$0xff]  }
  0x84   :  { %1489 = vmatprep.subr.bf16.mxu0 %v8483_v42  ;;  %1530 = vmatprep.subr.bf16.mxu1 %v8486_v43  ;;  %v8553_v42 = vld [vmem:[%s12084_s1 + $0x640] ss:$16 sps:$4 sm:$0xff]   ;;  %v8556_v43 = vld [vmem:[%s12084_s1 + $0x648] ss:$16 sps:$4 sm:$0xff]  }
  0x86   :  { %1134 = vmatmul.mubr.bf16.vlgmr.msra.gmra.mxu0 %v861_v45  ;;  %1175 = vmatmul.mubr.bf16.vlgmr.msra.gmra.mxu1 %v861_v45  ;;  %v8564_v45 = vld [vmem:[%s12084_s1 + $0x62c] ss:$16 sps:$4 sm:$0xff]  }
  0x87   :  { %1490 = vmatpush1.bf16.msra.mxu0 %v8481_v47  ;;  %1531 = vmatpush1.bf16.msra.mxu1 %v8484_v48  ;;  %v8559_v47 = vld [vmem:[%s12084_s1 + $0x620] ss:$16 sps:$4 sm:$0xff]   ;;  %v8562_v48 = vld [vmem:[%s12084_s1 + $0x628] ss:$16 sps:$4 sm:$0xff]  }
  0x88   :  { %1491 = vmatprep.subr.bf16.mxu0 %v8489_v49  ;;  %1532 = vmatprep.subr.bf16.mxu1 %v8492_v50  ;;  %v8567_v49 = vld [vmem:[%s12084_s1 + $0x604] ss:$16 sps:$4 sm:$0xff]   ;;  %v8570_v50 = vld [vmem:[%s12084_s1 + $0x60c] ss:$16 sps:$4 sm:$0xff]  }
  0x89   :  { %7057 = vmatprep.mubr.msk.bf16.mxu0 %vm360_vm2, %v1256_v51  ;;  %7058 = vmatprep.mubr.msk.bf16.mxu1 %vm360_vm2, %v1256_v51  ;;  %v8565_v51 = vld [vmem:[%s12084_s1 + $0x600] ss:$16 sps:$4 sm:$0xff]  }
  0x8b   :  { %1492 = vmatpush1.bf16.msra.mxu0 %v8487_v52  ;;  %1533 = vmatpush1.bf16.msra.mxu1 %v8490_v53  ;;  %v8568_v52 = vld [vmem:[%s12084_s1 + $0x608] ss:$16 sps:$4 sm:$0xff]   ;;  %v8573_v53 = vld [vmem:[%s12084_s1 + $0x5e4] ss:$16 sps:$4 sm:$0xff]  }
  0x8c   :  { %1493 = vmatprep.subr.bf16.mxu0 %v8495_v54  ;;  %1534 = vmatprep.subr.bf16.mxu1 %v8498_v55  ;;  %v8576_v54 = vld [vmem:[%s12084_s1 + $0x5ec] ss:$16 sps:$4 sm:$0xff]   ;;  %v8571_v55 = vld [vmem:[%s12084_s1 + $0x5e0] ss:$16 sps:$4 sm:$0xff]  }
  0x8f   :  { %1494 = vmatpush1.bf16.msra.mxu0 %v8493_v56  ;;  %1535 = vmatpush1.bf16.msra.mxu1 %v8496_v57  ;;  %v8574_v56 = vld [vmem:[%s12084_s1 + $0x5e8] ss:$16 sps:$4 sm:$0xff]   ;;  %v8579_v57 = vld [vmem:[%s12084_s1 + $0x5c4] ss:$16 sps:$4 sm:$0xff]  }
  0x90   :  { %1495 = vmatprep.subr.bf16.mxu0 %v8501_v58  ;;  %1536 = vmatprep.subr.bf16.mxu1 %v8504_v59  ;;  %v8582_v58 = vld [vmem:[%s12084_s1 + $0x5cc] ss:$16 sps:$4 sm:$0xff]   ;;  %v8577_v59 = vld [vmem:[%s12084_s1 + $0x5c0] ss:$16 sps:$4 sm:$0xff]  }
  0x93   :  { %1496 = vmatpush1.bf16.msra.mxu0 %v8499_v60  ;;  %1537 = vmatpush1.bf16.msra.mxu1 %v8502_v61  ;;  %v8580_v60 = vld [vmem:[%s12084_s1 + $0x5c8] ss:$16 sps:$4 sm:$0xff]   ;;  %v8585_v61 = vld [vmem:[%s12084_s1 + $0x5a4] ss:$16 sps:$4 sm:$0xff]  }
  0x94   :  { %1497 = vmatprep.subr.bf16.mxu0 %v8507_v62  ;;  %1538 = vmatprep.subr.bf16.mxu1 %v8510_v63  ;;  %v8588_v62 = vld [vmem:[%s12084_s1 + $0x5ac] ss:$16 sps:$4 sm:$0xff]   ;;  %v8583_v63 = vld [vmem:[%s12084_s1 + $0x5a0] ss:$16 sps:$4 sm:$0xff]  }
  0x97   :  { %1498 = vmatpush1.bf16.msra.mxu0 %v8505_v0  ;;  %1539 = vmatpush1.bf16.msra.mxu1 %v8508_v1  ;;  %v8586_v0 = vld [vmem:[%s12084_s1 + $0x5a8] ss:$16 sps:$4 sm:$0xff]   ;;  %v8591_v1 = vld [vmem:[%s12084_s1 + $0x584] ss:$16 sps:$4 sm:$0xff]  }
  0x98   :  { %1499 = vmatprep.subr.bf16.mxu0 %v8513_v2  ;;  %1540 = vmatprep.subr.bf16.mxu1 %v8516_v3  ;;  %v8594_v2 = vld [vmem:[%s12084_s1 + $0x58c] ss:$16 sps:$4 sm:$0xff]   ;;  %v8597_v3 = vld [vmem:[%s12084_s1 + $0x6c4] ss:$16 sps:$4 sm:$0x1f]  }
  0x9b   :  { %1500 = vmatpush1.bf16.msra.mxu0 %v8511_v4  ;;  %1541 = vmatpush1.bf16.msra.mxu1 %v8514_v5  ;;  %v8600_v4 = vld [vmem:[%s12084_s1 + $0x6cc] ss:$16 sps:$4 sm:$0x1f]   ;;  %v8589_v5 = vld [vmem:[%s12084_s1 + $0x580] ss:$16 sps:$4 sm:$0xff]  }
  0x9c   :  { %1501 = vmatprep.subr.bf16.mxu0 %v8519_v6  ;;  %1542 = vmatprep.subr.bf16.mxu1 %v8522_v7  ;;  %v8592_v6 = vld [vmem:[%s12084_s1 + $0x588] ss:$16 sps:$4 sm:$0xff]   ;;  %v8595_v7 = vld [vmem:[%s12084_s1 + $0x6c0] ss:$16 sps:$4 sm:$0x1f]  }
  0x9d   :  { %v1866_v11 = vand.u32 %v8595_v7, %v9551_v41  ;;  %v8664_v7 = vld [vmem:[%s12084_s1 + $0x828] ss:$16 sps:$4 sm:$0x1f]  }
  0x9f   :  { %1502 = vmatpush1.bf16.msra.mxu0 %v8517_v8  ;;  %1543 = vmatpush1.bf16.msra.mxu1 %v8520_v9  ;;  %v8598_v8 = vld [vmem:[%s12084_s1 + $0x6c8] ss:$16 sps:$4 sm:$0x1f]   ;;  %v1869_v9 = vand.u32 %v8597_v3, %v9551_v41  ;;  %v8666_v3 = vld [vmem:[%s12084_s1 + $0x82c] ss:$16 sps:$4 sm:$0x1f]  }
  0xa0   :  { %1503 = vmatprep.subr.bf16.mxu0 %v8525_v10  ;;  %1544 = vmatprep.subr.bf16.mxu1 %v8528_v12  ;;  %v1875_v10 = vand.u32 %v8600_v4, %v9551_v41  ;;  %v1872_v12 = vand.u32 %v8598_v8, %v9551_v41  ;;  %v8655_v4 = vld [vmem:[%s12084_s1 + $0x6e0] ss:$16 sps:$4 sm:$0xff]  }
  0xa3   :  { %1504 = vmatpush1.bf16.msra.mxu0 %v8523_v14  ;;  %1545 = vmatpush1.bf16.msra.mxu1 %v8526_v16  ;;  %v8606_v14 = vld [vmem:[%s12084_s1 + $0x6ac] ss:$16 sps:$4 sm:$0xff]   ;;  %v8604_v16 = vld [vmem:[%s12084_s1 + $0x6a8] ss:$16 sps:$4 sm:$0xff]  }
  0xa4   :  { %1515 = vmatprep.subr.bf16.mxu0 %v1481_v18  ;;  %1556 = vmatprep.subr.bf16.mxu1 %v1487_v19  ;;  %v8612_v18 = vld [vmem:[%s12084_s1 + $0x68c] ss:$16 sps:$4 sm:$0xff]   ;;  %v10179_v19 = vld.sshfl [vmem:[%s12083_s0 + $0xa] sm:$0x11 pattern:$0x75316420] }
  0xa7   :  { %1516 = vmatpush2.bf16.msra.mxu0 %v1478_v20  ;;  %1557 = vmatpush2.bf16.msra.mxu1 %v1484_v21  ;;  %v8607_v20 = vld [vmem:[%s12084_s1 + $0x680] ss:$16 sps:$4 sm:$0xff]   ;;  %v8610_v21 = vld [vmem:[%s12084_s1 + $0x688] ss:$16 sps:$4 sm:$0xff]  }
  0xa8   :  { %1517 = vmatprep.subr.bf16.mxu0 %v8537_v22  ;;  %1558 = vmatprep.subr.bf16.mxu1 %v8540_v23  ;;  %v8615_v22 = vld [vmem:[%s12084_s1 + $0x7c4] ss:$16 sps:$4 sm:$0xff]   ;;  %v8618_v23 = vld [vmem:[%s12084_s1 + $0x7cc] ss:$16 sps:$4 sm:$0xff]  }
  0xab   :  { %1518 = vmatpush2.bf16.msra.mxu0 %v8535_v24  ;;  %1559 = vmatpush2.bf16.msra.mxu1 %v8538_v25  ;;  %v2018_v24 = vcombine.high %v10179_v19, %v10179_v19  ;;  %v1637_v25 = vrot.slane %v10031_v28, %v9562_v46  ;;  %v8624_v28 = vld [vmem:[%s12084_s1 + $0x7ac] ss:$16 sps:$4 sm:$0xff]  }
  0xac   :  { %1519 = vmatprep.subr.bf16.mxu0 %v8543_v26  ;;  %1560 = vmatprep.subr.bf16.mxu1 %v8546_v27  ;;  %v8613_v26 = vld [vmem:[%s12084_s1 + $0x7c0] ss:$16 sps:$4 sm:$0xff]   ;;  %v8616_v27 = vld [vmem:[%s12084_s1 + $0x7c8] ss:$16 sps:$4 sm:$0xff]  }
  0xaf   :  { %1520 = vmatpush2.bf16.msra.mxu0 %v8541_v29  ;;  %1561 = vmatpush2.bf16.msra.mxu1 %v8544_v30  ;;  %v8621_v29 = vld [vmem:[%s12084_s1 + $0x7a4] ss:$16 sps:$4 sm:$0xff]   ;;  %v2032_v30 = vrot.slane %v2018_v24, %v9562_v46 }
  0xb0   :  { %1877 = vmatprep.subr.bf16.mxu0 %v8549_v31  ;;  %1918 = vmatprep.subr.bf16.mxu1 %v8552_v32  ;;  %v8619_v31 = vld [vmem:[%s12084_s1 + $0x7a0] ss:$16 sps:$4 sm:$0xff]   ;;  %v8622_v32 = vld [vmem:[%s12084_s1 + $0x7a8] ss:$16 sps:$4 sm:$0xff]  }
  0xb2   :  { %1522 = vmatmul.mubr.bf16.vlgmr.msra.gmra.mxu0 %v1249_v34  ;;  %1563 = vmatmul.mubr.bf16.vlgmr.msra.gmra.mxu1 %v1249_v34  ;;  %v8630_v34 = vld [vmem:[%s12084_s1 + $0x78c] ss:$16 sps:$4 sm:$0xff]  }
  0xb3   :  { %1878 = vmatpush1.bf16.msra.mxu0 %v8547_v35  ;;  %1919 = vmatpush1.bf16.msra.mxu1 %v8550_v36  ;;  %v8625_v35 = vld [vmem:[%s12084_s1 + $0x780] ss:$16 sps:$4 sm:$0xff]   ;;  %v8628_v36 = vld [vmem:[%s12084_s1 + $0x788] ss:$16 sps:$4 sm:$0xff]  }
  0xb4   :  { %1879 = vmatprep.subr.bf16.mxu0 %v8555_v37  ;;  %1920 = vmatprep.subr.bf16.mxu1 %v8558_v39  ;;  %v8633_v37 = vld [vmem:[%s12084_s1 + $0x764] ss:$16 sps:$4 sm:$0xff]   ;;  %v8636_v39 = vld [vmem:[%s12084_s1 + $0x76c] ss:$16 sps:$4 sm:$0xff]  }
  0xb5   :  { %7149 = vmatprep.mubr.msk.bf16.mxu0 %vm360_vm2, %v1644_v40  ;;  %7150 = vmatprep.mubr.msk.bf16.mxu1 %vm360_vm2, %v1644_v40  ;;  %v8631_v40 = vld [vmem:[%s12084_s1 + $0x760] ss:$16 sps:$4 sm:$0xff]  }
  0xb7   :  { %1880 = vmatpush1.bf16.msra.mxu0 %v8553_v42  ;;  %1921 = vmatpush1.bf16.msra.mxu1 %v8556_v43  ;;  %v8634_v42 = vld [vmem:[%s12084_s1 + $0x768] ss:$16 sps:$4 sm:$0xff]   ;;  %v8639_v43 = vld [vmem:[%s12084_s1 + $0x744] ss:$16 sps:$4 sm:$0xff]  }
  0xb8   :  { %1881 = vmatprep.subr.bf16.mxu0 %v8561_v44  ;;  %1922 = vmatprep.subr.bf16.mxu1 %v8564_v45  ;;  %v8642_v44 = vld [vmem:[%s12084_s1 + $0x74c] ss:$16 sps:$4 sm:$0xff]   ;;  %v8637_v45 = vld [vmem:[%s12084_s1 + $0x740] ss:$16 sps:$4 sm:$0xff]  }
  0xbb   :  { %1882 = vmatpush1.bf16.msra.mxu0 %v8559_v47  ;;  %1923 = vmatpush1.bf16.msra.mxu1 %v8562_v48  ;;  %v8640_v47 = vld [vmem:[%s12084_s1 + $0x748] ss:$16 sps:$4 sm:$0xff]   ;;  %v8645_v48 = vld [vmem:[%s12084_s1 + $0x724] ss:$16 sps:$4 sm:$0xff]  }
  0xbc   :  { %1883 = vmatprep.subr.bf16.mxu0 %v8567_v49  ;;  %1924 = vmatprep.subr.bf16.mxu1 %v8570_v50  ;;  %v8648_v49 = vld [vmem:[%s12084_s1 + $0x72c] ss:$16 sps:$4 sm:$0xff]  }
  0xbf   :  { %1884 = vmatpush1.bf16.msra.mxu0 %v8565_v51  ;;  %1925 = vmatpush1.bf16.msra.mxu1 %v8568_v52  ;;  %v8643_v52 = vld [vmem:[%s12084_s1 + $0x720] ss:$16 sps:$4 sm:$0xff]  }
  0xc0   :  { %1885 = vmatprep.subr.bf16.mxu0 %v8573_v53  ;;  %1926 = vmatprep.subr.bf16.mxu1 %v8576_v54  ;;  %v8646_v53 = vld [vmem:[%s12084_s1 + $0x728] ss:$16 sps:$4 sm:$0xff]  }
  0xc3   :  { %1886 = vmatpush1.bf16.msra.mxu0 %v8571_v55  ;;  %1927 = vmatpush1.bf16.msra.mxu1 %v8574_v56  ;;  %v8651_v56 = vld [vmem:[%s12084_s1 + $0x704] ss:$16 sps:$4 sm:$0xff]  }
  0xc4   :  { %1887 = vmatprep.subr.bf16.mxu0 %v8579_v57  ;;  %1928 = vmatprep.subr.bf16.mxu1 %v8582_v58  ;;  %v8654_v57 = vld [vmem:[%s12084_s1 + $0x70c] ss:$16 sps:$4 sm:$0xff]   ;;  %v8649_v58 = vld [vmem:[%s12084_s1 + $0x700] ss:$16 sps:$4 sm:$0xff]  }
  0xc7   :  { %1888 = vmatpush1.bf16.msra.mxu0 %v8577_v59  ;;  %1929 = vmatpush1.bf16.msra.mxu1 %v8580_v60  ;;  %v8652_v59 = vld [vmem:[%s12084_s1 + $0x708] ss:$16 sps:$4 sm:$0xff]  }
  0xc8   :  { %1889 = vmatprep.subr.bf16.mxu0 %v8585_v61  ;;  %1930 = vmatprep.subr.bf16.mxu1 %v8588_v62  ;;  %v8657_v62 = vld [vmem:[%s12084_s1 + $0x6e4] ss:$16 sps:$4 sm:$0xff]  }
  0xcb   :  { %1890 = vmatpush1.bf16.msra.mxu0 %v8583_v63  ;;  %1931 = vmatpush1.bf16.msra.mxu1 %v8586_v0  ;;  %v8660_v63 = vld [vmem:[%s12084_s1 + $0x6ec] ss:$16 sps:$4 sm:$0xff]   ;;  %v8663_v0 = vld [vmem:[%s12084_s1 + $0x824] ss:$16 sps:$4 sm:$0x1f]  }
  0xcc   :  { %1891 = vmatprep.subr.bf16.mxu0 %v8591_v1  ;;  %1932 = vmatprep.subr.bf16.mxu1 %v8594_v2  ;;  %v2257_v8 = vand.u32 %v8663_v0, %v9551_v41  ;;  %v8718_v0 = vld [vmem:[%s12084_s1 + $0x868] ss:$16 sps:$4 sm:$0xff]  }
  0xcf   :  { %1892 = vmatpush1.bf16.msra.mxu0 %v8589_v5  ;;  %1933 = vmatpush1.bf16.msra.mxu1 %v8592_v6  ;;  %v8658_v5 = vld [vmem:[%s12084_s1 + $0x6e8] ss:$16 sps:$4 sm:$0xff]   ;;  %v8661_v6 = vld [vmem:[%s12084_s1 + $0x820] ss:$16 sps:$4 sm:$0x1f]  }
  0xd0   :  { %1903 = vmatprep.subr.bf16.mxu0 %v1869_v9  ;;  %1944 = vmatprep.subr.bf16.mxu1 %v1875_v10  ;;  %v2263_v9 = vand.u32 %v8666_v3, %v9551_v41  ;;  %v2254_v10 = vand.u32 %v8661_v6, %v9551_v41  ;;  %v8723_v3 = vld [vmem:[%s12084_s1 + $0x844] ss:$16 sps:$4 sm:$0xff]   ;;  %v8732_v6 = vld [vmem:[%s12084_s1 + $0x98c] ss:$16 sps:$4 sm:$0x1f]  }
  0xd3   :  { %1904 = vmatpush2.bf16.msra.mxu0 %v1866_v11  ;;  %1945 = vmatpush2.bf16.msra.mxu1 %v1872_v12  ;;  %v2260_v11 = vand.u32 %v8664_v7, %v9551_v41  ;;  %v8669_v12 = vld [vmem:[%s12084_s1 + $0x804] ss:$16 sps:$4 sm:$0xff]   ;;  %v8721_v7 = vld [vmem:[%s12084_s1 + $0x840] ss:$16 sps:$4 sm:$0xff]  }
  0xd4   :  { %1905 = vmatprep.subr.bf16.mxu0 %v8603_v13  ;;  %1946 = vmatprep.subr.bf16.mxu1 %v8606_v14  ;;  %v8672_v13 = vld [vmem:[%s12084_s1 + $0x80c] ss:$16 sps:$4 sm:$0xff]   ;;  %v8667_v14 = vld [vmem:[%s12084_s1 + $0x800] ss:$16 sps:$4 sm:$0xff]  }
  0xd7   :  { %1906 = vmatpush2.bf16.msra.mxu0 %v8601_v15  ;;  %1947 = vmatpush2.bf16.msra.mxu1 %v8604_v16  ;;  %v8670_v15 = vld [vmem:[%s12084_s1 + $0x808] ss:$16 sps:$4 sm:$0xff]   ;;  %v8675_v16 = vld [vmem:[%s12084_s1 + $0x7e4] ss:$16 sps:$4 sm:$0xff]  }
  0xd8   :  { %1907 = vmatprep.subr.bf16.mxu0 %v8609_v17  ;;  %1948 = vmatprep.subr.bf16.mxu1 %v8612_v18  ;;  %v8678_v17 = vld [vmem:[%s12084_s1 + $0x7ec] ss:$16 sps:$4 sm:$0xff]   ;;  %v8673_v18 = vld [vmem:[%s12084_s1 + $0x7e0] ss:$16 sps:$4 sm:$0xff]  }
  0xdb   :  { %1908 = vmatpush2.bf16.msra.mxu0 %v8607_v20  ;;  %1949 = vmatpush2.bf16.msra.mxu1 %v8610_v21  ;;  %v8676_v20 = vld [vmem:[%s12084_s1 + $0x7e8] ss:$16 sps:$4 sm:$0xff]   ;;  %v10341_v21 = vld.sshfl [vmem:[%s12083_s0 + $0xc] sm:$0x11 pattern:$0x75316420] }
  0xdc   :  { %2265 = vmatprep.subr.bf16.mxu0 %v8615_v22  ;;  %2306 = vmatprep.subr.bf16.mxu1 %v8618_v23  ;;  %v8681_v22 = vld [vmem:[%s12084_s1 + $0x924] ss:$16 sps:$4 sm:$0xff]   ;;  %v8684_v23 = vld [vmem:[%s12084_s1 + $0x92c] ss:$16 sps:$4 sm:$0xff]   ;;  %v2406_v24 = vcombine.high %v10341_v21, %v10341_v21 }
  0xde   :  { %1910 = vmatmul.mubr.bf16.vlgmr.msra.gmra.mxu0 %v1637_v25  ;;  %1951 = vmatmul.mubr.bf16.vlgmr.msra.gmra.mxu1 %v1637_v25  ;;  %v2025_v25 = vrot.slane %v10179_v19, %v9562_v46  ;;  %v8690_v19 = vld [vmem:[%s12084_s1 + $0x90c] ss:$16 sps:$4 sm:$0xff]  }
  0xdf   :  { %2266 = vmatpush1.bf16.msra.mxu0 %v8613_v26  ;;  %2307 = vmatpush1.bf16.msra.mxu1 %v8616_v27  ;;  %v8679_v26 = vld [vmem:[%s12084_s1 + $0x920] ss:$16 sps:$4 sm:$0xff]   ;;  %v8682_v27 = vld [vmem:[%s12084_s1 + $0x928] ss:$16 sps:$4 sm:$0xff]  }
  0xe0   :  { %2267 = vmatprep.subr.bf16.mxu0 %v8621_v29  ;;  %2308 = vmatprep.subr.bf16.mxu1 %v8624_v28  ;;  %v8687_v29 = vld [vmem:[%s12084_s1 + $0x904] ss:$16 sps:$4 sm:$0xff]   ;;  %v2420_v28 = vrot.slane %v2406_v24, %v9562_v46  ;;  %v8739_v24 = vld [vmem:[%s12084_s1 + $0x940] ss:$16 sps:$4 sm:$0xff]  }
  0xe1   :  { %7241 = vmatprep.mubr.msk.bf16.mxu0 %vm360_vm2, %v2032_v30  ;;  %7242 = vmatprep.mubr.msk.bf16.mxu1 %vm360_vm2, %v2032_v30  ;;  %v8685_v30 = vld [vmem:[%s12084_s1 + $0x900] ss:$16 sps:$4 sm:$0xff]  }
  0xe3   :  { %2268 = vmatpush1.bf16.msra.mxu0 %v8619_v31  ;;  %2309 = vmatpush1.bf16.msra.mxu1 %v8622_v32  ;;  %v8688_v31 = vld [vmem:[%s12084_s1 + $0x908] ss:$16 sps:$4 sm:$0xff]   ;;  %v8693_v32 = vld [vmem:[%s12084_s1 + $0x8e4] ss:$16 sps:$4 sm:$0xff]  }
  0xe4   :  { %2269 = vmatprep.subr.bf16.mxu0 %v8627_v33  ;;  %2310 = vmatprep.subr.bf16.mxu1 %v8630_v34  ;;  %v8696_v33 = vld [vmem:[%s12084_s1 + $0x8ec] ss:$16 sps:$4 sm:$0xff]   ;;  %v8691_v34 = vld [vmem:[%s12084_s1 + $0x8e0] ss:$16 sps:$4 sm:$0xff]  }
  0xe7   :  { %2270 = vmatpush1.bf16.msra.mxu0 %v8625_v35  ;;  %2311 = vmatpush1.bf16.msra.mxu1 %v8628_v36  ;;  %v8694_v35 = vld [vmem:[%s12084_s1 + $0x8e8] ss:$16 sps:$4 sm:$0xff]   ;;  %v8699_v36 = vld [vmem:[%s12084_s1 + $0x8c4] ss:$16 sps:$4 sm:$0xff]  }
  0xe8   :  { %2271 = vmatprep.subr.bf16.mxu0 %v8633_v37  ;;  %2312 = vmatprep.subr.bf16.mxu1 %v8636_v39  ;;  %v8702_v37 = vld [vmem:[%s12084_s1 + $0x8cc] ss:$16 sps:$4 sm:$0xff]   ;;  %v8697_v39 = vld [vmem:[%s12084_s1 + $0x8c0] ss:$16 sps:$4 sm:$0xff]  }
  0xeb   :  { %2272 = vmatpush1.bf16.msra.mxu0 %v8631_v40  ;;  %2313 = vmatpush1.bf16.msra.mxu1 %v8634_v42  ;;  %v8700_v40 = vld [vmem:[%s12084_s1 + $0x8c8] ss:$16 sps:$4 sm:$0xff]   ;;  %v8705_v42 = vld [vmem:[%s12084_s1 + $0x8a4] ss:$16 sps:$4 sm:$0xff]  }
  0xec   :  { %2273 = vmatprep.subr.bf16.mxu0 %v8639_v43  ;;  %2314 = vmatprep.subr.bf16.mxu1 %v8642_v44  ;;  %v8708_v43 = vld [vmem:[%s12084_s1 + $0x8ac] ss:$16 sps:$4 sm:$0xff]   ;;  %v8703_v44 = vld [vmem:[%s12084_s1 + $0x8a0] ss:$16 sps:$4 sm:$0xff]  }
  0xee   :  { %v10260_v50 = vpop.f32.mrf.mxu0  ;;  %v10262_v51 = vpop.f32.mrf.mxu1 }
  0xef   :  { %2274 = vmatpush1.bf16.msra.mxu0 %v8637_v45  ;;  %2315 = vmatpush1.bf16.msra.mxu1 %v8640_v47  ;;  %v8706_v45 = vld [vmem:[%s12084_s1 + $0x8a8] ss:$16 sps:$4 sm:$0xff]   ;;  %v8711_v47 = vld [vmem:[%s12084_s1 + $0x884] ss:$16 sps:$4 sm:$0xff]  }
  0xf0   :  { %v10270_v54 = vpop.f32.mrf.mxu0  ;;  %v10272_v55 = vpop.f32.mrf.mxu1  ;;  %2275 = vmatprep.subr.bf16.mxu0 %v8645_v48  ;;  %2316 = vmatprep.subr.bf16.mxu1 %v8648_v49  ;;  %v8714_v48 = vld [vmem:[%s12084_s1 + $0x88c] ss:$16 sps:$4 sm:$0xff]   ;;  %v8709_v49 = vld [vmem:[%s12084_s1 + $0x880] ss:$16 sps:$4 sm:$0xff]  }
  0xf2   :  { %v418_v60 = vpop.f32.mrf.mxu0  ;;  %v459_v61 = vpop.f32.mrf.mxu1 }
  0xf3   :  { %2276 = vmatpush1.bf16.msra.mxu0 %v8643_v52  ;;  %2317 = vmatpush1.bf16.msra.mxu1 %v8646_v53  ;;  %v8712_v52 = vld [vmem:[%s12084_s1 + $0x888] ss:$16 sps:$4 sm:$0xff]   ;;  %v8717_v61 = vld [vmem:[%s12084_s1 + $0x864] ss:$16 sps:$4 sm:$0xff]  }
  0xf4   :  { %v419_v1 = vpop.f32.mrf.mxu0  ;;  %v460_v2 = vpop.f32.mrf.mxu1  ;;  %2277 = vmatprep.subr.bf16.mxu0 %v8651_v56  ;;  %2318 = vmatprep.subr.bf16.mxu1 %v8654_v57 }
  0xf7   :  { %2278 = vmatpush1.bf16.msra.mxu0 %v8649_v58  ;;  %2319 = vmatpush1.bf16.msra.mxu1 %v8652_v59 }
  0xf8   :  { %2279 = vmatprep.subr.bf16.mxu0 %v8657_v62  ;;  %2320 = vmatprep.subr.bf16.mxu1 %v8660_v63  ;;  %v8720_v62 = vld [vmem:[%s12084_s1 + $0x86c] ss:$16 sps:$4 sm:$0xff]   ;;  %v8715_v63 = vld [vmem:[%s12084_s1 + $0x860] ss:$16 sps:$4 sm:$0xff]  }
  0xfb   :  { %2280 = vmatpush1.bf16.msra.mxu0 %v8655_v4  ;;  %2321 = vmatpush1.bf16.msra.mxu1 %v8658_v5  ;;  %v8726_v5 = vld [vmem:[%s12084_s1 + $0x84c] ss:$16 sps:$4 sm:$0xff]  }
  0xfc   :  { %2291 = vmatprep.subr.bf16.mxu0 %v2257_v8  ;;  %2332 = vmatprep.subr.bf16.mxu1 %v2263_v9  ;;  %v8724_v8 = vld [vmem:[%s12084_s1 + $0x848] ss:$16 sps:$4 sm:$0xff]   ;;  %v8727_v9 = vld [vmem:[%s12084_s1 + $0x980] ss:$16 sps:$4 sm:$0x1f]  }
  0xff   :  { %2292 = vmatpush2.bf16.msra.mxu0 %v2254_v10  ;;  %2333 = vmatpush2.bf16.msra.mxu1 %v2260_v11  ;;  %v8730_v10 = vld [vmem:[%s12084_s1 + $0x988] ss:$16 sps:$4 sm:$0x1f]  }
 0x100   :  { %2293 = vmatprep.subr.bf16.mxu0 %v8669_v12  ;;  %2334 = vmatprep.subr.bf16.mxu1 %v8672_v13  ;;  %v2651_v12 = vand.u32 %v8732_v6, %v9551_v41  ;;  %v2642_v13 = vand.u32 %v8727_v9, %v9551_v41  ;;  %v8789_v6 = vld [vmem:[%s12084_s1 + $0x9a4] ss:$16 sps:$4 sm:$0xff]   ;;  %v8798_v9 = vld [vmem:[%s12084_s1 + $0xaec] ss:$16 sps:$4 sm:$0x1f]  }
 0x103   :  { %2294 = vmatpush2.bf16.msra.mxu0 %v8667_v14  ;;  %2335 = vmatpush2.bf16.msra.mxu1 %v8670_v15  ;;  %v2648_v14 = vand.u32 %v8730_v10, %v9551_v41  ;;  %v8735_v15 = vld [vmem:[%s12084_s1 + $0x964] ss:$16 sps:$4 sm:$0xff]   ;;  %v8787_v10 = vld [vmem:[%s12084_s1 + $0x9a0] ss:$16 sps:$4 sm:$0xff]  }
 0x104   :  { %2295 = vmatprep.subr.bf16.mxu0 %v8675_v16  ;;  %2336 = vmatprep.subr.bf16.mxu1 %v8678_v17  ;;  %v8738_v16 = vld [vmem:[%s12084_s1 + $0x96c] ss:$16 sps:$4 sm:$0xff]   ;;  %v8733_v17 = vld [vmem:[%s12084_s1 + $0x960] ss:$16 sps:$4 sm:$0xff]  }
 0x107   :  { %2296 = vmatpush2.bf16.msra.mxu0 %v8673_v18  ;;  %2337 = vmatpush2.bf16.msra.mxu1 %v8676_v20  ;;  %v8736_v18 = vld [vmem:[%s12084_s1 + $0x968] ss:$16 sps:$4 sm:$0xff]   ;;  %v8741_v20 = vld [vmem:[%s12084_s1 + $0x944] ss:$16 sps:$4 sm:$0xff]  }
 0x108   :  { %2653 = vmatprep.subr.bf16.mxu0 %v8681_v22  ;;  %2694 = vmatprep.subr.bf16.mxu1 %v8684_v23  ;;  %v8744_v22 = vld [vmem:[%s12084_s1 + $0x94c] ss:$16 sps:$4 sm:$0xff]  }
 0x109   :  { %v10495_v23 = vld.sshfl [vmem:[%s12083_s0 + $0xe] sm:$0x11 pattern:$0x75316420] }
 0x10a   :  { %2298 = vmatmul.mubr.bf16.vlgmr.msra.gmra.mxu0 %v2025_v25  ;;  %2339 = vmatmul.mubr.bf16.vlgmr.msra.gmra.mxu1 %v2025_v25  ;;  %v8742_v25 = vld [vmem:[%s12084_s1 + $0x948] ss:$16 sps:$4 sm:$0xff]  }
 0x10b   :  { %2654 = vmatpush1.bf16.msra.mxu0 %v8679_v26  ;;  %2695 = vmatpush1.bf16.msra.mxu1 %v8682_v27  ;;  %v8747_v26 = vld [vmem:[%s12084_s1 + $0xa84] ss:$16 sps:$4 sm:$0xff]   ;;  %v8750_v27 = vld [vmem:[%s12084_s1 + $0xa8c] ss:$16 sps:$4 sm:$0xff]  }
 0x10c   :  { %2655 = vmatprep.subr.bf16.mxu0 %v8687_v29  ;;  %2696 = vmatprep.subr.bf16.mxu1 %v8690_v19  ;;  %v2794_v29 = vcombine.high %v10495_v23, %v10495_v23  ;;  %v2413_v19 = vrot.slane %v10341_v21, %v9562_v46  ;;  %v8756_v21 = vld [vmem:[%s12084_s1 + $0xa6c] ss:$16 sps:$4 sm:$0xff]  }
 0x10d   :  { %7333 = vmatprep.mubr.msk.bf16.mxu0 %vm360_vm2, %v2420_v28  ;;  %7334 = vmatprep.mubr.msk.bf16.mxu1 %vm360_vm2, %v2420_v28  ;;  %v8745_v28 = vld [vmem:[%s12084_s1 + $0xa80] ss:$16 sps:$4 sm:$0xff]  }
 0x10f   :  { %2656 = vmatpush1.bf16.msra.mxu0 %v8685_v30  ;;  %2697 = vmatpush1.bf16.msra.mxu1 %v8688_v31  ;;  %v8748_v30 = vld [vmem:[%s12084_s1 + $0xa88] ss:$16 sps:$4 sm:$0xff]   ;;  %v8753_v31 = vld [vmem:[%s12084_s1 + $0xa64] ss:$16 sps:$4 sm:$0xff]  }
 0x110   :  { %2657 = vmatprep.subr.bf16.mxu0 %v8693_v32  ;;  %2698 = vmatprep.subr.bf16.mxu1 %v8696_v33  ;;  %v8751_v32 = vld [vmem:[%s12084_s1 + $0xa60] ss:$16 sps:$4 sm:$0xff]   ;;  %v8754_v33 = vld [vmem:[%s12084_s1 + $0xa68] ss:$16 sps:$4 sm:$0xff]  }
 0x113   :  { %2658 = vmatpush1.bf16.msra.mxu0 %v8691_v34  ;;  %2699 = vmatpush1.bf16.msra.mxu1 %v8694_v35  ;;  %v2808_v34 = vrot.slane %v2794_v29, %v9562_v46  ;;  %v8759_v35 = vld [vmem:[%s12084_s1 + $0xa44] ss:$16 sps:$4 sm:$0xff]   ;;  %v8805_v29 = vld [vmem:[%s12084_s1 + $0xaa0] ss:$16 sps:$4 sm:$0xff]  }
 0x114   :  { %2659 = vmatprep.subr.bf16.mxu0 %v8699_v36  ;;  %2700 = vmatprep.subr.bf16.mxu1 %v8702_v37  ;;  %v8762_v36 = vld [vmem:[%s12084_s1 + $0xa4c] ss:$16 sps:$4 sm:$0xff]   ;;  %v8757_v37 = vld [vmem:[%s12084_s1 + $0xa40] ss:$16 sps:$4 sm:$0xff]  }
 0x117   :  { %2660 = vmatpush1.bf16.msra.mxu0 %v8697_v39  ;;  %2701 = vmatpush1.bf16.msra.mxu1 %v8700_v40  ;;  %v8760_v39 = vld [vmem:[%s12084_s1 + $0xa48] ss:$16 sps:$4 sm:$0xff]   ;;  %v8765_v40 = vld [vmem:[%s12084_s1 + $0xa24] ss:$16 sps:$4 sm:$0xff]  }
 0x118   :  { %2661 = vmatprep.subr.bf16.mxu0 %v8705_v42  ;;  %2702 = vmatprep.subr.bf16.mxu1 %v8708_v43  ;;  %v8768_v42 = vld [vmem:[%s12084_s1 + $0xa2c] ss:$16 sps:$4 sm:$0xff]   ;;  %v8763_v43 = vld [vmem:[%s12084_s1 + $0xa20] ss:$16 sps:$4 sm:$0xff]  }
 0x11a   :  { %v751_v53 = vpop.f32.mrf.mxu0  ;;  %v792_v56 = vpop.f32.mrf.mxu1 }
 0x11b   :  { %v10423_v57 = vadd.f32 %v751_v53, %v10260_v50  ;;  %v10426_v58 = vadd.f32 %v792_v56, %v10262_v51  ;;  %2662 = vmatpush1.bf16.msra.mxu0 %v8703_v44  ;;  %2703 = vmatpush1.bf16.msra.mxu1 %v8706_v45  ;;  %v8766_v44 = vld [vmem:[%s12084_s1 + $0xa28] ss:$16 sps:$4 sm:$0xff]   ;;  %v8771_v45 = vld [vmem:[%s12084_s1 + $0xa04] ss:$16 sps:$4 sm:$0xff]   ;;  %v8780_v53 = vld [vmem:[%s12084_s1 + $0x9ec] ss:$16 sps:$4 sm:$0xff]  }
 0x11c   :  { %v753_v59 = vpop.f32.mrf.mxu0  ;;  %v794_v60 = vpop.f32.mrf.mxu1  ;;  %2663 = vmatprep.subr.bf16.mxu0 %v8711_v47  ;;  %2704 = vmatprep.subr.bf16.mxu1 %v8714_v48  ;;  %v8774_v47 = vld [vmem:[%s12084_s1 + $0xa0c] ss:$16 sps:$4 sm:$0xff]   ;;  %v8769_v48 = vld [vmem:[%s12084_s1 + $0xa00] ss:$16 sps:$4 sm:$0xff]  }
 0x11d   :  { %v10435_v50 = vadd.f32 %v753_v59, %v10270_v54  ;;  %v10438_v51 = vadd.f32 %v794_v60, %v10272_v55  ;;  %v8729_v54 = vld [vmem:[%s12084_s1 + $0x984] ss:$16 sps:$4 sm:$0x1f]   ;;  %v8775_v56 = vld [vmem:[%s12084_s1 + $0x9e0] ss:$16 sps:$4 sm:$0xff]  }
 0x11e   :  { %v755_v1 = vpop.f32.mrf.mxu0  ;;  %v796_v2 = vpop.f32.mrf.mxu1  ;;  %v2645_v11 = vand.u32 %v8729_v54, %v9551_v41  ;;  %v8778_v59 = vld [vmem:[%s12084_s1 + $0x9e8] ss:$16 sps:$4 sm:$0xff]   ;;  %v8781_v54 = vld [vmem:[%s12084_s1 + $0x9c0] ss:$16 sps:$4 sm:$0xff]  }
 0x11f   :  { %2664 = vmatpush1.bf16.msra.mxu0 %v8709_v49  ;;  %2705 = vmatpush1.bf16.msra.mxu1 %v8712_v52  ;;  %v8772_v49 = vld [vmem:[%s12084_s1 + $0xa08] ss:$16 sps:$4 sm:$0xff]   ;;  %v8777_v52 = vld [vmem:[%s12084_s1 + $0x9e4] ss:$16 sps:$4 sm:$0xff]  }
 0x120   :  { %v756_v55 = vpop.f32.mrf.mxu0  ;;  %v797_v4 = vpop.f32.mrf.mxu1  ;;  %2665 = vmatprep.subr.bf16.mxu0 %v8717_v61  ;;  %2706 = vmatprep.subr.bf16.mxu1 %v8720_v62  ;;  %v8783_v2 = vld [vmem:[%s12084_s1 + $0x9c4] ss:$16 sps:$4 sm:$0xff]  }
 0x121   :  { %v8784_v55 = vld [vmem:[%s12084_s1 + $0x9c8] ss:$16 sps:$4 sm:$0xff]  }
 0x123   :  { %2666 = vmatpush1.bf16.msra.mxu0 %v8715_v63  ;;  %2707 = vmatpush1.bf16.msra.mxu1 %v8718_v0 }
 0x124   :  { %2667 = vmatprep.subr.bf16.mxu0 %v8723_v3  ;;  %2708 = vmatprep.subr.bf16.mxu1 %v8726_v5  ;;  %v8786_v3 = vld [vmem:[%s12084_s1 + $0x9cc] ss:$16 sps:$4 sm:$0xff]  }
 0x127   :  { %2668 = vmatpush1.bf16.msra.mxu0 %v8721_v7  ;;  %2709 = vmatpush1.bf16.msra.mxu1 %v8724_v8  ;;  %v8792_v8 = vld [vmem:[%s12084_s1 + $0x9ac] ss:$16 sps:$4 sm:$0xff]  }
 0x128   :  { %2679 = vmatprep.subr.bf16.mxu0 %v2645_v11  ;;  %2720 = vmatprep.subr.bf16.mxu1 %v2651_v12  ;;  %v8790_v11 = vld [vmem:[%s12084_s1 + $0x9a8] ss:$16 sps:$4 sm:$0xff]   ;;  %v8793_v12 = vld [vmem:[%s12084_s1 + $0xae0] ss:$16 sps:$4 sm:$0x1f]  }
 0x12b   :  { %2680 = vmatpush2.bf16.msra.mxu0 %v2642_v13  ;;  %2721 = vmatpush2.bf16.msra.mxu1 %v2648_v14  ;;  %v8796_v13 = vld [vmem:[%s12084_s1 + $0xae8] ss:$16 sps:$4 sm:$0x1f]  }
 0x12c   :  { %2681 = vmatprep.subr.bf16.mxu0 %v8735_v15  ;;  %2722 = vmatprep.subr.bf16.mxu1 %v8738_v16  ;;  %v3039_v15 = vand.u32 %v8798_v9, %v9551_v41  ;;  %v3030_v16 = vand.u32 %v8793_v12, %v9551_v41  ;;  %v8855_v9 = vld [vmem:[%s12084_s1 + $0xb04] ss:$16 sps:$4 sm:$0xff]   ;;  %v8864_v12 = vld [vmem:[%s12084_s1 + $0xc4c] ss:$16 sps:$4 sm:$0x1f]  }
 0x12f   :  { %2682 = vmatpush2.bf16.msra.mxu0 %v8733_v17  ;;  %2723 = vmatpush2.bf16.msra.mxu1 %v8736_v18  ;;  %v3036_v17 = vand.u32 %v8796_v13, %v9551_v41  ;;  %v8801_v18 = vld [vmem:[%s12084_s1 + $0xac4] ss:$16 sps:$4 sm:$0xff]   ;;  %v8853_v13 = vld [vmem:[%s12084_s1 + $0xb00] ss:$16 sps:$4 sm:$0xff]  }
 0x130   :  { %2683 = vmatprep.subr.bf16.mxu0 %v8741_v20  ;;  %2724 = vmatprep.subr.bf16.mxu1 %v8744_v22  ;;  %v8804_v20 = vld [vmem:[%s12084_s1 + $0xacc] ss:$16 sps:$4 sm:$0xff]   ;;  %v8799_v22 = vld [vmem:[%s12084_s1 + $0xac0] ss:$16 sps:$4 sm:$0xff]  }
 0x133   :  { %2684 = vmatpush2.bf16.msra.mxu0 %v8739_v24  ;;  %2725 = vmatpush2.bf16.msra.mxu1 %v8742_v25  ;;  %v8802_v24 = vld [vmem:[%s12084_s1 + $0xac8] ss:$16 sps:$4 sm:$0xff]   ;;  %v8807_v25 = vld [vmem:[%s12084_s1 + $0xaa4] ss:$16 sps:$4 sm:$0xff]  }
 0x134   :  { %3041 = vmatprep.subr.bf16.mxu0 %v8747_v26  ;;  %3082 = vmatprep.subr.bf16.mxu1 %v8750_v27  ;;  %v8810_v26 = vld [vmem:[%s12084_s1 + $0xaac] ss:$16 sps:$4 sm:$0xff]   ;;  %v10655_v27 = vld.sshfl [vmem:[%s12083_s0 + $0x10] sm:$0x11 pattern:$0x75316420] }
 0x136   :  { %2686 = vmatmul.mubr.bf16.vlgmr.msra.gmra.mxu0 %v2413_v19  ;;  %2727 = vmatmul.mubr.bf16.vlgmr.msra.gmra.mxu1 %v2413_v19  ;;  %v8808_v19 = vld [vmem:[%s12084_s1 + $0xaa8] ss:$16 sps:$4 sm:$0xff]  }
 0x137   :  { %3042 = vmatpush1.bf16.msra.mxu0 %v8745_v28  ;;  %3083 = vmatpush1.bf16.msra.mxu1 %v8748_v30  ;;  %v8813_v28 = vld [vmem:[%s12084_s1 + $0xbe4] ss:$16 sps:$4 sm:$0xff]   ;;  %v8816_v30 = vld [vmem:[%s12084_s1 + $0xbec] ss:$16 sps:$4 sm:$0xff]  }
 0x138   :  { %3043 = vmatprep.subr.bf16.mxu0 %v8753_v31  ;;  %3084 = vmatprep.subr.bf16.mxu1 %v8756_v21  ;;  %v3182_v31 = vcombine.high %v10655_v27, %v10655_v27  ;;  %v2801_v21 = vrot.slane %v10495_v23, %v9562_v46  ;;  %v8822_v23 = vld [vmem:[%s12084_s1 + $0xbcc] ss:$16 sps:$4 sm:$0xff]  }
 0x139   :  { %7425 = vmatprep.mubr.msk.bf16.mxu0 %vm360_vm2, %v2808_v34  ;;  %7426 = vmatprep.mubr.msk.bf16.mxu1 %vm360_vm2, %v2808_v34  ;;  %v8819_v34 = vld [vmem:[%s12084_s1 + $0xbc4] ss:$16 sps:$4 sm:$0xff]  }
 0x13b   :  { %3044 = vmatpush1.bf16.msra.mxu0 %v8751_v32  ;;  %3085 = vmatpush1.bf16.msra.mxu1 %v8754_v33  ;;  %v8811_v32 = vld [vmem:[%s12084_s1 + $0xbe0] ss:$16 sps:$4 sm:$0xff]   ;;  %v8814_v33 = vld [vmem:[%s12084_s1 + $0xbe8] ss:$16 sps:$4 sm:$0xff]  }
 0x13c   :  { %3045 = vmatprep.subr.bf16.mxu0 %v8759_v35  ;;  %3086 = vmatprep.subr.bf16.mxu1 %v8762_v36  ;;  %v8817_v35 = vld [vmem:[%s12084_s1 + $0xbc0] ss:$16 sps:$4 sm:$0xff]   ;;  %v8820_v36 = vld [vmem:[%s12084_s1 + $0xbc8] ss:$16 sps:$4 sm:$0xff]  }
 0x13f   :  { %3046 = vmatpush1.bf16.msra.mxu0 %v8757_v37  ;;  %3087 = vmatpush1.bf16.msra.mxu1 %v8760_v39  ;;  %v3196_v37 = vrot.slane %v3182_v31, %v9562_v46  ;;  %v8825_v39 = vld [vmem:[%s12084_s1 + $0xba4] ss:$16 sps:$4 sm:$0xff]   ;;  %v8871_v31 = vld [vmem:[%s12084_s1 + $0xc00] ss:$16 sps:$4 sm:$0xff]  }
 0x140   :  { %3047 = vmatprep.subr.bf16.mxu0 %v8765_v40  ;;  %3088 = vmatprep.subr.bf16.mxu1 %v8768_v42  ;;  %v8828_v40 = vld [vmem:[%s12084_s1 + $0xbac] ss:$16 sps:$4 sm:$0xff]   ;;  %v8823_v42 = vld [vmem:[%s12084_s1 + $0xba0] ss:$16 sps:$4 sm:$0xff]  }
 0x143   :  { %3048 = vmatpush1.bf16.msra.mxu0 %v8763_v43  ;;  %3089 = vmatpush1.bf16.msra.mxu1 %v8766_v44  ;;  %v8826_v43 = vld [vmem:[%s12084_s1 + $0xba8] ss:$16 sps:$4 sm:$0xff]   ;;  %v8831_v44 = vld [vmem:[%s12084_s1 + $0xb84] ss:$16 sps:$4 sm:$0xff]  }
 0x144   :  { %3049 = vmatprep.subr.bf16.mxu0 %v8771_v45  ;;  %3090 = vmatprep.subr.bf16.mxu1 %v8774_v47  ;;  %v8834_v45 = vld [vmem:[%s12084_s1 + $0xb8c] ss:$16 sps:$4 sm:$0xff]   ;;  %v8829_v47 = vld [vmem:[%s12084_s1 + $0xb80] ss:$16 sps:$4 sm:$0xff]  }
 0x146   :  { %v1135_v60 = vpop.f32.mrf.mxu0  ;;  %v1176_v61 = vpop.f32.mrf.mxu1 }
 0x147   :  { %v10583_v62 = vadd.f32 %v1135_v60, %v10423_v57  ;;  %v10586_v63 = vadd.f32 %v1176_v61, %v10426_v58  ;;  %3050 = vmatpush1.bf16.msra.mxu0 %v8769_v48  ;;  %3091 = vmatpush1.bf16.msra.mxu1 %v8772_v49  ;;  %v8832_v48 = vld [vmem:[%s12084_s1 + $0xb88] ss:$16 sps:$4 sm:$0xff]   ;;  %v8837_v49 = vld [vmem:[%s12084_s1 + $0xb64] ss:$16 sps:$4 sm:$0xff]   ;;  %v8846_v60 = vld [vmem:[%s12084_s1 + $0xb4c] ss:$16 sps:$4 sm:$0xff]  }
 0x148   :  { %v1137_v0 = vpop.f32.mrf.mxu0  ;;  %v1178_v1 = vpop.f32.mrf.mxu1  ;;  %3051 = vmatprep.subr.bf16.mxu0 %v8777_v52  ;;  %3092 = vmatprep.subr.bf16.mxu1 %v8780_v53  ;;  %v8840_v52 = vld [vmem:[%s12084_s1 + $0xb6c] ss:$16 sps:$4 sm:$0xff]   ;;  %v8835_v53 = vld [vmem:[%s12084_s1 + $0xb60] ss:$16 sps:$4 sm:$0xff]  }
 0x149   :  { %v10595_v57 = vadd.f32 %v1137_v0, %v10435_v50  ;;  %v10598_v58 = vadd.f32 %v1178_v1, %v10438_v51  ;;  %v8795_v50 = vld [vmem:[%s12084_s1 + $0xae4] ss:$16 sps:$4 sm:$0x1f]   ;;  %v8841_v61 = vld [vmem:[%s12084_s1 + $0xb40] ss:$16 sps:$4 sm:$0xff]  }
 0x14a   :  { %v1139_v4 = vpop.f32.mrf.mxu0  ;;  %v1180_v5 = vpop.f32.mrf.mxu1  ;;  %v3033_v14 = vand.u32 %v8795_v50, %v9551_v41  ;;  %v8844_v0 = vld [vmem:[%s12084_s1 + $0xb48] ss:$16 sps:$4 sm:$0xff]   ;;  %v8847_v50 = vld [vmem:[%s12084_s1 + $0xb20] ss:$16 sps:$4 sm:$0xff]  }
 0x14b   :  { %3052 = vmatpush1.bf16.msra.mxu0 %v8775_v56  ;;  %3093 = vmatpush1.bf16.msra.mxu1 %v8778_v59  ;;  %v8838_v56 = vld [vmem:[%s12084_s1 + $0xb68] ss:$16 sps:$4 sm:$0xff]   ;;  %v8843_v59 = vld [vmem:[%s12084_s1 + $0xb44] ss:$16 sps:$4 sm:$0xff]  }
 0x14c   :  { %v1140_v51 = vpop.f32.mrf.mxu0  ;;  %v1181_v7 = vpop.f32.mrf.mxu1  ;;  %3053 = vmatprep.subr.bf16.mxu0 %v8783_v2  ;;  %3094 = vmatprep.subr.bf16.mxu1 %v8786_v3  ;;  %v8849_v5 = vld [vmem:[%s12084_s1 + $0xb24] ss:$16 sps:$4 sm:$0xff]  }
 0x14d   :  { %v8850_v51 = vld [vmem:[%s12084_s1 + $0xb28] ss:$16 sps:$4 sm:$0xff]  }
 0x14f   :  { %3054 = vmatpush1.bf16.msra.mxu0 %v8781_v54  ;;  %3095 = vmatpush1.bf16.msra.mxu1 %v8784_v55 }
 0x150   :  { %3055 = vmatprep.subr.bf16.mxu0 %v8789_v6  ;;  %3096 = vmatprep.subr.bf16.mxu1 %v8792_v8  ;;  %v8852_v6 = vld [vmem:[%s12084_s1 + $0xb2c] ss:$16 sps:$4 sm:$0xff]  }
 0x153   :  { %3056 = vmatpush1.bf16.msra.mxu0 %v8787_v10  ;;  %3097 = vmatpush1.bf16.msra.mxu1 %v8790_v11  ;;  %v8858_v11 = vld [vmem:[%s12084_s1 + $0xb0c] ss:$16 sps:$4 sm:$0xff]  }
 0x154   :  { %3067 = vmatprep.subr.bf16.mxu0 %v3033_v14  ;;  %3108 = vmatprep.subr.bf16.mxu1 %v3039_v15  ;;  %v8856_v14 = vld [vmem:[%s12084_s1 + $0xb08] ss:$16 sps:$4 sm:$0xff]   ;;  %v8859_v15 = vld [vmem:[%s12084_s1 + $0xc40] ss:$16 sps:$4 sm:$0x1f]  }
 0x157   :  { %3068 = vmatpush2.bf16.msra.mxu0 %v3030_v16  ;;  %3109 = vmatpush2.bf16.msra.mxu1 %v3036_v17  ;;  %v8862_v16 = vld [vmem:[%s12084_s1 + $0xc48] ss:$16 sps:$4 sm:$0x1f]  }
 0x158   :  { %3069 = vmatprep.subr.bf16.mxu0 %v8801_v18  ;;  %3110 = vmatprep.subr.bf16.mxu1 %v8804_v20  ;;  %v3427_v18 = vand.u32 %v8864_v12, %v9551_v41  ;;  %v3418_v20 = vand.u32 %v8859_v15, %v9551_v41  ;;  %v8921_v12 = vld [vmem:[%s12084_s1 + $0xc64] ss:$16 sps:$4 sm:$0xff]   ;;  %v8930_v15 = vld [vmem:[%s12084_s1 + $0xdac] ss:$16 sps:$4 sm:$0x1f]  }
 0x15b   :  { %3070 = vmatpush2.bf16.msra.mxu0 %v8799_v22  ;;  %3111 = vmatpush2.bf16.msra.mxu1 %v8802_v24  ;;  %v3424_v22 = vand.u32 %v8862_v16, %v9551_v41  ;;  %v8867_v24 = vld [vmem:[%s12084_s1 + $0xc24] ss:$16 sps:$4 sm:$0xff]   ;;  %v8919_v16 = vld [vmem:[%s12084_s1 + $0xc60] ss:$16 sps:$4 sm:$0xff]  }
 0x15c   :  { %3071 = vmatprep.subr.bf16.mxu0 %v8807_v25  ;;  %3112 = vmatprep.subr.bf16.mxu1 %v8810_v26  ;;  %v8870_v25 = vld [vmem:[%s12084_s1 + $0xc2c] ss:$16 sps:$4 sm:$0xff]   ;;  %v8865_v26 = vld [vmem:[%s12084_s1 + $0xc20] ss:$16 sps:$4 sm:$0xff]  }
 0x15f   :  { %3072 = vmatpush2.bf16.msra.mxu0 %v8805_v29  ;;  %3113 = vmatpush2.bf16.msra.mxu1 %v8808_v19  ;;  %v8868_v29 = vld [vmem:[%s12084_s1 + $0xc28] ss:$16 sps:$4 sm:$0xff]   ;;  %v8873_v19 = vld [vmem:[%s12084_s1 + $0xc04] ss:$16 sps:$4 sm:$0xff]  }
 0x160   :  { %3429 = vmatprep.subr.bf16.mxu0 %v8813_v28  ;;  %3470 = vmatprep.subr.bf16.mxu1 %v8816_v30  ;;  %v8876_v28 = vld [vmem:[%s12084_s1 + $0xc0c] ss:$16 sps:$4 sm:$0xff]   ;;  %v10815_v30 = vld.sshfl [vmem:[%s12083_s0 + $0x12] sm:$0x11 pattern:$0x75316420] }
 0x162   :  { %3074 = vmatmul.mubr.bf16.vlgmr.msra.gmra.mxu0 %v2801_v21  ;;  %3115 = vmatmul.mubr.bf16.vlgmr.msra.gmra.mxu1 %v2801_v21  ;;  %v8874_v21 = vld [vmem:[%s12084_s1 + $0xc08] ss:$16 sps:$4 sm:$0xff]  }
 0x163   :  { %3430 = vmatpush1.bf16.msra.mxu0 %v8811_v32  ;;  %3471 = vmatpush1.bf16.msra.mxu1 %v8814_v33  ;;  %v8879_v32 = vld [vmem:[%s12084_s1 + $0xd44] ss:$16 sps:$4 sm:$0xff]   ;;  %v8882_v33 = vld [vmem:[%s12084_s1 + $0xd4c] ss:$16 sps:$4 sm:$0xff]  }
 0x164   :  { %3431 = vmatprep.subr.bf16.mxu0 %v8819_v34  ;;  %3472 = vmatprep.subr.bf16.mxu1 %v8822_v23  ;;  %v3570_v34 = vcombine.high %v10815_v30, %v10815_v30  ;;  %v3189_v23 = vrot.slane %v10655_v27, %v9562_v46  ;;  %v8888_v27 = vld [vmem:[%s12084_s1 + $0xd2c] ss:$16 sps:$4 sm:$0xff]  }
 0x165   :  { %7517 = vmatprep.mubr.msk.bf16.mxu0 %vm360_vm2, %v3196_v37  ;;  %7518 = vmatprep.mubr.msk.bf16.mxu1 %vm360_vm2, %v3196_v37  ;;  %v8885_v37 = vld [vmem:[%s12084_s1 + $0xd24] ss:$16 sps:$4 sm:$0xff]  }
 0x167   :  { %3432 = vmatpush1.bf16.msra.mxu0 %v8817_v35  ;;  %3473 = vmatpush1.bf16.msra.mxu1 %v8820_v36  ;;  %v8877_v35 = vld [vmem:[%s12084_s1 + $0xd40] ss:$16 sps:$4 sm:$0xff]   ;;  %v8880_v36 = vld [vmem:[%s12084_s1 + $0xd48] ss:$16 sps:$4 sm:$0xff]  }
 0x168   :  { %3433 = vmatprep.subr.bf16.mxu0 %v8825_v39  ;;  %3474 = vmatprep.subr.bf16.mxu1 %v8828_v40  ;;  %v8883_v39 = vld [vmem:[%s12084_s1 + $0xd20] ss:$16 sps:$4 sm:$0xff]   ;;  %v8886_v40 = vld [vmem:[%s12084_s1 + $0xd28] ss:$16 sps:$4 sm:$0xff]  }
 0x16b   :  { %3434 = vmatpush1.bf16.msra.mxu0 %v8823_v42  ;;  %3475 = vmatpush1.bf16.msra.mxu1 %v8826_v43  ;;  %v3584_v42 = vrot.slane %v3570_v34, %v9562_v46  ;;  %v8891_v43 = vld [vmem:[%s12084_s1 + $0xd04] ss:$16 sps:$4 sm:$0xff]   ;;  %v8937_v34 = vld [vmem:[%s12084_s1 + $0xd60] ss:$16 sps:$4 sm:$0xff]  }
 0x16c   :  { %3435 = vmatprep.subr.bf16.mxu0 %v8831_v44  ;;  %3476 = vmatprep.subr.bf16.mxu1 %v8834_v45  ;;  %v8894_v44 = vld [vmem:[%s12084_s1 + $0xd0c] ss:$16 sps:$4 sm:$0xff]   ;;  %v8889_v45 = vld [vmem:[%s12084_s1 + $0xd00] ss:$16 sps:$4 sm:$0xff]  }
 0x16f   :  { %3436 = vmatpush1.bf16.msra.mxu0 %v8829_v47  ;;  %3477 = vmatpush1.bf16.msra.mxu1 %v8832_v48  ;;  %v8892_v47 = vld [vmem:[%s12084_s1 + $0xd08] ss:$16 sps:$4 sm:$0xff]   ;;  %v8897_v48 = vld [vmem:[%s12084_s1 + $0xce4] ss:$16 sps:$4 sm:$0xff]  }
 0x170   :  { %3437 = vmatprep.subr.bf16.mxu0 %v8837_v49  ;;  %3478 = vmatprep.subr.bf16.mxu1 %v8840_v52  ;;  %v8900_v49 = vld [vmem:[%s12084_s1 + $0xcec] ss:$16 sps:$4 sm:$0xff]   ;;  %v8895_v52 = vld [vmem:[%s12084_s1 + $0xce0] ss:$16 sps:$4 sm:$0xff]  }
 0x172   :  { %v1523_v1 = vpop.f32.mrf.mxu0  ;;  %v1564_v2 = vpop.f32.mrf.mxu1 }
 0x173   :  { %v10743_v3 = vadd.f32 %v1523_v1, %v10583_v62  ;;  %v10746_v54 = vadd.f32 %v1564_v2, %v10586_v63  ;;  %3438 = vmatpush1.bf16.msra.mxu0 %v8835_v53  ;;  %3479 = vmatpush1.bf16.msra.mxu1 %v8838_v56  ;;  %v8898_v53 = vld [vmem:[%s12084_s1 + $0xce8] ss:$16 sps:$4 sm:$0xff]   ;;  %v8903_v56 = vld [vmem:[%s12084_s1 + $0xcc4] ss:$16 sps:$4 sm:$0xff]   ;;  %v8912_v1 = vld [vmem:[%s12084_s1 + $0xcac] ss:$16 sps:$4 sm:$0xff]  }
 0x174   :  { %v1525_v55 = vpop.f32.mrf.mxu0  ;;  %v1566_v4 = vpop.f32.mrf.mxu1  ;;  %3439 = vmatprep.subr.bf16.mxu0 %v8843_v59  ;;  %3480 = vmatprep.subr.bf16.mxu1 %v8846_v60  ;;  %v8906_v59 = vld [vmem:[%s12084_s1 + $0xccc] ss:$16 sps:$4 sm:$0xff]   ;;  %v8901_v60 = vld [vmem:[%s12084_s1 + $0xcc0] ss:$16 sps:$4 sm:$0xff]  }
 0x175   :  { %v10755_v62 = vadd.f32 %v1525_v55, %v10595_v57  ;;  %v10758_v63 = vadd.f32 %v1566_v4, %v10598_v58  ;;  %v8861_v57 = vld [vmem:[%s12084_s1 + $0xc44] ss:$16 sps:$4 sm:$0x1f]   ;;  %v8907_v2 = vld [vmem:[%s12084_s1 + $0xca0] ss:$16 sps:$4 sm:$0xff]  }
 0x176   :  { %v1527_v7 = vpop.f32.mrf.mxu0  ;;  %v1568_v8 = vpop.f32.mrf.mxu1  ;;  %v3421_v17 = vand.u32 %v8861_v57, %v9551_v41  ;;  %v8910_v55 = vld [vmem:[%s12084_s1 + $0xca8] ss:$16 sps:$4 sm:$0xff]   ;;  %v8913_v57 = vld [vmem:[%s12084_s1 + $0xc80] ss:$16 sps:$4 sm:$0xff]  }
 0x177   :  { %3440 = vmatpush1.bf16.msra.mxu0 %v8841_v61  ;;  %3481 = vmatpush1.bf16.msra.mxu1 %v8844_v0  ;;  %v8904_v61 = vld [vmem:[%s12084_s1 + $0xcc8] ss:$16 sps:$4 sm:$0xff]   ;;  %v8909_v0 = vld [vmem:[%s12084_s1 + $0xca4] ss:$16 sps:$4 sm:$0xff]  }
 0x178   :  { %v1528_v58 = vpop.f32.mrf.mxu0  ;;  %v1569_v10 = vpop.f32.mrf.mxu1  ;;  %3441 = vmatprep.subr.bf16.mxu0 %v8849_v5  ;;  %3482 = vmatprep.subr.bf16.mxu1 %v8852_v6  ;;  %v8915_v8 = vld [vmem:[%s12084_s1 + $0xc84] ss:$16 sps:$4 sm:$0xff]  }
 0x179   :  { %v8916_v58 = vld [vmem:[%s12084_s1 + $0xc88] ss:$16 sps:$4 sm:$0xff]  }
 0x17b   :  { %3442 = vmatpush1.bf16.msra.mxu0 %v8847_v50  ;;  %3483 = vmatpush1.bf16.msra.mxu1 %v8850_v51 }
 0x17c   :  { %3443 = vmatprep.subr.bf16.mxu0 %v8855_v9  ;;  %3484 = vmatprep.subr.bf16.mxu1 %v8858_v11  ;;  %v8918_v9 = vld [vmem:[%s12084_s1 + $0xc8c] ss:$16 sps:$4 sm:$0xff]  }
 0x17f   :  { %3444 = vmatpush1.bf16.msra.mxu0 %v8853_v13  ;;  %3485 = vmatpush1.bf16.msra.mxu1 %v8856_v14  ;;  %v8924_v14 = vld [vmem:[%s12084_s1 + $0xc6c] ss:$16 sps:$4 sm:$0xff]  }
 0x180   :  { %3455 = vmatprep.subr.bf16.mxu0 %v3421_v17  ;;  %3496 = vmatprep.subr.bf16.mxu1 %v3427_v18  ;;  %v8922_v17 = vld [vmem:[%s12084_s1 + $0xc68] ss:$16 sps:$4 sm:$0xff]   ;;  %v8925_v18 = vld [vmem:[%s12084_s1 + $0xda0] ss:$16 sps:$4 sm:$0x1f]  }
 0x183   :  { %3456 = vmatpush2.bf16.msra.mxu0 %v3418_v20  ;;  %3497 = vmatpush2.bf16.msra.mxu1 %v3424_v22  ;;  %v8928_v20 = vld [vmem:[%s12084_s1 + $0xda8] ss:$16 sps:$4 sm:$0x1f]  }
 0x184   :  { %3457 = vmatprep.subr.bf16.mxu0 %v8867_v24  ;;  %3498 = vmatprep.subr.bf16.mxu1 %v8870_v25  ;;  %v3815_v24 = vand.u32 %v8930_v15, %v9551_v41  ;;  %v3806_v25 = vand.u32 %v8925_v18, %v9551_v41  ;;  %v8987_v15 = vld [vmem:[%s12084_s1 + $0xdc4] ss:$16 sps:$4 sm:$0xff]   ;;  %v8996_v18 = vld [vmem:[%s12084_s1 + $0xf0c] ss:$16 sps:$4 sm:$0x1f]  }
 0x187   :  { %3458 = vmatpush2.bf16.msra.mxu0 %v8865_v26  ;;  %3499 = vmatpush2.bf16.msra.mxu1 %v8868_v29  ;;  %v3812_v26 = vand.u32 %v8928_v20, %v9551_v41  ;;  %v8933_v29 = vld [vmem:[%s12084_s1 + $0xd84] ss:$16 sps:$4 sm:$0xff]   ;;  %v8985_v20 = vld [vmem:[%s12084_s1 + $0xdc0] ss:$16 sps:$4 sm:$0xff]  }
 0x188   :  { %3459 = vmatprep.subr.bf16.mxu0 %v8873_v19  ;;  %3500 = vmatprep.subr.bf16.mxu1 %v8876_v28  ;;  %v8936_v19 = vld [vmem:[%s12084_s1 + $0xd8c] ss:$16 sps:$4 sm:$0xff]   ;;  %v8931_v28 = vld [vmem:[%s12084_s1 + $0xd80] ss:$16 sps:$4 sm:$0xff]  }
 0x18b   :  { %3460 = vmatpush2.bf16.msra.mxu0 %v8871_v31  ;;  %3501 = vmatpush2.bf16.msra.mxu1 %v8874_v21  ;;  %v8934_v31 = vld [vmem:[%s12084_s1 + $0xd88] ss:$16 sps:$4 sm:$0xff]   ;;  %v8939_v21 = vld [vmem:[%s12084_s1 + $0xd64] ss:$16 sps:$4 sm:$0xff]  }
 0x18c   :  { %3817 = vmatprep.subr.bf16.mxu0 %v8879_v32  ;;  %3858 = vmatprep.subr.bf16.mxu1 %v8882_v33  ;;  %v8942_v32 = vld [vmem:[%s12084_s1 + $0xd6c] ss:$16 sps:$4 sm:$0xff]   ;;  %v10975_v33 = vld.sshfl [vmem:[%s12083_s0 + $0x14] sm:$0x11 pattern:$0x75316420] }
 0x18e   :  { %3462 = vmatmul.mubr.bf16.vlgmr.msra.gmra.mxu0 %v3189_v23  ;;  %3503 = vmatmul.mubr.bf16.vlgmr.msra.gmra.mxu1 %v3189_v23  ;;  %v8940_v23 = vld [vmem:[%s12084_s1 + $0xd68] ss:$16 sps:$4 sm:$0xff]  }
 0x18f   :  { %3818 = vmatpush1.bf16.msra.mxu0 %v8877_v35  ;;  %3859 = vmatpush1.bf16.msra.mxu1 %v8880_v36  ;;  %v8945_v35 = vld [vmem:[%s12084_s1 + $0xea4] ss:$16 sps:$4 sm:$0xff]   ;;  %v8948_v36 = vld [vmem:[%s12084_s1 + $0xeac] ss:$16 sps:$4 sm:$0xff]  }
 0x190   :  { %3819 = vmatprep.subr.bf16.mxu0 %v8885_v37  ;;  %3860 = vmatprep.subr.bf16.mxu1 %v8888_v27  ;;  %v3958_v37 = vcombine.high %v10975_v33, %v10975_v33  ;;  %v3577_v27 = vrot.slane %v10815_v30, %v9562_v46  ;;  %v8954_v30 = vld [vmem:[%s12084_s1 + $0xe8c] ss:$16 sps:$4 sm:$0xff]  }
 0x191   :  { %7609 = vmatprep.mubr.msk.bf16.mxu0 %vm360_vm2, %v3584_v42  ;;  %7610 = vmatprep.mubr.msk.bf16.mxu1 %vm360_vm2, %v3584_v42  ;;  %v8951_v42 = vld [vmem:[%s12084_s1 + $0xe84] ss:$16 sps:$4 sm:$0xff]  }
 0x193   :  { %3820 = vmatpush1.bf16.msra.mxu0 %v8883_v39  ;;  %3861 = vmatpush1.bf16.msra.mxu1 %v8886_v40  ;;  %v8943_v39 = vld [vmem:[%s12084_s1 + $0xea0] ss:$16 sps:$4 sm:$0xff]   ;;  %v8946_v40 = vld [vmem:[%s12084_s1 + $0xea8] ss:$16 sps:$4 sm:$0xff]  }
 0x194   :  { %3821 = vmatprep.subr.bf16.mxu0 %v8891_v43  ;;  %3862 = vmatprep.subr.bf16.mxu1 %v8894_v44  ;;  %v8949_v43 = vld [vmem:[%s12084_s1 + $0xe80] ss:$16 sps:$4 sm:$0xff]   ;;  %v8952_v44 = vld [vmem:[%s12084_s1 + $0xe88] ss:$16 sps:$4 sm:$0xff]  }
 0x197   :  { %3822 = vmatpush1.bf16.msra.mxu0 %v8889_v45  ;;  %3863 = vmatpush1.bf16.msra.mxu1 %v8892_v47  ;;  %v3972_v45 = vrot.slane %v3958_v37, %v9562_v46  ;;  %v8957_v47 = vld [vmem:[%s12084_s1 + $0xe64] ss:$16 sps:$4 sm:$0xff]  }
 0x198   :  { %3823 = vmatprep.subr.bf16.mxu0 %v8897_v48  ;;  %3864 = vmatprep.subr.bf16.mxu1 %v8900_v49  ;;  %v8960_v48 = vld [vmem:[%s12084_s1 + $0xe6c] ss:$16 sps:$4 sm:$0xff]   ;;  %v8955_v49 = vld [vmem:[%s12084_s1 + $0xe60] ss:$16 sps:$4 sm:$0xff]  }
 0x19b   :  { %3824 = vmatpush1.bf16.msra.mxu0 %v8895_v52  ;;  %3865 = vmatpush1.bf16.msra.mxu1 %v8898_v53  ;;  %v8958_v52 = vld [vmem:[%s12084_s1 + $0xe68] ss:$16 sps:$4 sm:$0xff]   ;;  %v8963_v53 = vld [vmem:[%s12084_s1 + $0xe44] ss:$16 sps:$4 sm:$0xff]  }
 0x19c   :  { %3825 = vmatprep.subr.bf16.mxu0 %v8903_v56  ;;  %3866 = vmatprep.subr.bf16.mxu1 %v8906_v59  ;;  %v8966_v56 = vld [vmem:[%s12084_s1 + $0xe4c] ss:$16 sps:$4 sm:$0xff]   ;;  %v8961_v59 = vld [vmem:[%s12084_s1 + $0xe40] ss:$16 sps:$4 sm:$0xff]  }
 0x19e   :  { %v1911_v4 = vpop.f32.mrf.mxu0  ;;  %v1952_v5 = vpop.f32.mrf.mxu1 }
 0x19f   :  { %v10903_v6 = vadd.f32 %v1911_v4, %v10743_v3  ;;  %v10906_v50 = vadd.f32 %v1952_v5, %v10746_v54  ;;  %3826 = vmatpush1.bf16.msra.mxu0 %v8901_v60  ;;  %3867 = vmatpush1.bf16.msra.mxu1 %v8904_v61  ;;  %v8964_v60 = vld [vmem:[%s12084_s1 + $0xe48] ss:$16 sps:$4 sm:$0xff]   ;;  %v8969_v61 = vld [vmem:[%s12084_s1 + $0xe24] ss:$16 sps:$4 sm:$0xff]   ;;  %v8978_v4 = vld [vmem:[%s12084_s1 + $0xe0c] ss:$16 sps:$4 sm:$0xff]  }
 0x1a0   :  { %v1913_v51 = vpop.f32.mrf.mxu0  ;;  %v1954_v7 = vpop.f32.mrf.mxu1  ;;  %3827 = vmatprep.subr.bf16.mxu0 %v8909_v0  ;;  %3868 = vmatprep.subr.bf16.mxu1 %v8912_v1  ;;  %v8972_v0 = vld [vmem:[%s12084_s1 + $0xe2c] ss:$16 sps:$4 sm:$0xff]   ;;  %v8967_v1 = vld [vmem:[%s12084_s1 + $0xe20] ss:$16 sps:$4 sm:$0xff]  }
 0x1a1   :  { %v10915_v3 = vadd.f32 %v1913_v51, %v10755_v62  ;;  %v10918_v54 = vadd.f32 %v1954_v7, %v10758_v63  ;;  %v8927_v62 = vld [vmem:[%s12084_s1 + $0xda4] ss:$16 sps:$4 sm:$0x1f]   ;;  %v8973_v5 = vld [vmem:[%s12084_s1 + $0xe00] ss:$16 sps:$4 sm:$0xff]  }
 0x1a2   :  { %v1915_v10 = vpop.f32.mrf.mxu0  ;;  %v1956_v11 = vpop.f32.mrf.mxu1  ;;  %v3809_v22 = vand.u32 %v8927_v62, %v9551_v41  ;;  %v8976_v51 = vld [vmem:[%s12084_s1 + $0xe08] ss:$16 sps:$4 sm:$0xff]   ;;  %v8979_v62 = vld [vmem:[%s12084_s1 + $0xde0] ss:$16 sps:$4 sm:$0xff]  }
 0x1a3   :  { %3828 = vmatpush1.bf16.msra.mxu0 %v8907_v2  ;;  %3869 = vmatpush1.bf16.msra.mxu1 %v8910_v55  ;;  %v8970_v2 = vld [vmem:[%s12084_s1 + $0xe28] ss:$16 sps:$4 sm:$0xff]   ;;  %v8975_v55 = vld [vmem:[%s12084_s1 + $0xe04] ss:$16 sps:$4 sm:$0xff]  }
 0x1a4   :  { %v1916_v63 = vpop.f32.mrf.mxu0  ;;  %v1957_v13 = vpop.f32.mrf.mxu1  ;;  %3829 = vmatprep.subr.bf16.mxu0 %v8915_v8  ;;  %3870 = vmatprep.subr.bf16.mxu1 %v8918_v9  ;;  %v8981_v11 = vld [vmem:[%s12084_s1 + $0xde4] ss:$16 sps:$4 sm:$0xff]  }
 0x1a5   :  { %v8982_v63 = vld [vmem:[%s12084_s1 + $0xde8] ss:$16 sps:$4 sm:$0xff]  }
 0x1a7   :  { %3830 = vmatpush1.bf16.msra.mxu0 %v8913_v57  ;;  %3871 = vmatpush1.bf16.msra.mxu1 %v8916_v58 }
 0x1a8   :  { %3831 = vmatprep.subr.bf16.mxu0 %v8921_v12  ;;  %3872 = vmatprep.subr.bf16.mxu1 %v8924_v14  ;;  %v8984_v12 = vld [vmem:[%s12084_s1 + $0xdec] ss:$16 sps:$4 sm:$0xff]  }
 0x1ab   :  { %3832 = vmatpush1.bf16.msra.mxu0 %v8919_v16  ;;  %3873 = vmatpush1.bf16.msra.mxu1 %v8922_v17 }
 0x1ac   :  { %3843 = vmatprep.subr.bf16.mxu0 %v3809_v22  ;;  %3884 = vmatprep.subr.bf16.mxu1 %v3815_v24  ;;  %v8988_v22 = vld [vmem:[%s12084_s1 + $0xdc8] ss:$16 sps:$4 sm:$0xff]   ;;  %v8991_v24 = vld [vmem:[%s12084_s1 + $0xf00] ss:$16 sps:$4 sm:$0x1f]  }
 0x1af   :  { %3844 = vmatpush2.bf16.msra.mxu0 %v3806_v25  ;;  %3885 = vmatpush2.bf16.msra.mxu1 %v3812_v26  ;;  %v8994_v25 = vld [vmem:[%s12084_s1 + $0xf08] ss:$16 sps:$4 sm:$0x1f]  }
 0x1b0   :  { %3845 = vmatprep.subr.bf16.mxu0 %v8933_v29  ;;  %3886 = vmatprep.subr.bf16.mxu1 %v8936_v19  ;;  %v4203_v29 = vand.u32 %v8996_v18, %v9551_v41 }
 0x1b3   :  { %3846 = vmatpush2.bf16.msra.mxu0 %v8931_v28  ;;  %3887 = vmatpush2.bf16.msra.mxu1 %v8934_v31 }
 0x1b4   :  { %3847 = vmatprep.subr.bf16.mxu0 %v8939_v21  ;;  %3888 = vmatprep.subr.bf16.mxu1 %v8942_v32 }
 0x1b7   :  { %3848 = vmatpush2.bf16.msra.mxu0 %v8937_v34  ;;  %3889 = vmatpush2.bf16.msra.mxu1 %v8940_v23 }
 0x1b8   :  { %4205 = vmatprep.subr.bf16.mxu0 %v8945_v35  ;;  %4246 = vmatprep.subr.bf16.mxu1 %v8948_v36 }
 0x1ba   :  { %3850 = vmatmul.mubr.bf16.vlgmr.msra.gmra.mxu0 %v3577_v27  ;;  %3891 = vmatmul.mubr.bf16.vlgmr.msra.gmra.mxu1 %v3577_v27 }
 0x1bb   :  { %4206 = vmatpush1.bf16.msra.mxu0 %v8943_v39  ;;  %4247 = vmatpush1.bf16.msra.mxu1 %v8946_v40 }
 0x1bc   :  { %4207 = vmatprep.subr.bf16.mxu0 %v8951_v42  ;;  %4248 = vmatprep.subr.bf16.mxu1 %v8954_v30 }
 0x1bd   :  { %7701 = vmatprep.mubr.msk.bf16.mxu0 %vm360_vm2, %v3972_v45  ;;  %7702 = vmatprep.mubr.msk.bf16.mxu1 %vm360_vm2, %v3972_v45 }
 0x1bf   :  { %4208 = vmatpush1.bf16.msra.mxu0 %v8949_v43  ;;  %4249 = vmatpush1.bf16.msra.mxu1 %v8952_v44 }
 0x1c0   :  { %4209 = vmatprep.subr.bf16.mxu0 %v8957_v47  ;;  %4250 = vmatprep.subr.bf16.mxu1 %v8960_v48 }
 0x1c3   :  { %4210 = vmatpush1.bf16.msra.mxu0 %v8955_v49  ;;  %4251 = vmatpush1.bf16.msra.mxu1 %v8958_v52 }
 0x1c4   :  { %4211 = vmatprep.subr.bf16.mxu0 %v8963_v53  ;;  %4252 = vmatprep.subr.bf16.mxu1 %v8966_v56 }
 0x1c7   :  { %4212 = vmatpush1.bf16.msra.mxu0 %v8961_v59  ;;  %4253 = vmatpush1.bf16.msra.mxu1 %v8964_v60 }
 0x1c8   :  { %4213 = vmatprep.subr.bf16.mxu0 %v8969_v61  ;;  %4254 = vmatprep.subr.bf16.mxu1 %v8972_v0 }
 0x1ca   :  { %v2299_v7 = vpop.f32.mrf.mxu0  ;;  %v2340_v8 = vpop.f32.mrf.mxu1 }
 0x1cb   :  { %v11063_v9 = vadd.f32 %v2299_v7, %v10903_v6  ;;  %v11066_v57 = vadd.f32 %v2340_v8, %v10906_v50  ;;  %4214 = vmatpush1.bf16.msra.mxu0 %v8967_v1  ;;  %4255 = vmatpush1.bf16.msra.mxu1 %v8970_v2 }
 0x1cc   :  { %v2301_v58 = vpop.f32.mrf.mxu0  ;;  %v2342_v10 = vpop.f32.mrf.mxu1  ;;  %4215 = vmatprep.subr.bf16.mxu0 %v8975_v55  ;;  %4256 = vmatprep.subr.bf16.mxu1 %v8978_v4 }
 0x1cd   :  { %v11075_v6 = vadd.f32 %v2301_v58, %v10915_v3  ;;  %v11078_v50 = vadd.f32 %v2342_v10, %v10918_v54  ;;  %v8990_v3 = vld [vmem:[%s12084_s1 + $0xdcc] ss:$16 sps:$4 sm:$0xff]   ;;  %v8993_v54 = vld [vmem:[%s12084_s1 + $0xf04] ss:$16 sps:$4 sm:$0x1f]  }
 0x1ce   :  { %v2303_v13 = vpop.f32.mrf.mxu0  ;;  %v2344_v14 = vpop.f32.mrf.mxu1  ;;  %v4197_v26 = vand.u32 %v8993_v54, %v9551_v41 }
 0x1cf   :  { %4216 = vmatpush1.bf16.msra.mxu0 %v8973_v5  ;;  %4257 = vmatpush1.bf16.msra.mxu1 %v8976_v51 }
 0x1d0   :  { %v2304_v16 = vpop.f32.mrf.mxu0  ;;  %v2345_v17 = vpop.f32.mrf.mxu1  ;;  %4217 = vmatprep.subr.bf16.mxu0 %v8981_v11  ;;  %4258 = vmatprep.subr.bf16.mxu1 %v8984_v12 }
 0x1d3   :  { %4218 = vmatpush1.bf16.msra.mxu0 %v8979_v62  ;;  %4259 = vmatpush1.bf16.msra.mxu1 %v8982_v63 }
 0x1d4   :  { %4219 = vmatprep.subr.bf16.mxu0 %v8987_v15  ;;  %4260 = vmatprep.subr.bf16.mxu1 %v8990_v3 }
 0x1d5   :  { %12 = vsyncpa [#allocation3], 0  ;;  %v4194_v19 = vand.u32 %v8991_v24, %v9551_v41  ;;  %v4200_v28 = vand.u32 %v8994_v25, %v9551_v41  ;;  %v8999_v31 = vld [vmem:[%s12084_s1 + $0xee4] ss:$16 sps:$4 sm:$0xff]   ;;  %v9002_v21 = vld [vmem:[%s12084_s1 + $0xeec] ss:$16 sps:$4 sm:$0xff]   ;;  %v3965_v30 = vrot.slane %v10975_v33, %v9562_v46 }
 0x1d6   :  { %v8997_v32 = vld [vmem:[%s12084_s1 + $0xee0] ss:$16 sps:$4 sm:$0xff]   ;;  %v9000_v34 = vld [vmem:[%s12084_s1 + $0xee8] ss:$16 sps:$4 sm:$0xff]   ;;  %v9005_v23 = vld [vmem:[%s12084_s1 + $0xec4] ss:$16 sps:$4 sm:$0xff]  }
 0x1d7   :  { %4220 = vmatpush1.bf16.msra.mxu0 %v8985_v20  ;;  %4261 = vmatpush1.bf16.msra.mxu1 %v8988_v22  ;;  %v9008_v35 = vld [vmem:[%s12084_s1 + $0xecc] ss:$16 sps:$4 sm:$0xff]   ;;  %v11135_v36 = vld.sshfl [vmem:[%s12083_s0 + $0x16] sm:$0x11 pattern:$0x75316420] }
 0x1d8   :  { %4231 = vmatprep.subr.bf16.mxu0 %v4197_v26  ;;  %4272 = vmatprep.subr.bf16.mxu1 %v4203_v29  ;;  %v9003_v37 = vld [vmem:[%s12084_s1 + $0xec0] ss:$16 sps:$4 sm:$0xff]   ;;  %v9006_v27 = vld [vmem:[%s12084_s1 + $0xec8] ss:$16 sps:$4 sm:$0xff]   ;;  %v9011_v39 = vld [vmem:[%s12084_s1 + $0x1004] ss:$16 sps:$4 sm:$0xff]   ;;  %v4346_v42 = vcombine.high %v11135_v36, %v11135_v36 }
 0x1d9   :  { %v9014_v40 = vld [vmem:[%s12084_s1 + $0x100c] ss:$16 sps:$4 sm:$0xff]   ;;  %v9009_v43 = vld [vmem:[%s12084_s1 + $0x1000] ss:$16 sps:$4 sm:$0xff]   ;;  %v9012_v44 = vld [vmem:[%s12084_s1 + $0x1008] ss:$16 sps:$4 sm:$0xff]  }
 0x1da   :  { %v9017_v45 = vld [vmem:[%s12084_s1 + $0xfe4] ss:$16 sps:$4 sm:$0xff]   ;;  %v9020_v33 = vld [vmem:[%s12084_s1 + $0xfec] ss:$16 sps:$4 sm:$0xff]   ;;  %v4360_v47 = vrot.slane %v4346_v42, %v9562_v46  ;;  %v9015_v48 = vld [vmem:[%s12084_s1 + $0xfe0] ss:$16 sps:$4 sm:$0xff]  }
 0x1db   :  { %4232 = vmatpush2.bf16.msra.mxu0 %v4194_v19  ;;  %4273 = vmatpush2.bf16.msra.mxu1 %v4200_v28  ;;  %v9018_v49 = vld [vmem:[%s12084_s1 + $0xfe8] ss:$16 sps:$4 sm:$0xff]   ;;  %v9023_v52 = vld [vmem:[%s12084_s1 + $0xfc4] ss:$16 sps:$4 sm:$0xff]   ;;  %v9026_v53 = vld [vmem:[%s12084_s1 + $0xfcc] ss:$16 sps:$4 sm:$0xff]  }
 0x1dc   :  { %4233 = vmatprep.subr.bf16.mxu0 %v8999_v31  ;;  %4274 = vmatprep.subr.bf16.mxu1 %v9002_v21  ;;  %v9021_v56 = vld [vmem:[%s12084_s1 + $0xfc0] ss:$16 sps:$4 sm:$0xff]   ;;  %v9024_v59 = vld [vmem:[%s12084_s1 + $0xfc8] ss:$16 sps:$4 sm:$0xff]   ;;  %v9029_v60 = vld [vmem:[%s12084_s1 + $0xfa4] ss:$16 sps:$4 sm:$0xff]  }
 0x1dd   :  { %v9032_v61 = vld [vmem:[%s12084_s1 + $0xfac] ss:$16 sps:$4 sm:$0xff]   ;;  %v9027_v0 = vld [vmem:[%s12084_s1 + $0xfa0] ss:$16 sps:$4 sm:$0xff]   ;;  %v9030_v1 = vld [vmem:[%s12084_s1 + $0xfa8] ss:$16 sps:$4 sm:$0xff]  }
 0x1de   :  { %v9035_v2 = vld [vmem:[%s12084_s1 + $0xf84] ss:$16 sps:$4 sm:$0xff]   ;;  %v9038_v55 = vld [vmem:[%s12084_s1 + $0xf8c] ss:$16 sps:$4 sm:$0xff]   ;;  %v9033_v4 = vld [vmem:[%s12084_s1 + $0xf80] ss:$16 sps:$4 sm:$0xff]  }
 0x1df   :  { %4234 = vmatpush2.bf16.msra.mxu0 %v8997_v32  ;;  %4275 = vmatpush2.bf16.msra.mxu1 %v9000_v34  ;;  %v9036_v5 = vld [vmem:[%s12084_s1 + $0xf88] ss:$16 sps:$4 sm:$0xff]   ;;  %v9041_v51 = vld [vmem:[%s12084_s1 + $0xf64] ss:$16 sps:$4 sm:$0xff]   ;;  %v9044_v7 = vld [vmem:[%s12084_s1 + $0xf6c] ss:$16 sps:$4 sm:$0xff]  }
 0x1e0   :  { %4235 = vmatprep.subr.bf16.mxu0 %v9005_v23  ;;  %4276 = vmatprep.subr.bf16.mxu1 %v9008_v35  ;;  %v9039_v12 = vld [vmem:[%s12084_s1 + $0xf60] ss:$16 sps:$4 sm:$0xff]   ;;  %v9042_v62 = vld [vmem:[%s12084_s1 + $0xf68] ss:$16 sps:$4 sm:$0xff]   ;;  %v9065_v34 = vld [vmem:[%s12084_s1 + $0x1044] ss:$16 sps:$4 sm:$0xff]  }
 0x1e1   :  { %v9045_v16 = vld [vmem:[%s12084_s1 + $0xf40] ss:$16 sps:$4 sm:$0xff]   ;;  %v9048_v17 = vld [vmem:[%s12084_s1 + $0xf48] ss:$16 sps:$4 sm:$0xff]   ;;  %v9068_v23 = vld [vmem:[%s12084_s1 + $0x104c] ss:$16 sps:$4 sm:$0xff]  }
 0x1e2   :  { %v9059_v22 = vld [vmem:[%s12084_s1 + $0x1064] ss:$16 sps:$4 sm:$0x1f]   ;;  %v9062_v24 = vld [vmem:[%s12084_s1 + $0x106c] ss:$16 sps:$4 sm:$0x1f]  }
 0x1e3   :  { %4236 = vmatpush2.bf16.msra.mxu0 %v9003_v37  ;;  %4277 = vmatpush2.bf16.msra.mxu1 %v9006_v27  ;;  %v9051_v25 = vld [vmem:[%s12084_s1 + $0xf20] ss:$16 sps:$4 sm:$0xff]   ;;  %v9054_v26 = vld [vmem:[%s12084_s1 + $0xf28] ss:$16 sps:$4 sm:$0xff]   ;;  %v4585_v28 = vand.u32 %v9059_v22, %v9551_v41  ;;  %v4591_v31 = vand.u32 %v9062_v24, %v9551_v41  ;;  %v9071_v27 = vld [vmem:[%s12084_s1 + $0x1024] ss:$16 sps:$4 sm:$0xff]  }
 0x1e4   :  { %4593 = vmatprep.subr.bf16.mxu0 %v9011_v39  ;;  %4634 = vmatprep.subr.bf16.mxu1 %v9014_v40  ;;  %v9057_v29 = vld [vmem:[%s12084_s1 + $0x1060] ss:$16 sps:$4 sm:$0x1f]   ;;  %v9060_v19 = vld [vmem:[%s12084_s1 + $0x1068] ss:$16 sps:$4 sm:$0x1f]  }
 0x1e5   :  { %v4582_v21 = vand.u32 %v9057_v29, %v9551_v41  ;;  %v4588_v32 = vand.u32 %v9060_v19, %v9551_v41  ;;  %v9063_v35 = vld [vmem:[%s12084_s1 + $0x1040] ss:$16 sps:$4 sm:$0xff]   ;;  %v9066_v37 = vld [vmem:[%s12084_s1 + $0x1048] ss:$16 sps:$4 sm:$0xff]   ;;  %v9074_v39 = vld [vmem:[%s12084_s1 + $0x102c] ss:$16 sps:$4 sm:$0xff]  }
 0x1e6   :  { %4238 = vmatmul.mubr.bf16.vlgmr.msra.gmra.mxu0 %v3965_v30  ;;  %4279 = vmatmul.mubr.bf16.vlgmr.msra.gmra.mxu1 %v3965_v30  ;;  %v11295_v40 = vld.sshfl [vmem:[%s12083_s0 + $0x18] sm:$0x11 pattern:$0x75316420]  ;;  %v9069_v42 = vld [vmem:[%s12084_s1 + $0x1020] ss:$16 sps:$4 sm:$0xff]  }
 0x1e7   :  { %4594 = vmatpush1.bf16.msra.mxu0 %v9009_v43  ;;  %4635 = vmatpush1.bf16.msra.mxu1 %v9012_v44  ;;  %v9072_v30 = vld [vmem:[%s12084_s1 + $0x1028] ss:$16 sps:$4 sm:$0xff]   ;;  %v9077_v43 = vld [vmem:[%s12084_s1 + $0x1164] ss:$16 sps:$4 sm:$0xff]   ;;  %v9080_v44 = vld [vmem:[%s12084_s1 + $0x116c] ss:$16 sps:$4 sm:$0xff]  }
 0x1e8   :  { %4595 = vmatprep.subr.bf16.mxu0 %v9017_v45  ;;  %4636 = vmatprep.subr.bf16.mxu1 %v9020_v33  ;;  %v4734_v45 = vcombine.high %v11295_v40, %v11295_v40  ;;  %v4353_v33 = vrot.slane %v11135_v36, %v9562_v46  ;;  %v9086_v36 = vld [vmem:[%s12084_s1 + $0x114c] ss:$16 sps:$4 sm:$0xff]   ;;  %v9114_v22 = vld [vmem:[%s12084_s1 + $0x10a8] ss:$16 sps:$4 sm:$0xff]   ;;  %v9117_v19 = vld [vmem:[%s12084_s1 + $0x1080] ss:$16 sps:$4 sm:$0xff]  }
 0x1e9   :  { %7793 = vmatprep.mubr.msk.bf16.mxu0 %vm360_vm2, %v4360_v47  ;;  %7794 = vmatprep.mubr.msk.bf16.mxu1 %vm360_vm2, %v4360_v47  ;;  %v9075_v47 = vld [vmem:[%s12084_s1 + $0x1160] ss:$16 sps:$4 sm:$0xff]   ;;  %v9128_v29 = vld [vmem:[%s12084_s1 + $0x11cc] ss:$16 sps:$4 sm:$0x1f]   ;;  %vm9404_vm3 = vmmov 0  }
 0x1ea   :  { %s9405_s18 = smov [#allocation2]  }
 0x1eb   :  { %4596 = vmatpush1.bf16.msra.mxu0 %v9015_v48  ;;  %4637 = vmatpush1.bf16.msra.mxu1 %v9018_v49  ;;  %v9078_v48 = vld [vmem:[%s12084_s1 + $0x1168] ss:$16 sps:$4 sm:$0xff]   ;;  %v9083_v49 = vld [vmem:[%s12084_s1 + $0x1144] ss:$16 sps:$4 sm:$0xff]   ;;  %s6728_s19 = sshll.u32 %s9405_s18, 4  ;;  %s6729_s19 = int_to_ptr.vmem [resolvable:$true] %s6728_s19 }
 0x1ec   :  { %4597 = vmatprep.subr.bf16.mxu0 %v9023_v52  ;;  %4638 = vmatprep.subr.bf16.mxu1 %v9026_v53  ;;  %v4748_v52 = vrot.slane %v4734_v45, %v9562_v46  ;;  %v9081_v53 = vld [vmem:[%s12084_s1 + $0x1140] ss:$16 sps:$4 sm:$0xff]   ;;  %p9384_p1 = scmp.lt.s32.totalorder %s6729_s19, %s6729_s19 }
 0x1ed   :  { %v9135_v45 = vld [vmem:[%s12084_s1 + $0x1180] ss:$16 sps:$4 sm:$0xff]  }
 0x1ef   :  { %4598 = vmatpush1.bf16.msra.mxu0 %v9021_v56  ;;  %4639 = vmatpush1.bf16.msra.mxu1 %v9024_v59  ;;  %v9084_v56 = vld [vmem:[%s12084_s1 + $0x1148] ss:$16 sps:$4 sm:$0xff]   ;;  %v9089_v59 = vld [vmem:[%s12084_s1 + $0x1124] ss:$16 sps:$4 sm:$0xff]  }
 0x1f0   :  { %4599 = vmatprep.subr.bf16.mxu0 %v9029_v60  ;;  %4640 = vmatprep.subr.bf16.mxu1 %v9032_v61  ;;  %v9092_v60 = vld [vmem:[%s12084_s1 + $0x112c] ss:$16 sps:$4 sm:$0xff]   ;;  %v9087_v61 = vld [vmem:[%s12084_s1 + $0x1120] ss:$16 sps:$4 sm:$0xff]  }
 0x1f3   :  { %4600 = vmatpush1.bf16.msra.mxu0 %v9027_v0  ;;  %4641 = vmatpush1.bf16.msra.mxu1 %v9030_v1  ;;  %v9090_v0 = vld [vmem:[%s12084_s1 + $0x1128] ss:$16 sps:$4 sm:$0xff]   ;;  %v9095_v1 = vld [vmem:[%s12084_s1 + $0x1104] ss:$16 sps:$4 sm:$0xff]  }
 0x1f4   :  { %4601 = vmatprep.subr.bf16.mxu0 %v9035_v2  ;;  %4642 = vmatprep.subr.bf16.mxu1 %v9038_v55  ;;  %v9098_v2 = vld [vmem:[%s12084_s1 + $0x110c] ss:$16 sps:$4 sm:$0xff]   ;;  %v9093_v55 = vld [vmem:[%s12084_s1 + $0x1100] ss:$16 sps:$4 sm:$0xff]  }
 0x1f6   :  { %v2687_v8 = vpop.f32.mrf.mxu0  ;;  %v2728_v58 = vpop.f32.mrf.mxu1 }
 0x1f7   :  { %v11217_v10 = vadd.f32 %v2687_v8, %v11063_v9  ;;  %v11220_v11 = vadd.f32 %v2728_v58, %v11066_v57  ;;  %4602 = vmatpush1.bf16.msra.mxu0 %v9033_v4  ;;  %4643 = vmatpush1.bf16.msra.mxu1 %v9036_v5  ;;  %v9047_v9 = vld [vmem:[%s12084_s1 + $0xf44] ss:$16 sps:$4 sm:$0xff]   ;;  %v9050_v57 = vld [vmem:[%s12084_s1 + $0xf4c] ss:$16 sps:$4 sm:$0xff]   ;;  %v9096_v4 = vld [vmem:[%s12084_s1 + $0x1108] ss:$16 sps:$4 sm:$0xff]  }
 0x1f8   :  { %v2689_v63 = vpop.f32.mrf.mxu0  ;;  %v2730_v13 = vpop.f32.mrf.mxu1  ;;  %4603 = vmatprep.subr.bf16.mxu0 %v9041_v51  ;;  %4644 = vmatprep.subr.bf16.mxu1 %v9044_v7  ;;  %v9101_v5 = vld [vmem:[%s12084_s1 + $0x10e4] ss:$16 sps:$4 sm:$0xff]   ;;  %v9104_v51 = vld [vmem:[%s12084_s1 + $0x10ec] ss:$16 sps:$4 sm:$0xff]   ;;  %v9099_v7 = vld [vmem:[%s12084_s1 + $0x10e0] ss:$16 sps:$4 sm:$0xff]  }
 0x1f9   :  { %v11235_v14 = vadd.f32 %v2689_v63, %v11075_v6  ;;  %v11238_v15 = vadd.f32 %v2730_v13, %v11078_v50  ;;  %v9053_v6 = vld [vmem:[%s12084_s1 + $0xf24] ss:$16 sps:$4 sm:$0xff]   ;;  %v9056_v50 = vld [vmem:[%s12084_s1 + $0xf2c] ss:$16 sps:$4 sm:$0xff]   ;;  %v9102_v8 = vld [vmem:[%s12084_s1 + $0x10e8] ss:$16 sps:$4 sm:$0xff]  }
 0x1fa   :  { %v2691_v3 = vpop.f32.mrf.mxu0  ;;  %v2732_v54 = vpop.f32.mrf.mxu1  ;;  %v9107_v58 = vld [vmem:[%s12084_s1 + $0x10c4] ss:$16 sps:$4 sm:$0xff]  }
 0x1fb   :  { %4604 = vmatpush1.bf16.msra.mxu0 %v9039_v12  ;;  %4645 = vmatpush1.bf16.msra.mxu1 %v9042_v62  ;;  %v9110_v12 = vld [vmem:[%s12084_s1 + $0x10cc] ss:$16 sps:$4 sm:$0xff]   ;;  %v9108_v3 = vld [vmem:[%s12084_s1 + $0x10c8] ss:$16 sps:$4 sm:$0xff]  }
 0x1fc   :  { %v2692_v18 = vpop.f32.mrf.mxu0  ;;  %v2733_v20 = vpop.f32.mrf.mxu1  ;;  %4605 = vmatprep.subr.bf16.mxu0 %v9047_v9  ;;  %4646 = vmatprep.subr.bf16.mxu1 %v9050_v57  ;;  %v9105_v57 = vld [vmem:[%s12084_s1 + $0x10c0] ss:$16 sps:$4 sm:$0xff]  }
 0x1fd   :  { %v9111_v20 = vld [vmem:[%s12084_s1 + $0x10a0] ss:$16 sps:$4 sm:$0xff]  }
 0x1ff   :  { %4606 = vmatpush1.bf16.msra.mxu0 %v9045_v16  ;;  %4647 = vmatpush1.bf16.msra.mxu1 %v9048_v17 }
 0x200   :  { %4607 = vmatprep.subr.bf16.mxu0 %v9053_v6  ;;  %4648 = vmatprep.subr.bf16.mxu1 %v9056_v50 }
 0x203   :  { %4608 = vmatpush1.bf16.msra.mxu0 %v9051_v25  ;;  %4649 = vmatpush1.bf16.msra.mxu1 %v9054_v26  ;;  %v9125_v26 = vld [vmem:[%s12084_s1 + $0x11c4] ss:$16 sps:$4 sm:$0x1f]  }
 0x204   :  { %4619 = vmatprep.subr.bf16.mxu0 %v4585_v28  ;;  %4660 = vmatprep.subr.bf16.mxu1 %v4591_v31  ;;  %v9120_v28 = vld [vmem:[%s12084_s1 + $0x1088] ss:$16 sps:$4 sm:$0xff]   ;;  %v9123_v31 = vld [vmem:[%s12084_s1 + $0x11c0] ss:$16 sps:$4 sm:$0x1f]  }
 0x207   :  { %4620 = vmatpush2.bf16.msra.mxu0 %v4582_v21  ;;  %4661 = vmatpush2.bf16.msra.mxu1 %v4588_v32  ;;  %v9126_v21 = vld [vmem:[%s12084_s1 + $0x11c8] ss:$16 sps:$4 sm:$0x1f]   ;;  %v4973_v32 = vand.u32 %v9125_v26, %v9551_v41 }
 0x208   :  { %4621 = vmatprep.subr.bf16.mxu0 %v9065_v34  ;;  %4662 = vmatprep.subr.bf16.mxu1 %v9068_v23  ;;  %v4979_v34 = vand.u32 %v9128_v29, %v9551_v41  ;;  %v4970_v23 = vand.u32 %v9123_v31, %v9551_v41  ;;  %v9180_v26 = vld [vmem:[%s12084_s1 + $0x1208] ss:$16 sps:$4 sm:$0xff]   ;;  %v9194_v31 = vld [vmem:[%s12084_s1 + $0x132c] ss:$16 sps:$4 sm:$0x1f]  }
 0x20b   :  { %4622 = vmatpush2.bf16.msra.mxu0 %v9063_v35  ;;  %4663 = vmatpush2.bf16.msra.mxu1 %v9066_v37  ;;  %v4976_v35 = vand.u32 %v9126_v21, %v9551_v41  ;;  %v9131_v37 = vld [vmem:[%s12084_s1 + $0x11a4] ss:$16 sps:$4 sm:$0xff]   ;;  %v9183_v21 = vld [vmem:[%s12084_s1 + $0x11e0] ss:$16 sps:$4 sm:$0xff]  }
 0x20c   :  { %4623 = vmatprep.subr.bf16.mxu0 %v9071_v27  ;;  %4664 = vmatprep.subr.bf16.mxu1 %v9074_v39  ;;  %v9134_v27 = vld [vmem:[%s12084_s1 + $0x11ac] ss:$16 sps:$4 sm:$0xff]   ;;  %v9129_v39 = vld [vmem:[%s12084_s1 + $0x11a0] ss:$16 sps:$4 sm:$0xff]  }
 0x20f   :  { %4624 = vmatpush2.bf16.msra.mxu0 %v9069_v42  ;;  %4665 = vmatpush2.bf16.msra.mxu1 %v9072_v30  ;;  %v9132_v42 = vld [vmem:[%s12084_s1 + $0x11a8] ss:$16 sps:$4 sm:$0xff]   ;;  %v9137_v30 = vld [vmem:[%s12084_s1 + $0x1184] ss:$16 sps:$4 sm:$0xff]  }
 0x210   :  { %4981 = vmatprep.subr.bf16.mxu0 %v9077_v43  ;;  %5022 = vmatprep.subr.bf16.mxu1 %v9080_v44  ;;  %v9140_v43 = vld [vmem:[%s12084_s1 + $0x118c] ss:$16 sps:$4 sm:$0xff]   ;;  %v11455_v44 = vld.sshfl [vmem:[%s12083_s0 + $0x1a] sm:$0x11 pattern:$0x75316420] }
 0x212   :  { %4626 = vmatmul.mubr.bf16.vlgmr.msra.gmra.mxu0 %v4353_v33  ;;  %4667 = vmatmul.mubr.bf16.vlgmr.msra.gmra.mxu1 %v4353_v33  ;;  %v9138_v33 = vld [vmem:[%s12084_s1 + $0x1188] ss:$16 sps:$4 sm:$0xff]  }
 0x213   :  { %4982 = vmatpush1.bf16.msra.mxu0 %v9075_v47  ;;  %5023 = vmatpush1.bf16.msra.mxu1 %v9078_v48  ;;  %v9143_v47 = vld [vmem:[%s12084_s1 + $0x12c4] ss:$16 sps:$4 sm:$0xff]   ;;  %v9146_v48 = vld [vmem:[%s12084_s1 + $0x12cc] ss:$16 sps:$4 sm:$0xff]  }
 0x214   :  { %4983 = vmatprep.subr.bf16.mxu0 %v9083_v49  ;;  %5024 = vmatprep.subr.bf16.mxu1 %v9086_v36  ;;  %v5122_v49 = vcombine.high %v11455_v44, %v11455_v44  ;;  %v4741_v36 = vrot.slane %v11295_v40, %v9562_v46  ;;  %v9152_v40 = vld [vmem:[%s12084_s1 + $0x12ac] ss:$16 sps:$4 sm:$0xff]  }
 0x215   :  { %7885 = vmatprep.mubr.msk.bf16.mxu0 %vm360_vm2, %v4748_v52  ;;  %7886 = vmatprep.mubr.msk.bf16.mxu1 %vm360_vm2, %v4748_v52  ;;  %v9141_v52 = vld [vmem:[%s12084_s1 + $0x12c0] ss:$16 sps:$4 sm:$0xff]  }
 0x217   :  { %4984 = vmatpush1.bf16.msra.mxu0 %v9081_v53  ;;  %5025 = vmatpush1.bf16.msra.mxu1 %v9084_v56  ;;  %v9144_v53 = vld [vmem:[%s12084_s1 + $0x12c8] ss:$16 sps:$4 sm:$0xff]   ;;  %v9149_v56 = vld [vmem:[%s12084_s1 + $0x12a4] ss:$16 sps:$4 sm:$0xff]  }
 0x218   :  { %4985 = vmatprep.subr.bf16.mxu0 %v9089_v59  ;;  %5026 = vmatprep.subr.bf16.mxu1 %v9092_v60  ;;  %v5136_v59 = vrot.slane %v5122_v49, %v9562_v46  ;;  %v9147_v60 = vld [vmem:[%s12084_s1 + $0x12a0] ss:$16 sps:$4 sm:$0xff]  }
 0x219   :  { %v9201_v49 = vld [vmem:[%s12084_s1 + $0x12e0] ss:$16 sps:$4 sm:$0xff]  }
 0x21b   :  { %4986 = vmatpush1.bf16.msra.mxu0 %v9087_v61  ;;  %5027 = vmatpush1.bf16.msra.mxu1 %v9090_v0  ;;  %v9150_v61 = vld [vmem:[%s12084_s1 + $0x12a8] ss:$16 sps:$4 sm:$0xff]   ;;  %v9155_v0 = vld [vmem:[%s12084_s1 + $0x1284] ss:$16 sps:$4 sm:$0xff]  }
 0x21c   :  { %4987 = vmatprep.subr.bf16.mxu0 %v9095_v1  ;;  %5028 = vmatprep.subr.bf16.mxu1 %v9098_v2  ;;  %v9158_v1 = vld [vmem:[%s12084_s1 + $0x128c] ss:$16 sps:$4 sm:$0xff]   ;;  %v9153_v2 = vld [vmem:[%s12084_s1 + $0x1280] ss:$16 sps:$4 sm:$0xff]  }
 0x21f   :  { %4988 = vmatpush1.bf16.msra.mxu0 %v9093_v55  ;;  %5029 = vmatpush1.bf16.msra.mxu1 %v9096_v4  ;;  %v9156_v55 = vld [vmem:[%s12084_s1 + $0x1288] ss:$16 sps:$4 sm:$0xff]   ;;  %v9161_v4 = vld [vmem:[%s12084_s1 + $0x1264] ss:$16 sps:$4 sm:$0xff]  }
 0x220   :  { %4989 = vmatprep.subr.bf16.mxu0 %v9101_v5  ;;  %5030 = vmatprep.subr.bf16.mxu1 %v9104_v51  ;;  %v9164_v5 = vld [vmem:[%s12084_s1 + $0x126c] ss:$16 sps:$4 sm:$0xff]   ;;  %v9159_v51 = vld [vmem:[%s12084_s1 + $0x1260] ss:$16 sps:$4 sm:$0xff]  }
 0x222   :  { %v3075_v62 = vpop.f32.mrf.mxu0  ;;  %v3116_v63 = vpop.f32.mrf.mxu1 }
 0x223   :  { %v11377_v13 = vadd.f32 %v3075_v62, %v11217_v10  ;;  %v11380_v9 = vadd.f32 %v3116_v63, %v11220_v11  ;;  %4990 = vmatpush1.bf16.msra.mxu0 %v9099_v7  ;;  %5031 = vmatpush1.bf16.msra.mxu1 %v9102_v8  ;;  %v9113_v10 = vld [vmem:[%s12084_s1 + $0x10a4] ss:$16 sps:$4 sm:$0xff]   ;;  %v9116_v11 = vld [vmem:[%s12084_s1 + $0x10ac] ss:$16 sps:$4 sm:$0xff]   ;;  %v9162_v7 = vld [vmem:[%s12084_s1 + $0x1268] ss:$16 sps:$4 sm:$0xff]  }
 0x224   :  { %v3077_v54 = vpop.f32.mrf.mxu0  ;;  %v3118_v16 = vpop.f32.mrf.mxu1  ;;  %4991 = vmatprep.subr.bf16.mxu0 %v9107_v58  ;;  %5032 = vmatprep.subr.bf16.mxu1 %v9110_v12  ;;  %v9167_v8 = vld [vmem:[%s12084_s1 + $0x1244] ss:$16 sps:$4 sm:$0xff]   ;;  %v9170_v58 = vld [vmem:[%s12084_s1 + $0x124c] ss:$16 sps:$4 sm:$0xff]   ;;  %v9165_v12 = vld [vmem:[%s12084_s1 + $0x1240] ss:$16 sps:$4 sm:$0xff]  }
 0x225   :  { %v11395_v17 = vadd.f32 %v3077_v54, %v11235_v14  ;;  %v11398_v6 = vadd.f32 %v3118_v16, %v11238_v15  ;;  %v9119_v14 = vld [vmem:[%s12084_s1 + $0x1084] ss:$16 sps:$4 sm:$0xff]   ;;  %v9122_v15 = vld [vmem:[%s12084_s1 + $0x108c] ss:$16 sps:$4 sm:$0xff]   ;;  %v9168_v62 = vld [vmem:[%s12084_s1 + $0x1248] ss:$16 sps:$4 sm:$0xff]  }
 0x226   :  { %v3079_v50 = vpop.f32.mrf.mxu0  ;;  %v3120_v18 = vpop.f32.mrf.mxu1  ;;  %v9173_v63 = vld [vmem:[%s12084_s1 + $0x1224] ss:$16 sps:$4 sm:$0xff]  }
 0x227   :  { %4992 = vmatpush1.bf16.msra.mxu0 %v9105_v57  ;;  %5033 = vmatpush1.bf16.msra.mxu1 %v9108_v3  ;;  %v9176_v57 = vld [vmem:[%s12084_s1 + $0x122c] ss:$16 sps:$4 sm:$0xff]   ;;  %v9174_v50 = vld [vmem:[%s12084_s1 + $0x1228] ss:$16 sps:$4 sm:$0xff]  }
 0x228   :  { %v3080_v24 = vpop.f32.mrf.mxu0  ;;  %v3121_v25 = vpop.f32.mrf.mxu1  ;;  %4993 = vmatprep.subr.bf16.mxu0 %v9113_v10  ;;  %5034 = vmatprep.subr.bf16.mxu1 %v9116_v11  ;;  %v9171_v11 = vld [vmem:[%s12084_s1 + $0x1220] ss:$16 sps:$4 sm:$0xff]  }
 0x229   :  { %v9177_v25 = vld [vmem:[%s12084_s1 + $0x1200] ss:$16 sps:$4 sm:$0xff]  }
 0x22b   :  { %4994 = vmatpush1.bf16.msra.mxu0 %v9111_v20  ;;  %5035 = vmatpush1.bf16.msra.mxu1 %v9114_v22 }
 0x22c   :  { %4995 = vmatprep.subr.bf16.mxu0 %v9119_v14  ;;  %5036 = vmatprep.subr.bf16.mxu1 %v9122_v15 }
 0x22f   :  { %4996 = vmatpush1.bf16.msra.mxu0 %v9117_v19  ;;  %5037 = vmatpush1.bf16.msra.mxu1 %v9120_v28  ;;  %v9191_v28 = vld [vmem:[%s12084_s1 + $0x1324] ss:$16 sps:$4 sm:$0x1f]  }
 0x230   :  { %5007 = vmatprep.subr.bf16.mxu0 %v4973_v32  ;;  %5048 = vmatprep.subr.bf16.mxu1 %v4979_v34  ;;  %v9186_v32 = vld [vmem:[%s12084_s1 + $0x11e8] ss:$16 sps:$4 sm:$0xff]   ;;  %v9189_v34 = vld [vmem:[%s12084_s1 + $0x1320] ss:$16 sps:$4 sm:$0x1f]  }
 0x233   :  { %5008 = vmatpush2.bf16.msra.mxu0 %v4970_v23  ;;  %5049 = vmatpush2.bf16.msra.mxu1 %v4976_v35  ;;  %v9192_v23 = vld [vmem:[%s12084_s1 + $0x1328] ss:$16 sps:$4 sm:$0x1f]   ;;  %v5361_v35 = vand.u32 %v9191_v28, %v9551_v41 }
 0x234   :  { %5009 = vmatprep.subr.bf16.mxu0 %v9131_v37  ;;  %5050 = vmatprep.subr.bf16.mxu1 %v9134_v27  ;;  %v5367_v37 = vand.u32 %v9194_v31, %v9551_v41  ;;  %v5358_v27 = vand.u32 %v9189_v34, %v9551_v41  ;;  %v9246_v28 = vld [vmem:[%s12084_s1 + $0x1368] ss:$16 sps:$4 sm:$0xff]   ;;  %v9260_v34 = vld [vmem:[%s12084_s1 + $0x148c] ss:$16 sps:$4 sm:$0x1f]  }
 0x237   :  { %5010 = vmatpush2.bf16.msra.mxu0 %v9129_v39  ;;  %5051 = vmatpush2.bf16.msra.mxu1 %v9132_v42  ;;  %v5364_v39 = vand.u32 %v9192_v23, %v9551_v41  ;;  %v9197_v42 = vld [vmem:[%s12084_s1 + $0x1304] ss:$16 sps:$4 sm:$0xff]   ;;  %v9249_v23 = vld [vmem:[%s12084_s1 + $0x1340] ss:$16 sps:$4 sm:$0xff]  }
 0x238   :  { %5011 = vmatprep.subr.bf16.mxu0 %v9137_v30  ;;  %5052 = vmatprep.subr.bf16.mxu1 %v9140_v43  ;;  %v9200_v30 = vld [vmem:[%s12084_s1 + $0x130c] ss:$16 sps:$4 sm:$0xff]   ;;  %v9195_v43 = vld [vmem:[%s12084_s1 + $0x1300] ss:$16 sps:$4 sm:$0xff]  }
 0x23b   :  { %5012 = vmatpush2.bf16.msra.mxu0 %v9135_v45  ;;  %5053 = vmatpush2.bf16.msra.mxu1 %v9138_v33  ;;  %v9198_v45 = vld [vmem:[%s12084_s1 + $0x1308] ss:$16 sps:$4 sm:$0xff]   ;;  %v9203_v33 = vld [vmem:[%s12084_s1 + $0x12e4] ss:$16 sps:$4 sm:$0xff]  }
 0x23c   :  { %5369 = vmatprep.subr.bf16.mxu0 %v9143_v47  ;;  %5410 = vmatprep.subr.bf16.mxu1 %v9146_v48  ;;  %v9206_v47 = vld [vmem:[%s12084_s1 + $0x12ec] ss:$16 sps:$4 sm:$0xff]  }
 0x23d   :  { %v11615_v48 = vld.sshfl [vmem:[%s12083_s0 + $0x1c] sm:$0x11 pattern:$0x75316420] }
 0x23e   :  { %5014 = vmatmul.mubr.bf16.vlgmr.msra.gmra.mxu0 %v4741_v36  ;;  %5055 = vmatmul.mubr.bf16.vlgmr.msra.gmra.mxu1 %v4741_v36  ;;  %v9204_v36 = vld [vmem:[%s12084_s1 + $0x12e8] ss:$16 sps:$4 sm:$0xff]  }
 0x23f   :  { %5370 = vmatpush1.bf16.msra.mxu0 %v9141_v52  ;;  %5411 = vmatpush1.bf16.msra.mxu1 %v9144_v53  ;;  %v9209_v52 = vld [vmem:[%s12084_s1 + $0x1424] ss:$16 sps:$4 sm:$0xff]   ;;  %v9212_v53 = vld [vmem:[%s12084_s1 + $0x142c] ss:$16 sps:$4 sm:$0xff]  }
 0x240   :  { %5371 = vmatprep.subr.bf16.mxu0 %v9149_v56  ;;  %5412 = vmatprep.subr.bf16.mxu1 %v9152_v40  ;;  %v5510_v56 = vcombine.high %v11615_v48, %v11615_v48  ;;  %v5129_v40 = vrot.slane %v11455_v44, %v9562_v46  ;;  %v9218_v44 = vld [vmem:[%s12084_s1 + $0x140c] ss:$16 sps:$4 sm:$0xff]  }
 0x241   :  { %7977 = vmatprep.mubr.msk.bf16.mxu0 %vm360_vm2, %v5136_v59  ;;  %7978 = vmatprep.mubr.msk.bf16.mxu1 %vm360_vm2, %v5136_v59  ;;  %v9207_v59 = vld [vmem:[%s12084_s1 + $0x1420] ss:$16 sps:$4 sm:$0xff]  }
 0x243   :  { %5372 = vmatpush1.bf16.msra.mxu0 %v9147_v60  ;;  %5413 = vmatpush1.bf16.msra.mxu1 %v9150_v61  ;;  %v9210_v60 = vld [vmem:[%s12084_s1 + $0x1428] ss:$16 sps:$4 sm:$0xff]   ;;  %v9215_v61 = vld [vmem:[%s12084_s1 + $0x1404] ss:$16 sps:$4 sm:$0xff]  }
 0x244   :  { %5373 = vmatprep.subr.bf16.mxu0 %v9155_v0  ;;  %5414 = vmatprep.subr.bf16.mxu1 %v9158_v1  ;;  %v5524_v0 = vrot.slane %v5510_v56, %v9562_v46  ;;  %v9213_v1 = vld [vmem:[%s12084_s1 + $0x1400] ss:$16 sps:$4 sm:$0xff]  }
 0x245   :  { %v9267_v56 = vld [vmem:[%s12084_s1 + $0x1440] ss:$16 sps:$4 sm:$0xff]  }
 0x247   :  { %5374 = vmatpush1.bf16.msra.mxu0 %v9153_v2  ;;  %5415 = vmatpush1.bf16.msra.mxu1 %v9156_v55  ;;  %v9216_v2 = vld [vmem:[%s12084_s1 + $0x1408] ss:$16 sps:$4 sm:$0xff]   ;;  %v9221_v55 = vld [vmem:[%s12084_s1 + $0x13e4] ss:$16 sps:$4 sm:$0xff]  }
 0x248   :  { %5375 = vmatprep.subr.bf16.mxu0 %v9161_v4  ;;  %5416 = vmatprep.subr.bf16.mxu1 %v9164_v5  ;;  %v9224_v4 = vld [vmem:[%s12084_s1 + $0x13ec] ss:$16 sps:$4 sm:$0xff]   ;;  %v9219_v5 = vld [vmem:[%s12084_s1 + $0x13e0] ss:$16 sps:$4 sm:$0xff]  }
 0x24b   :  { %5376 = vmatpush1.bf16.msra.mxu0 %v9159_v51  ;;  %5417 = vmatpush1.bf16.msra.mxu1 %v9162_v7  ;;  %v9222_v51 = vld [vmem:[%s12084_s1 + $0x13e8] ss:$16 sps:$4 sm:$0xff]   ;;  %v9227_v7 = vld [vmem:[%s12084_s1 + $0x13c4] ss:$16 sps:$4 sm:$0xff]  }
 0x24c   :  { %5377 = vmatprep.subr.bf16.mxu0 %v9167_v8  ;;  %5418 = vmatprep.subr.bf16.mxu1 %v9170_v58  ;;  %v9230_v8 = vld [vmem:[%s12084_s1 + $0x13cc] ss:$16 sps:$4 sm:$0xff]   ;;  %v9225_v58 = vld [vmem:[%s12084_s1 + $0x13c0] ss:$16 sps:$4 sm:$0xff]  }
 0x24e   :  { %v3463_v3 = vpop.f32.mrf.mxu0  ;;  %v3504_v54 = vpop.f32.mrf.mxu1 }
 0x24f   :  { %v11537_v16 = vadd.f32 %v3463_v3, %v11377_v13  ;;  %v11540_v10 = vadd.f32 %v3504_v54, %v11380_v9  ;;  %5378 = vmatpush1.bf16.msra.mxu0 %v9165_v12  ;;  %5419 = vmatpush1.bf16.msra.mxu1 %v9168_v62  ;;  %v9179_v13 = vld [vmem:[%s12084_s1 + $0x1204] ss:$16 sps:$4 sm:$0xff]   ;;  %v9182_v9 = vld [vmem:[%s12084_s1 + $0x120c] ss:$16 sps:$4 sm:$0xff]   ;;  %v9228_v12 = vld [vmem:[%s12084_s1 + $0x13c8] ss:$16 sps:$4 sm:$0xff]  }
 0x250   :  { %v3465_v18 = vpop.f32.mrf.mxu0  ;;  %v3506_v20 = vpop.f32.mrf.mxu1  ;;  %5379 = vmatprep.subr.bf16.mxu0 %v9173_v63  ;;  %5420 = vmatprep.subr.bf16.mxu1 %v9176_v57  ;;  %v9233_v62 = vld [vmem:[%s12084_s1 + $0x13a4] ss:$16 sps:$4 sm:$0xff]   ;;  %v9236_v63 = vld [vmem:[%s12084_s1 + $0x13ac] ss:$16 sps:$4 sm:$0xff]   ;;  %v9231_v57 = vld [vmem:[%s12084_s1 + $0x13a0] ss:$16 sps:$4 sm:$0xff]  }
 0x251   :  { %v11555_v22 = vadd.f32 %v3465_v18, %v11395_v17  ;;  %v11558_v14 = vadd.f32 %v3506_v20, %v11398_v6  ;;  %v9185_v17 = vld [vmem:[%s12084_s1 + $0x11e4] ss:$16 sps:$4 sm:$0xff]   ;;  %v9188_v6 = vld [vmem:[%s12084_s1 + $0x11ec] ss:$16 sps:$4 sm:$0xff]   ;;  %v9234_v3 = vld [vmem:[%s12084_s1 + $0x13a8] ss:$16 sps:$4 sm:$0xff]  }
 0x252   :  { %v3467_v15 = vpop.f32.mrf.mxu0  ;;  %v3508_v24 = vpop.f32.mrf.mxu1  ;;  %v9239_v54 = vld [vmem:[%s12084_s1 + $0x1384] ss:$16 sps:$4 sm:$0xff]  }
 0x253   :  { %5380 = vmatpush1.bf16.msra.mxu0 %v9171_v11  ;;  %5421 = vmatpush1.bf16.msra.mxu1 %v9174_v50  ;;  %v9242_v11 = vld [vmem:[%s12084_s1 + $0x138c] ss:$16 sps:$4 sm:$0xff]   ;;  %v9240_v15 = vld [vmem:[%s12084_s1 + $0x1388] ss:$16 sps:$4 sm:$0xff]  }
 0x254   :  { %v3468_v29 = vpop.f32.mrf.mxu0  ;;  %v3509_v19 = vpop.f32.mrf.mxu1  ;;  %5381 = vmatprep.subr.bf16.mxu0 %v9179_v13  ;;  %5422 = vmatprep.subr.bf16.mxu1 %v9182_v9  ;;  %v9237_v9 = vld [vmem:[%s12084_s1 + $0x1380] ss:$16 sps:$4 sm:$0xff]  }
 0x255   :  { %v9243_v19 = vld [vmem:[%s12084_s1 + $0x1360] ss:$16 sps:$4 sm:$0xff]  }
 0x257   :  { %5382 = vmatpush1.bf16.msra.mxu0 %v9177_v25  ;;  %5423 = vmatpush1.bf16.msra.mxu1 %v9180_v26 }
 0x258   :  { %5383 = vmatprep.subr.bf16.mxu0 %v9185_v17  ;;  %5424 = vmatprep.subr.bf16.mxu1 %v9188_v6 }
 0x25b   :  { %5384 = vmatpush1.bf16.msra.mxu0 %v9183_v21  ;;  %5425 = vmatpush1.bf16.msra.mxu1 %v9186_v32  ;;  %v9257_v32 = vld [vmem:[%s12084_s1 + $0x1484] ss:$16 sps:$4 sm:$0x1f]  }
 0x25c   :  { %5395 = vmatprep.subr.bf16.mxu0 %v5361_v35  ;;  %5436 = vmatprep.subr.bf16.mxu1 %v5367_v37  ;;  %v9252_v35 = vld [vmem:[%s12084_s1 + $0x1348] ss:$16 sps:$4 sm:$0xff]   ;;  %v9255_v37 = vld [vmem:[%s12084_s1 + $0x1480] ss:$16 sps:$4 sm:$0x1f]  }
 0x25f   :  { %5396 = vmatpush2.bf16.msra.mxu0 %v5358_v27  ;;  %5437 = vmatpush2.bf16.msra.mxu1 %v5364_v39  ;;  %v9258_v27 = vld [vmem:[%s12084_s1 + $0x1488] ss:$16 sps:$4 sm:$0x1f]   ;;  %v5749_v39 = vand.u32 %v9257_v32, %v9551_v41 }
 0x260   :  { %5397 = vmatprep.subr.bf16.mxu0 %v9197_v42  ;;  %5438 = vmatprep.subr.bf16.mxu1 %v9200_v30  ;;  %v5755_v42 = vand.u32 %v9260_v34, %v9551_v41  ;;  %v5746_v30 = vand.u32 %v9255_v37, %v9551_v41  ;;  %v9312_v32 = vld [vmem:[%s12084_s1 + $0x14c8] ss:$16 sps:$4 sm:$0xff]   ;;  %v9317_v34 = vld [vmem:[%s12084_s1 + $0x14a4] ss:$16 sps:$4 sm:$0xff]  }
 0x261   :  { %v9326_v37 = vld [vmem:[%s12084_s1 + $0x15ec] ss:$16 sps:$4 sm:$0x1f]  }
 0x263   :  { %5398 = vmatpush2.bf16.msra.mxu0 %v9195_v43  ;;  %5439 = vmatpush2.bf16.msra.mxu1 %v9198_v45  ;;  %v5752_v43 = vand.u32 %v9258_v27, %v9551_v41  ;;  %v9263_v45 = vld [vmem:[%s12084_s1 + $0x1464] ss:$16 sps:$4 sm:$0xff]   ;;  %v9315_v27 = vld [vmem:[%s12084_s1 + $0x14a0] ss:$16 sps:$4 sm:$0xff]  }
 0x264   :  { %5399 = vmatprep.subr.bf16.mxu0 %v9203_v33  ;;  %5440 = vmatprep.subr.bf16.mxu1 %v9206_v47  ;;  %v9266_v33 = vld [vmem:[%s12084_s1 + $0x146c] ss:$16 sps:$4 sm:$0xff]   ;;  %v9261_v47 = vld [vmem:[%s12084_s1 + $0x1460] ss:$16 sps:$4 sm:$0xff]  }
 0x267   :  { %5400 = vmatpush2.bf16.msra.mxu0 %v9201_v49  ;;  %5441 = vmatpush2.bf16.msra.mxu1 %v9204_v36  ;;  %v9264_v49 = vld [vmem:[%s12084_s1 + $0x1468] ss:$16 sps:$4 sm:$0xff]   ;;  %v9269_v36 = vld [vmem:[%s12084_s1 + $0x1444] ss:$16 sps:$4 sm:$0xff]  }
 0x268   :  { %5757 = vmatprep.subr.bf16.mxu0 %v9209_v52  ;;  %5798 = vmatprep.subr.bf16.mxu1 %v9212_v53  ;;  %v9272_v52 = vld [vmem:[%s12084_s1 + $0x144c] ss:$16 sps:$4 sm:$0xff]  }
 0x269   :  { %v11775_v53 = vld.sshfl [vmem:[%s12083_s0 + $0x1e] sm:$0x11 pattern:$0x75316420] }
 0x26a   :  { %5402 = vmatmul.mubr.bf16.vlgmr.msra.gmra.mxu0 %v5129_v40  ;;  %5443 = vmatmul.mubr.bf16.vlgmr.msra.gmra.mxu1 %v5129_v40  ;;  %v9270_v40 = vld [vmem:[%s12084_s1 + $0x1448] ss:$16 sps:$4 sm:$0xff]  }
 0x26b   :  { %5758 = vmatpush1.bf16.msra.mxu0 %v9207_v59  ;;  %5799 = vmatpush1.bf16.msra.mxu1 %v9210_v60  ;;  %v9275_v59 = vld [vmem:[%s12084_s1 + $0x1584] ss:$16 sps:$4 sm:$0xff]   ;;  %v9278_v60 = vld [vmem:[%s12084_s1 + $0x158c] ss:$16 sps:$4 sm:$0xff]  }
 0x26c   :  { %5759 = vmatprep.subr.bf16.mxu0 %v9215_v61  ;;  %5800 = vmatprep.subr.bf16.mxu1 %v9218_v44  ;;  %v5898_v61 = vcombine.high %v11775_v53, %v11775_v53  ;;  %v5517_v44 = vrot.slane %v11615_v48, %v9562_v46  ;;  %v9284_v48 = vld [vmem:[%s12084_s1 + $0x156c] ss:$16 sps:$4 sm:$0xff]  }
 0x26d   :  { %8069 = vmatprep.mubr.msk.bf16.mxu0 %vm360_vm2, %v5524_v0  ;;  %8070 = vmatprep.mubr.msk.bf16.mxu1 %vm360_vm2, %v5524_v0  ;;  %v9273_v0 = vld [vmem:[%s12084_s1 + $0x1580] ss:$16 sps:$4 sm:$0xff]  }
 0x26f   :  { %5760 = vmatpush1.bf16.msra.mxu0 %v9213_v1  ;;  %5801 = vmatpush1.bf16.msra.mxu1 %v9216_v2  ;;  %v9276_v1 = vld [vmem:[%s12084_s1 + $0x1588] ss:$16 sps:$4 sm:$0xff]   ;;  %v9281_v2 = vld [vmem:[%s12084_s1 + $0x1564] ss:$16 sps:$4 sm:$0xff]  }
 0x270   :  { %5761 = vmatprep.subr.bf16.mxu0 %v9221_v55  ;;  %5802 = vmatprep.subr.bf16.mxu1 %v9224_v4  ;;  %v5912_v55 = vrot.slane %v5898_v61, %v9562_v46  ;;  %v9279_v4 = vld [vmem:[%s12084_s1 + $0x1560] ss:$16 sps:$4 sm:$0xff]   ;;  %v5905_v61 = vrot.slane %v11775_v53, %v9562_v46  ;;  %v9339_v46 = vld [vmem:[%s12086_s3 + $0x78] sm:$0xff]  }
 0x271   :  { %v9340_v53 = vld [vmem:[%s12086_s3 + $0xf8] sm:$0xff]  }
 0x273   :  { %5762 = vmatpush1.bf16.msra.mxu0 %v9219_v5  ;;  %5803 = vmatpush1.bf16.msra.mxu1 %v9222_v51  ;;  %v9282_v5 = vld [vmem:[%s12084_s1 + $0x1568] ss:$16 sps:$4 sm:$0xff]   ;;  %v9287_v51 = vld [vmem:[%s12084_s1 + $0x1544] ss:$16 sps:$4 sm:$0xff]  }
 0x274   :  { %5763 = vmatprep.subr.bf16.mxu0 %v9227_v7  ;;  %5804 = vmatprep.subr.bf16.mxu1 %v9230_v8  ;;  %v9290_v7 = vld [vmem:[%s12084_s1 + $0x154c] ss:$16 sps:$4 sm:$0xff]   ;;  %v9285_v8 = vld [vmem:[%s12084_s1 + $0x1540] ss:$16 sps:$4 sm:$0xff]  }
 0x277   :  { %5764 = vmatpush1.bf16.msra.mxu0 %v9225_v58  ;;  %5805 = vmatpush1.bf16.msra.mxu1 %v9228_v12  ;;  %v9288_v58 = vld [vmem:[%s12084_s1 + $0x1548] ss:$16 sps:$4 sm:$0xff]   ;;  %v9293_v12 = vld [vmem:[%s12084_s1 + $0x1524] ss:$16 sps:$4 sm:$0xff]  }
 0x278   :  { %5765 = vmatprep.subr.bf16.mxu0 %v9233_v62  ;;  %5806 = vmatprep.subr.bf16.mxu1 %v9236_v63  ;;  %v9296_v62 = vld [vmem:[%s12084_s1 + $0x152c] ss:$16 sps:$4 sm:$0xff]   ;;  %v9291_v63 = vld [vmem:[%s12084_s1 + $0x1520] ss:$16 sps:$4 sm:$0xff]  }
 0x27a   :  { %v3851_v50 = vpop.f32.mrf.mxu0  ;;  %v3892_v18 = vpop.f32.mrf.mxu1 }
 0x27b   :  { %v11697_v20 = vadd.f32 %v3851_v50, %v11537_v16  ;;  %v11700_v13 = vadd.f32 %v3892_v18, %v11540_v10  ;;  %5766 = vmatpush1.bf16.msra.mxu0 %v9231_v57  ;;  %5807 = vmatpush1.bf16.msra.mxu1 %v9234_v3  ;;  %v9245_v16 = vld [vmem:[%s12084_s1 + $0x1364] ss:$16 sps:$4 sm:$0xff]   ;;  %v9248_v10 = vld [vmem:[%s12084_s1 + $0x136c] ss:$16 sps:$4 sm:$0xff]   ;;  %v9294_v57 = vld [vmem:[%s12084_s1 + $0x1528] ss:$16 sps:$4 sm:$0xff]  }
 0x27c   :  { %v3853_v24 = vpop.f32.mrf.mxu0  ;;  %v3894_v25 = vpop.f32.mrf.mxu1  ;;  %5767 = vmatprep.subr.bf16.mxu0 %v9239_v54  ;;  %5808 = vmatprep.subr.bf16.mxu1 %v9242_v11  ;;  %v9299_v3 = vld [vmem:[%s12084_s1 + $0x1504] ss:$16 sps:$4 sm:$0xff]   ;;  %v9302_v54 = vld [vmem:[%s12084_s1 + $0x150c] ss:$16 sps:$4 sm:$0xff]   ;;  %v9297_v11 = vld [vmem:[%s12084_s1 + $0x1500] ss:$16 sps:$4 sm:$0xff]  }
 0x27d   :  { %v11715_v26 = vadd.f32 %v3853_v24, %v11555_v22  ;;  %v11718_v17 = vadd.f32 %v3894_v25, %v11558_v14  ;;  %v9251_v22 = vld [vmem:[%s12084_s1 + $0x1344] ss:$16 sps:$4 sm:$0xff]   ;;  %v9254_v14 = vld [vmem:[%s12084_s1 + $0x134c] ss:$16 sps:$4 sm:$0xff]   ;;  %v9300_v50 = vld [vmem:[%s12084_s1 + $0x1508] ss:$16 sps:$4 sm:$0xff]  }
 0x27e   :  { %v3855_v6 = vpop.f32.mrf.mxu0  ;;  %v3896_v29 = vpop.f32.mrf.mxu1  ;;  %v9305_v18 = vld [vmem:[%s12084_s1 + $0x14e4] ss:$16 sps:$4 sm:$0xff]  }
 0x27f   :  { %5768 = vmatpush1.bf16.msra.mxu0 %v9237_v9  ;;  %5809 = vmatpush1.bf16.msra.mxu1 %v9240_v15  ;;  %v9308_v9 = vld [vmem:[%s12084_s1 + $0x14ec] ss:$16 sps:$4 sm:$0xff]   ;;  %v9306_v6 = vld [vmem:[%s12084_s1 + $0x14e8] ss:$16 sps:$4 sm:$0xff]  }
 0x280   :  { %v3856_v31 = vpop.f32.mrf.mxu0  ;;  %v3897_v21 = vpop.f32.mrf.mxu1  ;;  %5769 = vmatprep.subr.bf16.mxu0 %v9245_v16  ;;  %5810 = vmatprep.subr.bf16.mxu1 %v9248_v10  ;;  %v9303_v10 = vld [vmem:[%s12084_s1 + $0x14e0] ss:$16 sps:$4 sm:$0xff]  }
 0x281   :  { %v9309_v21 = vld [vmem:[%s12084_s1 + $0x14c0] ss:$16 sps:$4 sm:$0xff]  }
 0x283   :  { %5770 = vmatpush1.bf16.msra.mxu0 %v9243_v19  ;;  %5811 = vmatpush1.bf16.msra.mxu1 %v9246_v28 }
 0x284   :  { %5771 = vmatprep.subr.bf16.mxu0 %v9251_v22  ;;  %5812 = vmatprep.subr.bf16.mxu1 %v9254_v14 }
 0x287   :  { %5772 = vmatpush1.bf16.msra.mxu0 %v9249_v23  ;;  %5813 = vmatpush1.bf16.msra.mxu1 %v9252_v35  ;;  %v9323_v35 = vld [vmem:[%s12084_s1 + $0x15e4] ss:$16 sps:$4 sm:$0x1f]  }
 0x288   :  { %5783 = vmatprep.subr.bf16.mxu0 %v5749_v39  ;;  %5824 = vmatprep.subr.bf16.mxu1 %v5755_v42  ;;  %v9318_v39 = vld [vmem:[%s12084_s1 + $0x14a8] ss:$16 sps:$4 sm:$0xff]   ;;  %v9321_v42 = vld [vmem:[%s12084_s1 + $0x15e0] ss:$16 sps:$4 sm:$0x1f]  }
 0x28b   :  { %5784 = vmatpush2.bf16.msra.mxu0 %v5746_v30  ;;  %5825 = vmatpush2.bf16.msra.mxu1 %v5752_v43  ;;  %v9324_v30 = vld [vmem:[%s12084_s1 + $0x15e8] ss:$16 sps:$4 sm:$0x1f]   ;;  %v6137_v43 = vand.u32 %v9323_v35, %v9551_v41 }
 0x28c   :  { %5785 = vmatprep.subr.bf16.mxu0 %v9263_v45  ;;  %5826 = vmatprep.subr.bf16.mxu1 %v9266_v33  ;;  %v6143_v45 = vand.u32 %v9326_v37, %v9551_v41  ;;  %v6134_v33 = vand.u32 %v9321_v42, %v9551_v41  ;;  %v9363_v42 = vld [vmem:[%s12086_s3 + $0x48] sm:$0xff]  }
 0x28f   :  { %5786 = vmatpush2.bf16.msra.mxu0 %v9261_v47  ;;  %5827 = vmatpush2.bf16.msra.mxu1 %v9264_v49  ;;  %v6140_v47 = vand.u32 %v9324_v30, %v9551_v41  ;;  %v9329_v49 = vld [vmem:[%s12084_s1 + $0x15c4] ss:$16 sps:$4 sm:$0xff]   ;;  %v9330_v41 = vld [vmem:[%s12084_s1 + $0x15c8] ss:$16 sps:$4 sm:$0xff]  }
 0x290   :  { %5787 = vmatprep.subr.bf16.mxu0 %v9269_v36  ;;  %5828 = vmatprep.subr.bf16.mxu1 %v9272_v52  ;;  %v9332_v36 = vld [vmem:[%s12084_s1 + $0x15cc] ss:$16 sps:$4 sm:$0xff]   ;;  %v9327_v52 = vld [vmem:[%s12084_s1 + $0x15c0] ss:$16 sps:$4 sm:$0xff]  }
 0x291   :  { %v9364_v30 = vld [vmem:[%s12086_s3 + $0xc8] sm:$0xff]  }
 0x293   :  { %5788 = vmatpush2.bf16.msra.mxu0 %v9267_v56  ;;  %5829 = vmatpush2.bf16.msra.mxu1 %v9270_v40  ;;  %v9335_v56 = vld [vmem:[%s12084_s1 + $0x15a4] ss:$16 sps:$4 sm:$0xff]   ;;  %v9338_v40 = vld [vmem:[%s12084_s1 + $0x15ac] ss:$16 sps:$4 sm:$0xff]  }
 0x294   :  { %6145 = vmatprep.subr.bf16.mxu0 %v9275_v59  ;;  %6186 = vmatprep.subr.bf16.mxu1 %v9278_v60  ;;  %v9333_v59 = vld [vmem:[%s12084_s1 + $0x15a0] ss:$16 sps:$4 sm:$0xff]   ;;  %v9336_v60 = vld [vmem:[%s12084_s1 + $0x15a8] ss:$16 sps:$4 sm:$0xff]  }
 0x296   :  { %5790 = vmatmul.mubr.bf16.vlgmr.msra.gmra.mxu0 %v5517_v44  ;;  %5831 = vmatmul.mubr.bf16.vlgmr.msra.gmra.mxu1 %v5517_v44 }
 0x297   :  { %6146 = vmatpush1.bf16.msra.mxu0 %v9273_v0  ;;  %6187 = vmatpush1.bf16.msra.mxu1 %v9276_v1 }
 0x298   :  { %6147 = vmatprep.subr.bf16.mxu0 %v9281_v2  ;;  %6188 = vmatprep.subr.bf16.mxu1 %v9284_v48 }
 0x299   :  { %8161 = vmatprep.mubr.msk.bf16.mxu0 %vm360_vm2, %v5912_v55  ;;  %8162 = vmatprep.mubr.msk.bf16.mxu1 %vm360_vm2, %v5912_v55 }
 0x29b   :  { %6148 = vmatpush1.bf16.msra.mxu0 %v9279_v4  ;;  %6189 = vmatpush1.bf16.msra.mxu1 %v9282_v5 }
 0x29c   :  { %6149 = vmatprep.subr.bf16.mxu0 %v9287_v51  ;;  %6190 = vmatprep.subr.bf16.mxu1 %v9290_v7 }
 0x29f   :  { %6150 = vmatpush1.bf16.msra.mxu0 %v9285_v8  ;;  %6191 = vmatpush1.bf16.msra.mxu1 %v9288_v58 }
 0x2a0   :  { %6151 = vmatprep.subr.bf16.mxu0 %v9293_v12  ;;  %6192 = vmatprep.subr.bf16.mxu1 %v9296_v62  ;;  %v9341_v12 = vld [vmem:[%s12086_s3 + $0x38] sm:$0xff]  }
 0x2a1   :  { %v9342_v62 = vld [vmem:[%s12086_s3 + $0xb8] sm:$0xff]  }
 0x2a3   :  { %6152 = vmatpush1.bf16.msra.mxu0 %v9291_v63  ;;  %6193 = vmatpush1.bf16.msra.mxu1 %v9294_v57  ;;  %v9343_v63 = vld [vmem:[%s12086_s3 + $0x70] sm:$0xff]  }
 0x2a4   :  { %6153 = vmatprep.subr.bf16.mxu0 %v9299_v3  ;;  %6194 = vmatprep.subr.bf16.mxu1 %v9302_v54  ;;  %v9344_v57 = vld [vmem:[%s12086_s3 + $0xf0] sm:$0xff]  }
 0x2a5   :  { %v9345_v3 = vld [vmem:[%s12086_s3 + $0x30] sm:$0xff]  }
 0x2a6   :  { %v4239_v15 = vpop.f32.mrf.mxu0  ;;  %v4280_v24 = vpop.f32.mrf.mxu1  ;;  %v9346_v54 = vld [vmem:[%s12086_s3 + $0xb0] sm:$0xff]  }
 0x2a7   :  { %v11857_v25 = vadd.f32 %v4239_v15, %v11697_v20  ;;  %v11860_v16 = vadd.f32 %v4280_v24, %v11700_v13  ;;  %6154 = vmatpush1.bf16.msra.mxu0 %v9297_v11  ;;  %6195 = vmatpush1.bf16.msra.mxu1 %v9300_v50  ;;  %v9311_v20 = vld [vmem:[%s12084_s1 + $0x14c4] ss:$16 sps:$4 sm:$0xff]   ;;  %v9314_v13 = vld [vmem:[%s12084_s1 + $0x14cc] ss:$16 sps:$4 sm:$0xff]  }
 0x2a8   :  { %v4241_v29 = vpop.f32.mrf.mxu0  ;;  %v4282_v19 = vpop.f32.mrf.mxu1  ;;  %6155 = vmatprep.subr.bf16.mxu0 %v9305_v18  ;;  %6196 = vmatprep.subr.bf16.mxu1 %v9308_v9  ;;  %v9347_v11 = vld [vmem:[%s12086_s3 + $0x68] sm:$0xff]   ;;  %v9351_v15 = vld [vmem:[%s12086_s3 + $0x60] sm:$0xff]  }
 0x2a9   :  { %v4288_v28 = vadd.f32 %v4241_v29, %v11715_v26  ;;  %v4290_v22 = vadd.f32 %v4282_v19, %v11718_v17  ;;  %v9320_v26 = vld [vmem:[%s12084_s1 + $0x14ac] ss:$16 sps:$4 sm:$0xff]   ;;  %v9352_v24 = vld [vmem:[%s12086_s3 + $0xe0] sm:$0xff]  }
 0x2aa   :  { %v4243_v14 = vpop.f32.mrf.mxu0  ;;  %v4284_v31 = vpop.f32.mrf.mxu1  ;;  %v9348_v50 = vld [vmem:[%s12086_s3 + $0xe8] sm:$0xff]   ;;  %v9357_v29 = vld [vmem:[%s12086_s3 + $0x18] sm:$0xff]  }
 0x2ab   :  { %6156 = vmatpush1.bf16.msra.mxu0 %v9303_v10  ;;  %6197 = vmatpush1.bf16.msra.mxu1 %v9306_v6  ;;  %v9349_v18 = vld [vmem:[%s12086_s3 + $0x28] sm:$0xff]   ;;  %v9355_v10 = vld [vmem:[%s12086_s3 + $0x58] sm:$0xff]  }
 0x2ac   :  { %v4244_v17 = vpop.f32.mrf.mxu0  ;;  %v4285_v23 = vpop.f32.mrf.mxu1  ;;  %6157 = vmatprep.subr.bf16.mxu0 %v9311_v20  ;;  %6198 = vmatprep.subr.bf16.mxu1 %v9314_v13  ;;  %v9350_v9 = vld [vmem:[%s12086_s3 + $0xa8] sm:$0xff]   ;;  %v9356_v6 = vld [vmem:[%s12086_s3 + $0xd8] sm:$0xff]  }
 0x2ad   :  { %v9358_v19 = vld [vmem:[%s12086_s3 + $0x98] sm:$0xff]   ;;  %v9361_v17 = vld [vmem:[%s12086_s3 + $0x10] sm:$0xff]  }
 0x2ae   :  { %v9362_v23 = vld [vmem:[%s12086_s3 + $0x90] sm:$0xff]  }
 0x2af   :  { %6158 = vmatpush1.bf16.msra.mxu0 %v9309_v21  ;;  %6199 = vmatpush1.bf16.msra.mxu1 %v9312_v32  ;;  %v9359_v21 = vld [vmem:[%s12086_s3 + $0x50] sm:$0xff]  }
 0x2b0   :  { %6159 = vmatprep.subr.bf16.mxu0 %v9317_v34  ;;  %6200 = vmatprep.subr.bf16.mxu1 %v9320_v26  ;;  %v9360_v32 = vld [vmem:[%s12086_s3 + $0xd0] sm:$0xff]  }
 0x2b3   :  { %6160 = vmatpush1.bf16.msra.mxu0 %v9315_v27  ;;  %6201 = vmatpush1.bf16.msra.mxu1 %v9318_v39 }
 0x2b4   :  { %6171 = vmatprep.subr.bf16.mxu0 %v6137_v43  ;;  %6212 = vmatprep.subr.bf16.mxu1 %v6143_v45  ;;  %v9365_v43 = vld [vmem:[%s12086_s3 + $0x8] sm:$0xff]  }
 0x2b5   :  { %v9366_v45 = vld [vmem:[%s12086_s3 + $0x88] sm:$0xff]  }
 0x2b7   :  { %6172 = vmatpush2.bf16.msra.mxu0 %v6134_v33  ;;  %6213 = vmatpush2.bf16.msra.mxu1 %v6140_v47  ;;  %v9367_v33 = vld [vmem:[%s12086_s3 + $0x40] sm:$0xff]  }
 0x2b8   :  { %6173 = vmatprep.subr.bf16.mxu0 %v9329_v49  ;;  %6214 = vmatprep.subr.bf16.mxu1 %v9332_v36  ;;  %v9368_v47 = vld [vmem:[%s12086_s3 + $0xc0] sm:$0xff]  }
 0x2b9   :  { %v9369_v49 = vld [vmem:[%s12086_s3] sm:$0xff]  }
 0x2ba   :  { %v9370_v36 = vld [vmem:[%s12086_s3 + $0x80] sm:$0xff]  }
 0x2bb   :  { %6174 = vmatpush2.bf16.msra.mxu0 %v9327_v52  ;;  %6215 = vmatpush2.bf16.msra.mxu1 %v9330_v41  ;;  %v9403_v52 = vmov 0.0  }
 0x2bc   :  { %6175 = vmatprep.subr.bf16.mxu0 %v9335_v56  ;;  %6216 = vmatprep.subr.bf16.mxu1 %v9338_v40 }
 0x2bf   :  { %6176 = vmatpush2.bf16.msra.mxu0 %v9333_v59  ;;  %6217 = vmatpush2.bf16.msra.mxu1 %v9336_v60 }
 0x2c0   :  { %8205 = vmatprep.subr.bf16.mxu0 %v9339_v46  ;;  %8227 = vmatprep.subr.bf16.mxu1 %v9340_v53 }
 0x2c2   :  { %6178 = vmatmul.mubr.bf16.vlgmr.msra.gmra.mxu0 %v5905_v61  ;;  %6219 = vmatmul.mubr.bf16.vlgmr.msra.gmra.mxu1 %v5905_v61 }
 0x2c3   :  { %8206 = vmatpush3.bf16.msra.mxu0 %v9341_v12  ;;  %8228 = vmatpush3.bf16.msra.mxu1 %v9342_v62  ;;  %v6235_v12 = vsub.s32 0, %v9542_v38  ;;  %v6243_v62 = vsub.s32 2, %v9542_v38 }
 0x2c4   :  { %8207 = vmatprep.subr.bf16.mxu0 %v9343_v63  ;;  %8229 = vmatprep.subr.bf16.mxu1 %v9344_v57  ;;  %v6231_v63 = vld [vmem:[%s12085_s2] sm:$0xf]  ;;  %v6239_v57 = vsub.s32 1, %v9542_v38 }
 0x2c7   :  { %8208 = vmatpush3.bf16.msra.mxu0 %v9345_v3  ;;  %8230 = vmatpush3.bf16.msra.mxu1 %v9346_v54  ;;  %v6247_v3 = vsub.s32 3, %v9542_v38 }
 0x2c8   :  { %8209 = vmatprep.subr.bf16.mxu0 %v9347_v11  ;;  %8231 = vmatprep.subr.bf16.mxu1 %v9348_v50  ;;  %v6236_v50 = vrot.slane %v6231_v63, %v6235_v12 }
 0x2cb   :  { %8210 = vmatpush3.bf16.msra.mxu0 %v9349_v18  ;;  %8232 = vmatpush3.bf16.msra.mxu1 %v9350_v9  ;;  %v6244_v18 = vrot.slane %v6231_v63, %v6243_v62 }
 0x2cc   :  { %8211 = vmatprep.subr.bf16.mxu0 %v9351_v15  ;;  %8233 = vmatprep.subr.bf16.mxu1 %v9352_v24  ;;  %v6240_v24 = vrot.slane %v6231_v63, %v6239_v57 }
 0x2d2   :  { %v4627_v44 = vpop.f32.mrf.mxu0  ;;  %v4668_v0 = vpop.f32.mrf.mxu1 }
 0x2d3   :  { %v4675_v1 = vadd.f32 %v4627_v44, %v11857_v25  ;;  %v4677_v2 = vadd.f32 %v4668_v0, %v11860_v16  ;;  %v9353_v25 = vld [vmem:[%s12086_s3 + $0x20] sm:$0xff]  }
 0x2d4   :  { %v4629_v48 = vpop.f32.mrf.mxu0  ;;  %v4670_v55 = vpop.f32.mrf.mxu1  ;;  %v9354_v16 = vld [vmem:[%s12086_s3 + $0xa0] sm:$0xff]   ;;  %8212 = vmatpush3.bf16.msra.mxu0 %v9353_v25  ;;  %v6248_v25 = vrot.slane %v6231_v63, %v6247_v3 }
 0x2d5   :  { %v4676_v4 = vadd.f32 %v4629_v48, %v4288_v28  ;;  %v4678_v5 = vadd.f32 %v4670_v55, %v4290_v22  ;;  %8234 = vmatpush3.bf16.msra.mxu1 %v9354_v16  ;;  %8213 = vmatprep.subr.bf16.mxu0 %v9355_v10 }
 0x2d6   :  { %v4631_v51 = vpop.f32.mrf.mxu0  ;;  %v4672_v7 = vpop.f32.mrf.mxu1  ;;  %8235 = vmatprep.subr.bf16.mxu1 %v9356_v6 }
 0x2d8   :  { %v4632_v8 = vpop.f32.mrf.mxu0  ;;  %v4673_v58 = vpop.f32.mrf.mxu1  ;;  %8214 = vmatpush3.bf16.msra.mxu0 %v9357_v29 }
 0x2d9   :  { %8236 = vmatpush3.bf16.msra.mxu1 %v9358_v19  ;;  %8215 = vmatprep.subr.bf16.mxu0 %v9359_v21 }
 0x2da   :  { %8237 = vmatprep.subr.bf16.mxu1 %v9360_v32 }
 0x2dc   :  { %8216 = vmatpush3.bf16.msra.mxu0 %v9361_v17 }
 0x2dd   :  { %8238 = vmatpush3.bf16.msra.mxu1 %v9362_v23  ;;  %8217 = vmatprep.subr.bf16.mxu0 %v9363_v42  ;;  %v9371_v42 = vld [vmem:[%s12088_s5 + $0x38] sm:$0xff]  }
 0x2de   :  { %8239 = vmatprep.subr.bf16.mxu1 %v9364_v30 }
 0x2e0   :  { %8218 = vmatpush3.bf16.msra.mxu0 %v9365_v43 }
 0x2e1   :  { %8240 = vmatpush3.bf16.msra.mxu1 %v9366_v45  ;;  %8219 = vmatprep.subr.bf16.mxu0 %v9367_v33  ;;  %v9372_v45 = vld [vmem:[%s12088_s5 + $0x30] sm:$0xff]   ;;  %v9373_v33 = vld [vmem:[%s12088_s5 + $0x28] sm:$0xff]  }
 0x2e2   :  { %8241 = vmatprep.subr.bf16.mxu1 %v9368_v47  ;;  %v9374_v47 = vld [vmem:[%s12088_s5 + $0x20] sm:$0xff]  }
 0x2e4   :  { %8220 = vmatpush3.bf16.msra.mxu0 %v9369_v49  ;;  %v9375_v49 = vld [vmem:[%s12088_s5 + $0x18] sm:$0xff]  }
 0x2e5   :  { %8242 = vmatpush3.bf16.msra.mxu1 %v9370_v36  ;;  %8258 = vmatprep.subr.bf16.mxu0 %v9403_v52  ;;  %v9376_v36 = vld [vmem:[%s12088_s5 + $0x10] sm:$0xff]  }
 0x2fe   :  { %v5015_v20 = vpop.f32.mrf.mxu0  ;;  %v5056_v13 = vpop.f32.mrf.mxu1 }
 0x2ff   :  { %v5063_v28 = vadd.f32 %v5015_v20, %v4675_v1  ;;  %v5065_v22 = vadd.f32 %v5056_v13, %v4677_v2 }
 0x300   :  { %v5017_v14 = vpop.f32.mrf.mxu0  ;;  %v5058_v31 = vpop.f32.mrf.mxu1 }
 0x301   :  { %v5064_v34 = vadd.f32 %v5017_v14, %v4676_v4  ;;  %v5066_v26 = vadd.f32 %v5058_v31, %v4678_v5 }
 0x302   :  { %v5019_v35 = vpop.f32.mrf.mxu0  ;;  %v5060_v37 = vpop.f32.mrf.mxu1 }
 0x304   :  { %v5020_v27 = vpop.f32.mrf.mxu0  ;;  %v5061_v39 = vpop.f32.mrf.mxu1 }
 0x32a   :  { %v5403_v41 = vpop.f32.mrf.mxu0  ;;  %v5444_v56 = vpop.f32.mrf.mxu1 }
 0x32b   :  { %v5451_v40 = vadd.f32 %v5403_v41, %v5063_v28  ;;  %v5453_v59 = vadd.f32 %v5444_v56, %v5065_v22  ;;  %v9377_v41 = vld [vmem:[%s12088_s5 + $0x8] sm:$0xff]   ;;  %v9378_v56 = vld [vmem:[%s12088_s5] sm:$0xff]  }
 0x32c   :  { %v5405_v60 = vpop.f32.mrf.mxu0  ;;  %v5446_v61 = vpop.f32.mrf.mxu1 }
 0x32d   :  { %v5452_v44 = vadd.f32 %v5405_v60, %v5064_v34  ;;  %v5454_v0 = vadd.f32 %v5446_v61, %v5066_v26  ;;  %v8163_v60 = vld [vmem:[%s12087_s4] ss:$0 sm:$0xff]  ;;  %s9379_s4 = scalar_lea.vmem %s6729_s19, 32 }
 0x32e   :  { %v5407_v1 = vpop.f32.mrf.mxu0  ;;  %v5448_v2 = vpop.f32.mrf.mxu1  ;;  %p9380_p0 = scmp.ne.s32.totalorder %s6729_s19, %s9379_s4  ;;  %p9385_p2 = scmp.lt.s32.totalorder %s9379_s4, %s9379_s4 }
 0x330   :  { %v5408_v48 = vpop.f32.mrf.mxu0  ;;  %v5449_v55 = vpop.f32.mrf.mxu1  ;;  %p9386_p3 = por %p9385_p2, %p9384_p1 }
 0x332   :  { %p9387_p4 = pnand %p9386_p3, %p9380_p0 }
 0x356   :  { %v5791_v4 = vpop.f32.mrf.mxu0  ;;  %v5832_v5 = vpop.f32.mrf.mxu1 }
 0x357   :  { %v5839_v54 = vadd.f32 %v5791_v4, %v5451_v40  ;;  %v5841_v11 = vadd.f32 %v5832_v5, %v5453_v59 }
 0x358   :  { %v5793_v51 = vpop.f32.mrf.mxu0  ;;  %v5834_v7 = vpop.f32.mrf.mxu1 }
 0x359   :  { %v5840_v16 = vadd.f32 %v5793_v51, %v5452_v44  ;;  %v5842_v10 = vadd.f32 %v5834_v7, %v5454_v0 }
 0x35a   :  { %v5795_v8 = vpop.f32.mrf.mxu0  ;;  %v5836_v58 = vpop.f32.mrf.mxu1 }
 0x35c   :  { %v5796_v46 = vpop.f32.mrf.mxu0  ;;  %v5837_v53 = vpop.f32.mrf.mxu1 }
 0x382   :  { %v6179_v9 = vpop.f32.mrf.mxu0  ;;  %v6220_v15 = vpop.f32.mrf.mxu1 }
 0x383   :  { %v6227_v6 = vadd.f32 %v6179_v9, %v5839_v54  ;;  %v6229_v29 = vadd.f32 %v6220_v15, %v5841_v11 }
 0x384   :  { %v6181_v19 = vpop.f32.mrf.mxu0  ;;  %v6222_v20 = vpop.f32.mrf.mxu1 }
 0x385   :  { %v6253_v13 = vadd.f32 %v6236_v50, %v6227_v6  ;;  %v6255_v28 = vadd.f32 %v6244_v18, %v6229_v29  ;;  %v6228_v22 = vadd.f32 %v6181_v19, %v5840_v16  ;;  %v6230_v14 = vadd.f32 %v6222_v20, %v5842_v10 }
 0x386   :  { %v6183_v31 = vpop.f32.mrf.mxu0  ;;  %v6224_v38 = vpop.f32.mrf.mxu1 }
 0x387   :  { %v6254_v21 = vadd.f32 %v6240_v24, %v6228_v22  ;;  %v6256_v32 = vadd.f32 %v6248_v25, %v6230_v14  ;;  %v6257_v34 = vmax.f32 %v6253_v13, 0.0  ;;  %v6259_v26 = vmax.f32 %v6255_v28, 0.0 }
 0x388   :  { %v6184_v17 = vpop.f32.mrf.mxu0  ;;  %v6225_v23 = vpop.f32.mrf.mxu1 }
 0x389   :  { %v6258_v35 = vmax.f32 %v6254_v21, 0.0  ;;  %v6260_v37 = vmax.f32 %v6256_v32, 0.0  ;;  %v6261_v30 = vpack.c.bf16 %v6257_v34, %v6257_v34  ;;  %v6263_v43 = vpack.c.bf16 %v6259_v26, %v6259_v26 }
 0x38b   :  { %v6262_v27 = vpack.c.bf16 %v6258_v35, %v6258_v35  ;;  %v6264_v39 = vpack.c.bf16 %v6260_v37, %v6260_v37 }
 0x38d   :  { %6560 = vmatprep.mubr.bf16.mxu0 %v6262_v27  ;;  %6600 = vmatprep.mubr.bf16.mxu1 %v6264_v39 }
 0x38e   :  { %6561 = vmatmul.mubr.bf16.vlgmr.msra.gmra.mxu0 %v6261_v30  ;;  %6601 = vmatmul.mubr.bf16.vlgmr.msra.gmra.mxu1 %v6263_v43 }
 0x38f   :  { %8259 = vmatpush3.bf16.msra.mxu0 %v9371_v42  ;;  %8274 = vmatprep.mubr.msk.bf16.mxu0 %vm9404_vm3, %v9403_v52 }
 0x390   :  { %8260 = vmatprep.subr.bf16.mxu0 %v9403_v52 }
 0x393   :  { %8261 = vmatpush3.bf16.msra.mxu0 %v9372_v45 }
 0x394   :  { %8262 = vmatprep.subr.bf16.mxu0 %v9403_v52 }
 0x397   :  { %8263 = vmatpush3.bf16.msra.mxu0 %v9373_v33 }
 0x398   :  { %8264 = vmatprep.subr.bf16.mxu0 %v9403_v52 }
 0x39b   :  { %8265 = vmatpush3.bf16.msra.mxu0 %v9374_v47 }
 0x39c   :  { %8266 = vmatprep.subr.bf16.mxu0 %v9403_v52 }
 0x39f   :  { %8267 = vmatpush3.bf16.msra.mxu0 %v9375_v49 }
 0x3a0   :  { %8268 = vmatprep.subr.bf16.mxu0 %v9403_v52 }
 0x3a3   :  { %8269 = vmatpush3.bf16.msra.mxu0 %v9376_v36 }
 0x3a4   :  { %8270 = vmatprep.subr.bf16.mxu0 %v9403_v52 }
 0x3a7   :  { %8271 = vmatpush3.bf16.msra.mxu0 %v9377_v41 }
 0x3a8   :  { %8272 = vmatprep.subr.bf16.mxu0 %v9403_v52  ;;  %v8196_v52 = vld [vmem:[%s12089_s6] ss:$0 sm:$0xff] }
 0x3ab   :  { %8273 = vmatpush3.bf16.msra.mxu0 %v9378_v56 }
 0x44e   :  { %v8221_v40 = vpop.f32.mrf.mxu0  ;;  %v8243_v59 = vpop.f32.mrf.mxu1 }
 0x450   :  { %v8222_v61 = vpop.f32.mrf.mxu0  ;;  %v8244_v44 = vpop.f32.mrf.mxu1 }
 0x451   :  { %v8223_v0 = vadd.f32 %v8222_v61, %v8221_v40  ;;  %v8245_v55 = vadd.f32 %v8244_v44, %v8243_v59 }
 0x452   :  { %v8224_v1 = vpop.f32.mrf.mxu0  ;;  %v8246_v2 = vpop.f32.mrf.mxu1 }
 0x453   :  { %v6563_v48 = vadd.f32 %v8223_v0, %v8163_v60 }
 0x454   :  { %v8225_v4 = vpop.f32.mrf.mxu0  ;;  %v8247_v5 = vpop.f32.mrf.mxu1 }
 0x455   :  { %v6603_v51 = vadd.f32 %v8245_v55, %v6563_v48 }
 0x457   :  { %v6608_v7 = vmax.f32 %v6603_v51, 0.0 }
 0x459   :  { %v6609_v8 = vpack.c.bf16 %v6608_v7, %v6608_v7 }
 0x45b   :  { %8275 = vmatmul.mubr.bf16.vlgmr.msra.gmra.mxu0 %v6609_v8 }
 0x51b   :  { %v6715_v58 = vpop.f32.mrf.mxu0 }
 0x51c   :  { %v6716_v46 = vadd.f32 %v8196_v52, %v6715_v58 }
 0x51d   :  { %v8276_v53 = vpop.f32.mrf.mxu0 }
 0x51e   :  { %6721 = vst [vmem:[#allocation2] sm:$0x3] %v6716_v46 }
 0x51f   :  { %v6718_v12 = vpop.f32.mrf.mxu0 }
 0x520   :  { %9390 = shalt.err (!%p9387_p4)
}
 0x521   :  { %6731 = dma.vmem_to_hbm [thread:$0]  %s6729_s19, 32, %s12090_s7, [#allocation3]   ;;  %v8277_v62 = vpop.f32.mrf.mxu0 }
 0x522   :  { %9399 = dma.done.wait [#allocation3], 32  }
 0x523   :  { %9400 = vsyncadd [#allocation3], 4294967264 }
 0x524   :  { %6735 = vsyncpa [#allocation3], 1 }

</bundles_post_ra>
